<compile_context>
chip_gen: v6e
topology: v6e:2x2x1
jax: 0.10.0
libtpu: 0.0.40
codegen_flags: <defaults>
</compile_context>

<pallas_src>
import jax
import jax.numpy as jnp
from jax.experimental import pallas as pl
from jax.experimental.pallas import tpu as pltpu

_K = 3      # Conv1d kernel size (all layers)
_OFF = 8    # sublane-aligned offset of the activation interior in pad buffers


def init_params(key, emb_dim, n_hidden, n_classes):
    """PyTorch-style uniform(+-1/sqrt(fan_in)) init, stored in matmul layout."""
    conv_defs = ((emb_dim, n_hidden), (n_hidden, n_hidden), (n_hidden, 2 * n_hidden),
                 (2 * n_hidden, 2 * n_hidden), (2 * n_hidden, 3 * n_hidden))
    lin_defs = ((6 * n_hidden, 4 * n_hidden), (4 * n_hidden, 4 * n_hidden),
                (4 * n_hidden, 4 * n_hidden), (4 * n_hidden, n_classes))
    keys = jax.random.split(key, 2 * (len(conv_defs) + len(lin_defs)))
    ki = iter(keys)
    conv_w, conv_b, lin_w, lin_b = [], [], [], []
    for cin, cout in conv_defs:
        bound = 1.0 / (cin * _K) ** 0.5
        conv_w.append(jax.random.uniform(next(ki), (_K, cin, cout), jnp.float32, -bound, bound))
        conv_b.append(jax.random.uniform(next(ki), (1, cout), jnp.float32, -bound, bound))
    for fin, fout in lin_defs:
        bound = 1.0 / fin ** 0.5
        lin_w.append(jax.random.uniform(next(ki), (fin, fout), jnp.float32, -bound, bound))
        lin_b.append(jax.random.uniform(next(ki), (1, fout), jnp.float32, -bound, bound))
    return {"conv_w": conv_w, "conv_b": conv_b, "lin_w": lin_w, "lin_b": lin_b}


def make_forward(*, emb_dim, n_hidden, n_classes, seq_len, batch, block_batch=1):
    """Builds jitted forward(params, head_ncl, body_ncl) -> [batch, n_classes]."""
    assert batch % block_batch == 0
    bt = block_batch

    pads = (3, 3, 3, 1, 1)
    pools = (True, True, True, False, False)
    cins = (emb_dim, n_hidden, n_hidden, 2 * n_hidden, 2 * n_hidden)
    couts = (n_hidden, n_hidden, 2 * n_hidden, 2 * n_hidden, 3 * n_hidden)

    # Static length plan: Conv1d Lout = L + 2p - 2 ; MaxPool1d(2) floors.
    plan = []                                  # (lin, lout, lbuf) per conv layer
    lin = seq_len
    for pad, pool in zip(pads, pools):
        lout = lin + 2 * pad - (_K - 1)
        plan.append((lin, lout, _OFF + lin + pad))
        lin = lout // 2 if pool else lout
    assert lin >= 1 and all(lo >= 1 for _, lo, _ in plan), "sequence too short"

    f3 = 3 * n_hidden                          # per-stream feature width
    lin_dims = ((6 * n_hidden, 4 * n_hidden), (4 * n_hidden, 4 * n_hidden),
                (4 * n_hidden, 4 * n_hidden), (4 * n_hidden, n_classes))

    def kernel(head_ref, body_ref,
               cw1, cb1, cw2, cb2, cw3, cb3, cw4, cb4, cw5, cb5,
               lw1, lb1, lw2, lb2, lw3, lb3, lw4, lb4,
               out_ref,
               pb1, pb2, pb3, pb4, pb5):
        conv_w = (cw1, cw2, cw3, cw4, cw5)
        conv_b = (cb1, cb2, cb3, cb4, cb5)
        pbufs = (pb1, pb2, pb3, pb4, pb5)

        def maxpool2(y, lout):
            """MaxPool1d(2) along axis 1 via even/odd selection matmuls (exact)."""
            lh = lout // 2
            rows = jax.lax.broadcasted_iota(jnp.int32, (lh, lout), 0)
            cols = jax.lax.broadcasted_iota(jnp.int32, (lh, lout), 1)
            sel_e = jnp.broadcast_to((cols == 2 * rows).astype(jnp.float32)[None],
                                     (bt, lh, lout))
            sel_o = jnp.broadcast_to((cols == 2 * rows + 1).astype(jnp.float32)[None],
                                     (bt, lh, lout))
            y_e = jnp.einsum('bjs,bsc->bjc', sel_e, y,
                             preferred_element_type=jnp.float32)
            y_o = jnp.einsum('bjs,bsc->bjc', sel_o, y,
                             preferred_element_type=jnp.float32)
            return jnp.maximum(y_e, y_o)

        def conv_tower(x):
            """[bt, seq_len, emb_dim] -> [bt, 3*n_hidden] (max over time)."""
            act = x
            for li in range(5):
                lin_l, lout, _ = plan[li]
                pad, pool = pads[li], pools[li]
                cin, cout = cins[li], couts[li]
                pbuf, w_ref, b_ref = pbufs[li], conv_w[li], conv_b[li]

                # zero-padded activation; interior at aligned sublane offset _OFF
                pbuf[...] = jnp.zeros_like(pbuf)
                pbuf[:, _OFF:_OFF + lin_l, :] = act

                y = None
                for k in range(_K):                          # K shifted matmuls
                    start = _OFF - pad + k                   # static offset
                    xk = pbuf[:, start:start + lout, :]      # [bt, lout, cin]
                    wk = jnp.broadcast_to(w_ref[k][None], (bt, cin, cout))
                    t = jnp.einsum('blc,bcd->bld', xk, wk,
                                   preferred_element_type=jnp.float32)
                    y = t if y is None else y + t
                y = jnp.maximum(y + b_ref[...], 0.0)         # bias + ReLU (Dropout=id)
                if pool:
                    y = maxpool2(y, lout)
                act = y
            return jnp.max(act, axis=1)                      # [bt, 3*n_hidden]

        feat_h = conv_tower(head_ref[...])
        feat_b = conv_tower(body_ref[...])

        # Fused MLP head.  cat([head, body], dim=1) @ W1
        #   == head @ W1[:f3] + body @ W1[f3:]  (avoids an in-kernel concat).
        h = (jnp.dot(feat_h, lw1[0:f3, :], preferred_element_type=jnp.float32)
             + jnp.dot(feat_b, lw1[f3:2 * f3, :], preferred_element_type=jnp.float32)
             + lb1[...])
        h = jnp.maximum(h, 0.0)
        h = jnp.maximum(jnp.dot(h, lw2[...], preferred_element_type=jnp.float32)
                        + lb2[...], 0.0)
        h = jnp.maximum(jnp.dot(h, lw3[...], preferred_element_type=jnp.float32)
                        + lb3[...], 0.0)
        o = jnp.dot(h, lw4[...], preferred_element_type=jnp.float32) + lb4[...]
        out_ref[:, 0, :] = o.astype(out_ref.dtype)

    in_specs = [
        pl.BlockSpec((bt, seq_len, emb_dim), lambda i: (i, 0, 0)),   # head
        pl.BlockSpec((bt, seq_len, emb_dim), lambda i: (i, 0, 0)),   # body
    ]
    for cin, cout in zip(cins, couts):
        in_specs.append(pl.BlockSpec((_K, cin, cout), lambda i: (0, 0, 0)))
        in_specs.append(pl.BlockSpec((1, cout), lambda i: (0, 0)))
    for fin, fout in lin_dims:
        in_specs.append(pl.BlockSpec((fin, fout), lambda i: (0, 0)))
        in_specs.append(pl.BlockSpec((1, fout), lambda i: (0, 0)))

    scratch_shapes = [pltpu.VMEM((bt, lbuf, cin), jnp.float32)
                      for (_, _, lbuf), cin in zip(plan, cins)]

    fused = pl.pallas_call(
        kernel,
        grid=(batch // bt,),
        in_specs=in_specs,
        out_specs=pl.BlockSpec((bt, 1, n_classes), lambda i: (i, 0, 0)),
        out_shape=jax.ShapeDtypeStruct((batch, 1, n_classes), jnp.float32),
        scratch_shapes=scratch_shapes,
        compiler_params=pltpu.CompilerParams(
            dimension_semantics=("parallel",),          # megacore-shardable on v7x
            vmem_limit_bytes=32 * 1024 * 1024),
    )

    @jax.jit
    def forward(params, head_ncl, body_ncl):
        # NCL -> NLC (lane = channels) once at the boundary; all intermediates
        # stay inside the fused kernel in VMEM.
        head = jnp.transpose(head_ncl, (0, 2, 1)).astype(jnp.float32)
        body = jnp.transpose(body_ncl, (0, 2, 1)).astype(jnp.float32)
        args = [head, body]
        for w, b in zip(params["conv_w"], params["conv_b"]):
            args += [w, b]
        for w, b in zip(params["lin_w"], params["lin_b"]):
            args += [w, b]
        out = fused(*args)
        return out.reshape(batch, n_classes)

    return forward


if __name__ == "__main__":
    emb_dim, n_hidden, n_classes = 8, 16, 4
    batch, seq_len = 2, 12

    root = jax.random.PRNGKey(0)
    k_head, k_body, k_params = jax.random.split(root, 3)

    head = jax.random.normal(k_head, (batch, emb_dim, seq_len), jnp.float32)  # NCL
    body = jax.random.normal(k_body, (batch, emb_dim, seq_len), jnp.float32)  # NCL
    params = init_params(k_params, emb_dim, n_hidden, n_classes)

    forward = make_forward(emb_dim=emb_dim, n_hidden=n_hidden, n_classes=n_classes,
                           seq_len=seq_len, batch=batch, block_batch=1)

    out = jax.block_until_ready(forward(params, head, body))

    assert out.shape == (batch, n_classes), out.shape
    assert bool(jnp.all(jnp.isfinite(out)))
    print("KERNEL_OK")
</pallas_src>

<mosaic_0001>
module attributes {stable_mosaic.version = 11 : i64} {
  func.func @kernel(%arg0: i32, %arg1: memref<1x12x8xf32, #tpu.memory_space<vmem>>, %arg2: memref<1x12x8xf32, #tpu.memory_space<vmem>>, %arg3: memref<3x8x16xf32, #tpu.memory_space<vmem>>, %arg4: memref<1x16xf32, #tpu.memory_space<vmem>>, %arg5: memref<3x16x16xf32, #tpu.memory_space<vmem>>, %arg6: memref<1x16xf32, #tpu.memory_space<vmem>>, %arg7: memref<3x16x32xf32, #tpu.memory_space<vmem>>, %arg8: memref<1x32xf32, #tpu.memory_space<vmem>>, %arg9: memref<3x32x32xf32, #tpu.memory_space<vmem>>, %arg10: memref<1x32xf32, #tpu.memory_space<vmem>>, %arg11: memref<3x32x48xf32, #tpu.memory_space<vmem>>, %arg12: memref<1x48xf32, #tpu.memory_space<vmem>>, %arg13: memref<96x64xf32, #tpu.memory_space<vmem>>, %arg14: memref<1x64xf32, #tpu.memory_space<vmem>>, %arg15: memref<64x64xf32, #tpu.memory_space<vmem>>, %arg16: memref<1x64xf32, #tpu.memory_space<vmem>>, %arg17: memref<64x64xf32, #tpu.memory_space<vmem>>, %arg18: memref<1x64xf32, #tpu.memory_space<vmem>>, %arg19: memref<64x4xf32, #tpu.memory_space<vmem>>, %arg20: memref<1x4xf32, #tpu.memory_space<vmem>>, %arg21: memref<1x1x4xf32, #tpu.memory_space<vmem>>, %arg22: memref<1x23x8xf32, #tpu.memory_space<vmem>>, %arg23: memref<1x19x16xf32, #tpu.memory_space<vmem>>, %arg24: memref<1x17x16xf32, #tpu.memory_space<vmem>>, %arg25: memref<1x14x32xf32, #tpu.memory_space<vmem>>, %arg26: memref<1x14x32xf32, #tpu.memory_space<vmem>>) attributes {dimension_semantics = [#tpu.dimension_semantics<parallel>], iteration_bounds = array<i64: 2>, scalar_prefetch = 0 : i64, scratch_operands = 5 : i64, tpu.core_type = #tpu.core_type<tc>, window_params = [{transform_indices = @transform_0, window_bounds = array<i64: 1, 12, 8>}, {transform_indices = @transform_1, window_bounds = array<i64: 1, 12, 8>}, {pipeline_mode = #tpu.pipeline_mode<synchronous>, transform_indices = @transform_2, window_bounds = array<i64: 3, 8, 16>}, {pipeline_mode = #tpu.pipeline_mode<synchronous>, transform_indices = @transform_3, window_bounds = array<i64: 1, 16>}, {pipeline_mode = #tpu.pipeline_mode<synchronous>, transform_indices = @transform_4, window_bounds = array<i64: 3, 16, 16>}, {pipeline_mode = #tpu.pipeline_mode<synchronous>, transform_indices = @transform_5, window_bounds = array<i64: 1, 16>}, {pipeline_mode = #tpu.pipeline_mode<synchronous>, transform_indices = @transform_6, window_bounds = array<i64: 3, 16, 32>}, {pipeline_mode = #tpu.pipeline_mode<synchronous>, transform_indices = @transform_7, window_bounds = array<i64: 1, 32>}, {pipeline_mode = #tpu.pipeline_mode<synchronous>, transform_indices = @transform_8, window_bounds = array<i64: 3, 32, 32>}, {pipeline_mode = #tpu.pipeline_mode<synchronous>, transform_indices = @transform_9, window_bounds = array<i64: 1, 32>}, {pipeline_mode = #tpu.pipeline_mode<synchronous>, transform_indices = @transform_10, window_bounds = array<i64: 3, 32, 48>}, {pipeline_mode = #tpu.pipeline_mode<synchronous>, transform_indices = @transform_11, window_bounds = array<i64: 1, 48>}, {pipeline_mode = #tpu.pipeline_mode<synchronous>, transform_indices = @transform_12, window_bounds = array<i64: 96, 64>}, {pipeline_mode = #tpu.pipeline_mode<synchronous>, transform_indices = @transform_13, window_bounds = array<i64: 1, 64>}, {pipeline_mode = #tpu.pipeline_mode<synchronous>, transform_indices = @transform_14, window_bounds = array<i64: 64, 64>}, {pipeline_mode = #tpu.pipeline_mode<synchronous>, transform_indices = @transform_15, window_bounds = array<i64: 1, 64>}, {pipeline_mode = #tpu.pipeline_mode<synchronous>, transform_indices = @transform_16, window_bounds = array<i64: 64, 64>}, {pipeline_mode = #tpu.pipeline_mode<synchronous>, transform_indices = @transform_17, window_bounds = array<i64: 1, 64>}, {pipeline_mode = #tpu.pipeline_mode<synchronous>, transform_indices = @transform_18, window_bounds = array<i64: 64, 4>}, {pipeline_mode = #tpu.pipeline_mode<synchronous>, transform_indices = @transform_19, window_bounds = array<i64: 1, 4>}, {transform_indices = @transform_20, window_bounds = array<i64: 1, 1, 4>}]} {
    %c0 = arith.constant 0 : index
    %c0_0 = arith.constant 0 : index
    %c0_1 = arith.constant 0 : index
    %0 = vector.load %arg1[%c0, %c0_0, %c0_1] : memref<1x12x8xf32, #tpu.memory_space<vmem>>, vector<1x12x8xf32>
    %cst = arith.constant 0.000000e+00 : f32
    %1 = vector.broadcast %cst : f32 to vector<1x23x8xf32>
    %c0_2 = arith.constant 0 : index
    %c0_3 = arith.constant 0 : index
    %c0_4 = arith.constant 0 : index
    %2 = vector.load %arg22[%c0_2, %c0_3, %c0_4] : memref<1x23x8xf32, #tpu.memory_space<vmem>>, vector<1x23x8xf32>
    tpu.vector_store %arg22[%c0_2, %c0_3, %c0_4], %1 {strides = array<i32>} : memref<1x23x8xf32, #tpu.memory_space<vmem>>, vector<1x23x8xf32>,
    %c0_5 = arith.constant 0 : index
    %c8 = arith.constant 8 : index
    %c0_6 = arith.constant 0 : index
    %3 = vector.load %arg22[%c0_5, %c8, %c0_6] : memref<1x23x8xf32, #tpu.memory_space<vmem>>, vector<1x12x8xf32>
    tpu.vector_store %arg22[%c0_5, %c8, %c0_6], %0 {strides = array<i32>} : memref<1x23x8xf32, #tpu.memory_space<vmem>>, vector<1x12x8xf32>,
    %c0_7 = arith.constant 0 : index
    %c5 = arith.constant 5 : index
    %c0_8 = arith.constant 0 : index
    %4 = vector.load %arg22[%c0_7, %c5, %c0_8] : memref<1x23x8xf32, #tpu.memory_space<vmem>>, vector<1x16x8xf32>
    %c0_9 = arith.constant 0 : index
    %c0_10 = arith.constant 0 : index
    %c0_11 = arith.constant 0 : index
    %5 = vector.load %arg3[%c0_9, %c0_10, %c0_11] : memref<3x8x16xf32, #tpu.memory_space<vmem>>, vector<1x8x16xf32>
    %6 = vector.shape_cast %5 : vector<1x8x16xf32> to vector<8x16xf32>
    %7 = vector.shape_cast %6 : vector<8x16xf32> to vector<1x8x16xf32>
    "tpu.trace_start"() <{level = 10 : i32, message = "blc,bcd->bld"}> : () -> ()
    %cst_12 = arith.constant dense<0.000000e+00> : vector<1x16x16xf32>
    %8 = tpu.matmul %4, %7, %cst_12 {dimension_numbers = #tpu.dot_dimension_numbers<[2], [1], [1], [2], [0, 0, 0, 1, 1, 2], [0], [0]>} : vector<1x16x8xf32>, vector<1x8x16xf32>, vector<1x16x16xf32> -> vector<1x16x16xf32>
    "tpu.trace_stop"() : () -> ()
    %c0_13 = arith.constant 0 : index
    %c6 = arith.constant 6 : index
    %c0_14 = arith.constant 0 : index
    %9 = vector.load %arg22[%c0_13, %c6, %c0_14] : memref<1x23x8xf32, #tpu.memory_space<vmem>>, vector<1x16x8xf32>
    %c1 = arith.constant 1 : index
    %c0_15 = arith.constant 0 : index
    %c0_16 = arith.constant 0 : index
    %10 = vector.load %arg3[%c1, %c0_15, %c0_16] : memref<3x8x16xf32, #tpu.memory_space<vmem>>, vector<1x8x16xf32>
    %11 = vector.shape_cast %10 : vector<1x8x16xf32> to vector<8x16xf32>
    %12 = vector.shape_cast %11 : vector<8x16xf32> to vector<1x8x16xf32>
    "tpu.trace_start"() <{level = 10 : i32, message = "blc,bcd->bld"}> : () -> ()
    %cst_17 = arith.constant dense<0.000000e+00> : vector<1x16x16xf32>
    %13 = tpu.matmul %9, %12, %cst_17 {dimension_numbers = #tpu.dot_dimension_numbers<[2], [1], [1], [2], [0, 0, 0, 1, 1, 2], [0], [0]>} : vector<1x16x8xf32>, vector<1x8x16xf32>, vector<1x16x16xf32> -> vector<1x16x16xf32>
    "tpu.trace_stop"() : () -> ()
    %14 = arith.addf %8, %13 : vector<1x16x16xf32>
    %c0_18 = arith.constant 0 : index
    %c7 = arith.constant 7 : index
    %c0_19 = arith.constant 0 : index
    %15 = vector.load %arg22[%c0_18, %c7, %c0_19] : memref<1x23x8xf32, #tpu.memory_space<vmem>>, vector<1x16x8xf32>
    %c2 = arith.constant 2 : index
    %c0_20 = arith.constant 0 : index
    %c0_21 = arith.constant 0 : index
    %16 = vector.load %arg3[%c2, %c0_20, %c0_21] : memref<3x8x16xf32, #tpu.memory_space<vmem>>, vector<1x8x16xf32>
    %17 = vector.shape_cast %16 : vector<1x8x16xf32> to vector<8x16xf32>
    %18 = vector.shape_cast %17 : vector<8x16xf32> to vector<1x8x16xf32>
    "tpu.trace_start"() <{level = 10 : i32, message = "blc,bcd->bld"}> : () -> ()
    %cst_22 = arith.constant dense<0.000000e+00> : vector<1x16x16xf32>
    %19 = tpu.matmul %15, %18, %cst_22 {dimension_numbers = #tpu.dot_dimension_numbers<[2], [1], [1], [2], [0, 0, 0, 1, 1, 2], [0], [0]>} : vector<1x16x8xf32>, vector<1x8x16xf32>, vector<1x16x16xf32> -> vector<1x16x16xf32>
    "tpu.trace_stop"() : () -> ()
    %20 = arith.addf %14, %19 : vector<1x16x16xf32>
    %c0_23 = arith.constant 0 : index
    %c0_24 = arith.constant 0 : index
    %21 = vector.load %arg4[%c0_23, %c0_24] : memref<1x16xf32, #tpu.memory_space<vmem>>, vector<1x16xf32>
    %22 = vector.shape_cast %21 : vector<1x16xf32> to vector<1x1x16xf32>
    %23 = vector.broadcast %22 : vector<1x1x16xf32> to vector<1x16x16xf32>
    %24 = arith.addf %20, %23 : vector<1x16x16xf32>
    %cst_25 = arith.constant 0.000000e+00 : f32
    %25 = vector.broadcast %cst_25 : f32 to vector<1x16x16xf32>
    %26 = arith.maximumf %24, %25 : vector<1x16x16xf32>
    %27 = tpu.iota {dimensions = array<i32: 0>} : vector<8x16xi32>
    %28 = tpu.iota {dimensions = array<i32: 1>} : vector<8x16xi32>
    %c2_i32 = arith.constant 2 : i32
    %29 = vector.broadcast %c2_i32 : i32 to vector<8x16xi32>
    %30 = arith.muli %29, %27 : vector<8x16xi32>
    %31 = arith.cmpi eq, %28, %30 : vector<8x16xi32>
    %32 = arith.extui %31 : vector<8x16xi1> to vector<8x16xi32>
    %33 = arith.sitofp %32 : vector<8x16xi32> to vector<8x16xf32>
    %34 = vector.shape_cast %33 : vector<8x16xf32> to vector<1x8x16xf32>
    %c2_i32_26 = arith.constant 2 : i32
    %35 = vector.broadcast %c2_i32_26 : i32 to vector<8x16xi32>
    %36 = arith.muli %35, %27 : vector<8x16xi32>
    %c1_i32 = arith.constant 1 : i32
    %37 = vector.broadcast %c1_i32 : i32 to vector<8x16xi32>
    %38 = arith.addi %36, %37 : vector<8x16xi32>
    %39 = arith.cmpi eq, %28, %38 : vector<8x16xi32>
    %40 = arith.extui %39 : vector<8x16xi1> to vector<8x16xi32>
    %41 = arith.sitofp %40 : vector<8x16xi32> to vector<8x16xf32>
    %42 = vector.shape_cast %41 : vector<8x16xf32> to vector<1x8x16xf32>
    "tpu.trace_start"() <{level = 10 : i32, message = "bjs,bsc->bjc"}> : () -> ()
    %cst_27 = arith.constant dense<0.000000e+00> : vector<1x8x16xf32>
    %43 = tpu.matmul %34, %26, %cst_27 {dimension_numbers = #tpu.dot_dimension_numbers<[2], [1], [1], [2], [0, 0, 0, 1, 1, 2], [0], [0]>} : vector<1x8x16xf32>, vector<1x16x16xf32>, vector<1x8x16xf32> -> vector<1x8x16xf32>
    %cst_28 = arith.constant dense<0.000000e+00> : vector<1x8x16xf32>
    %44 = tpu.matmul %42, %26, %cst_28 {dimension_numbers = #tpu.dot_dimension_numbers<[2], [1], [1], [2], [0, 0, 0, 1, 1, 2], [0], [0]>} : vector<1x8x16xf32>, vector<1x16x16xf32>, vector<1x8x16xf32> -> vector<1x8x16xf32>
    "tpu.trace_stop"() : () -> ()
    %45 = arith.maximumf %43, %44 : vector<1x8x16xf32>
    %cst_29 = arith.constant 0.000000e+00 : f32
    %46 = vector.broadcast %cst_29 : f32 to vector<1x19x16xf32>
    %c0_30 = arith.constant 0 : index
    %c0_31 = arith.constant 0 : index
    %c0_32 = arith.constant 0 : index
    %47 = vector.load %arg23[%c0_30, %c0_31, %c0_32] : memref<1x19x16xf32, #tpu.memory_space<vmem>>, vector<1x19x16xf32>
    tpu.vector_store %arg23[%c0_30, %c0_31, %c0_32], %46 {strides = array<i32>} : memref<1x19x16xf32, #tpu.memory_space<vmem>>, vector<1x19x16xf32>,
    %c0_33 = arith.constant 0 : index
    %c8_34 = arith.constant 8 : index
    %c0_35 = arith.constant 0 : index
    %48 = vector.load %arg23[%c0_33, %c8_34, %c0_35] : memref<1x19x16xf32, #tpu.memory_space<vmem>>, vector<1x8x16xf32>
    tpu.vector_store %arg23[%c0_33, %c8_34, %c0_35], %45 {strides = array<i32>} : memref<1x19x16xf32, #tpu.memory_space<vmem>>, vector<1x8x16xf32>,
    %c0_36 = arith.constant 0 : index
    %c5_37 = arith.constant 5 : index
    %c0_38 = arith.constant 0 : index
    %49 = vector.load %arg23[%c0_36, %c5_37, %c0_38] : memref<1x19x16xf32, #tpu.memory_space<vmem>>, vector<1x12x16xf32>
    %c0_39 = arith.constant 0 : index
    %c0_40 = arith.constant 0 : index
    %c0_41 = arith.constant 0 : index
    %50 = vector.load %arg5[%c0_39, %c0_40, %c0_41] : memref<3x16x16xf32, #tpu.memory_space<vmem>>, vector<1x16x16xf32>
    %51 = vector.shape_cast %50 : vector<1x16x16xf32> to vector<16x16xf32>
    %52 = vector.shape_cast %51 : vector<16x16xf32> to vector<1x16x16xf32>
    "tpu.trace_start"() <{level = 10 : i32, message = "blc,bcd->bld"}> : () -> ()
    %cst_42 = arith.constant dense<0.000000e+00> : vector<1x12x16xf32>
    %53 = tpu.matmul %49, %52, %cst_42 {dimension_numbers = #tpu.dot_dimension_numbers<[2], [1], [1], [2], [0, 0, 0, 1, 1, 2], [0], [0]>} : vector<1x12x16xf32>, vector<1x16x16xf32>, vector<1x12x16xf32> -> vector<1x12x16xf32>
    "tpu.trace_stop"() : () -> ()
    %c0_43 = arith.constant 0 : index
    %c6_44 = arith.constant 6 : index
    %c0_45 = arith.constant 0 : index
    %54 = vector.load %arg23[%c0_43, %c6_44, %c0_45] : memref<1x19x16xf32, #tpu.memory_space<vmem>>, vector<1x12x16xf32>
    %c1_46 = arith.constant 1 : index
    %c0_47 = arith.constant 0 : index
    %c0_48 = arith.constant 0 : index
    %55 = vector.load %arg5[%c1_46, %c0_47, %c0_48] : memref<3x16x16xf32, #tpu.memory_space<vmem>>, vector<1x16x16xf32>
    %56 = vector.shape_cast %55 : vector<1x16x16xf32> to vector<16x16xf32>
    %57 = vector.shape_cast %56 : vector<16x16xf32> to vector<1x16x16xf32>
    "tpu.trace_start"() <{level = 10 : i32, message = "blc,bcd->bld"}> : () -> ()
    %cst_49 = arith.constant dense<0.000000e+00> : vector<1x12x16xf32>
    %58 = tpu.matmul %54, %57, %cst_49 {dimension_numbers = #tpu.dot_dimension_numbers<[2], [1], [1], [2], [0, 0, 0, 1, 1, 2], [0], [0]>} : vector<1x12x16xf32>, vector<1x16x16xf32>, vector<1x12x16xf32> -> vector<1x12x16xf32>
    "tpu.trace_stop"() : () -> ()
    %59 = arith.addf %53, %58 : vector<1x12x16xf32>
    %c0_50 = arith.constant 0 : index
    %c7_51 = arith.constant 7 : index
    %c0_52 = arith.constant 0 : index
    %60 = vector.load %arg23[%c0_50, %c7_51, %c0_52] : memref<1x19x16xf32, #tpu.memory_space<vmem>>, vector<1x12x16xf32>
    %c2_53 = arith.constant 2 : index
    %c0_54 = arith.constant 0 : index
    %c0_55 = arith.constant 0 : index
    %61 = vector.load %arg5[%c2_53, %c0_54, %c0_55] : memref<3x16x16xf32, #tpu.memory_space<vmem>>, vector<1x16x16xf32>
    %62 = vector.shape_cast %61 : vector<1x16x16xf32> to vector<16x16xf32>
    %63 = vector.shape_cast %62 : vector<16x16xf32> to vector<1x16x16xf32>
    "tpu.trace_start"() <{level = 10 : i32, message = "blc,bcd->bld"}> : () -> ()
    %cst_56 = arith.constant dense<0.000000e+00> : vector<1x12x16xf32>
    %64 = tpu.matmul %60, %63, %cst_56 {dimension_numbers = #tpu.dot_dimension_numbers<[2], [1], [1], [2], [0, 0, 0, 1, 1, 2], [0], [0]>} : vector<1x12x16xf32>, vector<1x16x16xf32>, vector<1x12x16xf32> -> vector<1x12x16xf32>
    "tpu.trace_stop"() : () -> ()
    %65 = arith.addf %59, %64 : vector<1x12x16xf32>
    %c0_57 = arith.constant 0 : index
    %c0_58 = arith.constant 0 : index
    %66 = vector.load %arg6[%c0_57, %c0_58] : memref<1x16xf32, #tpu.memory_space<vmem>>, vector<1x16xf32>
    %67 = vector.shape_cast %66 : vector<1x16xf32> to vector<1x1x16xf32>
    %68 = vector.broadcast %67 : vector<1x1x16xf32> to vector<1x12x16xf32>
    %69 = arith.addf %65, %68 : vector<1x12x16xf32>
    %cst_59 = arith.constant 0.000000e+00 : f32
    %70 = vector.broadcast %cst_59 : f32 to vector<1x12x16xf32>
    %71 = arith.maximumf %69, %70 : vector<1x12x16xf32>
    %72 = tpu.iota {dimensions = array<i32: 0>} : vector<6x12xi32>
    %73 = tpu.iota {dimensions = array<i32: 1>} : vector<6x12xi32>
    %c2_i32_60 = arith.constant 2 : i32
    %74 = vector.broadcast %c2_i32_60 : i32 to vector<6x12xi32>
    %75 = arith.muli %74, %72 : vector<6x12xi32>
    %76 = arith.cmpi eq, %73, %75 : vector<6x12xi32>
    %77 = arith.extui %76 : vector<6x12xi1> to vector<6x12xi32>
    %78 = arith.sitofp %77 : vector<6x12xi32> to vector<6x12xf32>
    %79 = vector.shape_cast %78 : vector<6x12xf32> to vector<1x6x12xf32>
    %c2_i32_61 = arith.constant 2 : i32
    %80 = vector.broadcast %c2_i32_61 : i32 to vector<6x12xi32>
    %81 = arith.muli %80, %72 : vector<6x12xi32>
    %c1_i32_62 = arith.constant 1 : i32
    %82 = vector.broadcast %c1_i32_62 : i32 to vector<6x12xi32>
    %83 = arith.addi %81, %82 : vector<6x12xi32>
    %84 = arith.cmpi eq, %73, %83 : vector<6x12xi32>
    %85 = arith.extui %84 : vector<6x12xi1> to vector<6x12xi32>
    %86 = arith.sitofp %85 : vector<6x12xi32> to vector<6x12xf32>
    %87 = vector.shape_cast %86 : vector<6x12xf32> to vector<1x6x12xf32>
    "tpu.trace_start"() <{level = 10 : i32, message = "bjs,bsc->bjc"}> : () -> ()
    %cst_63 = arith.constant dense<0.000000e+00> : vector<1x6x16xf32>
    %88 = tpu.matmul %79, %71, %cst_63 {dimension_numbers = #tpu.dot_dimension_numbers<[2], [1], [1], [2], [0, 0, 0, 1, 1, 2], [0], [0]>} : vector<1x6x12xf32>, vector<1x12x16xf32>, vector<1x6x16xf32> -> vector<1x6x16xf32>
    %cst_64 = arith.constant dense<0.000000e+00> : vector<1x6x16xf32>
    %89 = tpu.matmul %87, %71, %cst_64 {dimension_numbers = #tpu.dot_dimension_numbers<[2], [1], [1], [2], [0, 0, 0, 1, 1, 2], [0], [0]>} : vector<1x6x12xf32>, vector<1x12x16xf32>, vector<1x6x16xf32> -> vector<1x6x16xf32>
    "tpu.trace_stop"() : () -> ()
    %90 = arith.maximumf %88, %89 : vector<1x6x16xf32>
    %cst_65 = arith.constant 0.000000e+00 : f32
    %91 = vector.broadcast %cst_65 : f32 to vector<1x17x16xf32>
    %c0_66 = arith.constant 0 : index
    %c0_67 = arith.constant 0 : index
    %c0_68 = arith.constant 0 : index
    %92 = vector.load %arg24[%c0_66, %c0_67, %c0_68] : memref<1x17x16xf32, #tpu.memory_space<vmem>>, vector<1x17x16xf32>
    tpu.vector_store %arg24[%c0_66, %c0_67, %c0_68], %91 {strides = array<i32>} : memref<1x17x16xf32, #tpu.memory_space<vmem>>, vector<1x17x16xf32>,
    %c0_69 = arith.constant 0 : index
    %c8_70 = arith.constant 8 : index
    %c0_71 = arith.constant 0 : index
    %93 = vector.load %arg24[%c0_69, %c8_70, %c0_71] : memref<1x17x16xf32, #tpu.memory_space<vmem>>, vector<1x6x16xf32>
    tpu.vector_store %arg24[%c0_69, %c8_70, %c0_71], %90 {strides = array<i32>} : memref<1x17x16xf32, #tpu.memory_space<vmem>>, vector<1x6x16xf32>,
    %c0_72 = arith.constant 0 : index
    %c5_73 = arith.constant 5 : index
    %c0_74 = arith.constant 0 : index
    %94 = vector.load %arg24[%c0_72, %c5_73, %c0_74] : memref<1x17x16xf32, #tpu.memory_space<vmem>>, vector<1x10x16xf32>
    %c0_75 = arith.constant 0 : index
    %c0_76 = arith.constant 0 : index
    %c0_77 = arith.constant 0 : index
    %95 = vector.load %arg7[%c0_75, %c0_76, %c0_77] : memref<3x16x32xf32, #tpu.memory_space<vmem>>, vector<1x16x32xf32>
    %96 = vector.shape_cast %95 : vector<1x16x32xf32> to vector<16x32xf32>
    %97 = vector.shape_cast %96 : vector<16x32xf32> to vector<1x16x32xf32>
    "tpu.trace_start"() <{level = 10 : i32, message = "blc,bcd->bld"}> : () -> ()
    %cst_78 = arith.constant dense<0.000000e+00> : vector<1x10x32xf32>
    %98 = tpu.matmul %94, %97, %cst_78 {dimension_numbers = #tpu.dot_dimension_numbers<[2], [1], [1], [2], [0, 0, 0, 1, 1, 2], [0], [0]>} : vector<1x10x16xf32>, vector<1x16x32xf32>, vector<1x10x32xf32> -> vector<1x10x32xf32>
    "tpu.trace_stop"() : () -> ()
    %c0_79 = arith.constant 0 : index
    %c6_80 = arith.constant 6 : index
    %c0_81 = arith.constant 0 : index
    %99 = vector.load %arg24[%c0_79, %c6_80, %c0_81] : memref<1x17x16xf32, #tpu.memory_space<vmem>>, vector<1x10x16xf32>
    %c1_82 = arith.constant 1 : index
    %c0_83 = arith.constant 0 : index
    %c0_84 = arith.constant 0 : index
    %100 = vector.load %arg7[%c1_82, %c0_83, %c0_84] : memref<3x16x32xf32, #tpu.memory_space<vmem>>, vector<1x16x32xf32>
    %101 = vector.shape_cast %100 : vector<1x16x32xf32> to vector<16x32xf32>
    %102 = vector.shape_cast %101 : vector<16x32xf32> to vector<1x16x32xf32>
    "tpu.trace_start"() <{level = 10 : i32, message = "blc,bcd->bld"}> : () -> ()
    %cst_85 = arith.constant dense<0.000000e+00> : vector<1x10x32xf32>
    %103 = tpu.matmul %99, %102, %cst_85 {dimension_numbers = #tpu.dot_dimension_numbers<[2], [1], [1], [2], [0, 0, 0, 1, 1, 2], [0], [0]>} : vector<1x10x16xf32>, vector<1x16x32xf32>, vector<1x10x32xf32> -> vector<1x10x32xf32>
    "tpu.trace_stop"() : () -> ()
    %104 = arith.addf %98, %103 : vector<1x10x32xf32>
    %c0_86 = arith.constant 0 : index
    %c7_87 = arith.constant 7 : index
    %c0_88 = arith.constant 0 : index
    %105 = vector.load %arg24[%c0_86, %c7_87, %c0_88] : memref<1x17x16xf32, #tpu.memory_space<vmem>>, vector<1x10x16xf32>
    %c2_89 = arith.constant 2 : index
    %c0_90 = arith.constant 0 : index
    %c0_91 = arith.constant 0 : index
    %106 = vector.load %arg7[%c2_89, %c0_90, %c0_91] : memref<3x16x32xf32, #tpu.memory_space<vmem>>, vector<1x16x32xf32>
    %107 = vector.shape_cast %106 : vector<1x16x32xf32> to vector<16x32xf32>
    %108 = vector.shape_cast %107 : vector<16x32xf32> to vector<1x16x32xf32>
    "tpu.trace_start"() <{level = 10 : i32, message = "blc,bcd->bld"}> : () -> ()
    %cst_92 = arith.constant dense<0.000000e+00> : vector<1x10x32xf32>
    %109 = tpu.matmul %105, %108, %cst_92 {dimension_numbers = #tpu.dot_dimension_numbers<[2], [1], [1], [2], [0, 0, 0, 1, 1, 2], [0], [0]>} : vector<1x10x16xf32>, vector<1x16x32xf32>, vector<1x10x32xf32> -> vector<1x10x32xf32>
    "tpu.trace_stop"() : () -> ()
    %110 = arith.addf %104, %109 : vector<1x10x32xf32>
    %c0_93 = arith.constant 0 : index
    %c0_94 = arith.constant 0 : index
    %111 = vector.load %arg8[%c0_93, %c0_94] : memref<1x32xf32, #tpu.memory_space<vmem>>, vector<1x32xf32>
    %112 = vector.shape_cast %111 : vector<1x32xf32> to vector<1x1x32xf32>
    %113 = vector.broadcast %112 : vector<1x1x32xf32> to vector<1x10x32xf32>
    %114 = arith.addf %110, %113 : vector<1x10x32xf32>
    %cst_95 = arith.constant 0.000000e+00 : f32
    %115 = vector.broadcast %cst_95 : f32 to vector<1x10x32xf32>
    %116 = arith.maximumf %114, %115 : vector<1x10x32xf32>
    %117 = tpu.iota {dimensions = array<i32: 0>} : vector<5x10xi32>
    %118 = tpu.iota {dimensions = array<i32: 1>} : vector<5x10xi32>
    %c2_i32_96 = arith.constant 2 : i32
    %119 = vector.broadcast %c2_i32_96 : i32 to vector<5x10xi32>
    %120 = arith.muli %119, %117 : vector<5x10xi32>
    %121 = arith.cmpi eq, %118, %120 : vector<5x10xi32>
    %122 = arith.extui %121 : vector<5x10xi1> to vector<5x10xi32>
    %123 = arith.sitofp %122 : vector<5x10xi32> to vector<5x10xf32>
    %124 = vector.shape_cast %123 : vector<5x10xf32> to vector<1x5x10xf32>
    %c2_i32_97 = arith.constant 2 : i32
    %125 = vector.broadcast %c2_i32_97 : i32 to vector<5x10xi32>
    %126 = arith.muli %125, %117 : vector<5x10xi32>
    %c1_i32_98 = arith.constant 1 : i32
    %127 = vector.broadcast %c1_i32_98 : i32 to vector<5x10xi32>
    %128 = arith.addi %126, %127 : vector<5x10xi32>
    %129 = arith.cmpi eq, %118, %128 : vector<5x10xi32>
    %130 = arith.extui %129 : vector<5x10xi1> to vector<5x10xi32>
    %131 = arith.sitofp %130 : vector<5x10xi32> to vector<5x10xf32>
    %132 = vector.shape_cast %131 : vector<5x10xf32> to vector<1x5x10xf32>
    "tpu.trace_start"() <{level = 10 : i32, message = "bjs,bsc->bjc"}> : () -> ()
    %cst_99 = arith.constant dense<0.000000e+00> : vector<1x5x32xf32>
    %133 = tpu.matmul %124, %116, %cst_99 {dimension_numbers = #tpu.dot_dimension_numbers<[2], [1], [1], [2], [0, 0, 0, 1, 1, 2], [0], [0]>} : vector<1x5x10xf32>, vector<1x10x32xf32>, vector<1x5x32xf32> -> vector<1x5x32xf32>
    %cst_100 = arith.constant dense<0.000000e+00> : vector<1x5x32xf32>
    %134 = tpu.matmul %132, %116, %cst_100 {dimension_numbers = #tpu.dot_dimension_numbers<[2], [1], [1], [2], [0, 0, 0, 1, 1, 2], [0], [0]>} : vector<1x5x10xf32>, vector<1x10x32xf32>, vector<1x5x32xf32> -> vector<1x5x32xf32>
    "tpu.trace_stop"() : () -> ()
    %135 = arith.maximumf %133, %134 : vector<1x5x32xf32>
    %cst_101 = arith.constant 0.000000e+00 : f32
    %136 = vector.broadcast %cst_101 : f32 to vector<1x14x32xf32>
    %c0_102 = arith.constant 0 : index
    %c0_103 = arith.constant 0 : index
    %c0_104 = arith.constant 0 : index
    %137 = vector.load %arg25[%c0_102, %c0_103, %c0_104] : memref<1x14x32xf32, #tpu.memory_space<vmem>>, vector<1x14x32xf32>
    tpu.vector_store %arg25[%c0_102, %c0_103, %c0_104], %136 {strides = array<i32>} : memref<1x14x32xf32, #tpu.memory_space<vmem>>, vector<1x14x32xf32>,
    %c0_105 = arith.constant 0 : index
    %c8_106 = arith.constant 8 : index
    %c0_107 = arith.constant 0 : index
    %138 = vector.load %arg25[%c0_105, %c8_106, %c0_107] : memref<1x14x32xf32, #tpu.memory_space<vmem>>, vector<1x5x32xf32>
    tpu.vector_store %arg25[%c0_105, %c8_106, %c0_107], %135 {strides = array<i32>} : memref<1x14x32xf32, #tpu.memory_space<vmem>>, vector<1x5x32xf32>,
    %c0_108 = arith.constant 0 : index
    %c7_109 = arith.constant 7 : index
    %c0_110 = arith.constant 0 : index
    %139 = vector.load %arg25[%c0_108, %c7_109, %c0_110] : memref<1x14x32xf32, #tpu.memory_space<vmem>>, vector<1x5x32xf32>
    %c0_111 = arith.constant 0 : index
    %c0_112 = arith.constant 0 : index
    %c0_113 = arith.constant 0 : index
    %140 = vector.load %arg9[%c0_111, %c0_112, %c0_113] : memref<3x32x32xf32, #tpu.memory_space<vmem>>, vector<1x32x32xf32>
    %141 = vector.shape_cast %140 : vector<1x32x32xf32> to vector<32x32xf32>
    %142 = vector.shape_cast %141 : vector<32x32xf32> to vector<1x32x32xf32>
    "tpu.trace_start"() <{level = 10 : i32, message = "blc,bcd->bld"}> : () -> ()
    %cst_114 = arith.constant dense<0.000000e+00> : vector<1x5x32xf32>
    %143 = tpu.matmul %139, %142, %cst_114 {dimension_numbers = #tpu.dot_dimension_numbers<[2], [1], [1], [2], [0, 0, 0, 1, 1, 2], [0], [0]>} : vector<1x5x32xf32>, vector<1x32x32xf32>, vector<1x5x32xf32> -> vector<1x5x32xf32>
    "tpu.trace_stop"() : () -> ()
    %c0_115 = arith.constant 0 : index
    %c8_116 = arith.constant 8 : index
    %c0_117 = arith.constant 0 : index
    %144 = vector.load %arg25[%c0_115, %c8_116, %c0_117] : memref<1x14x32xf32, #tpu.memory_space<vmem>>, vector<1x5x32xf32>
    %c1_118 = arith.constant 1 : index
    %c0_119 = arith.constant 0 : index
    %c0_120 = arith.constant 0 : index
    %145 = vector.load %arg9[%c1_118, %c0_119, %c0_120] : memref<3x32x32xf32, #tpu.memory_space<vmem>>, vector<1x32x32xf32>
    %146 = vector.shape_cast %145 : vector<1x32x32xf32> to vector<32x32xf32>
    %147 = vector.shape_cast %146 : vector<32x32xf32> to vector<1x32x32xf32>
    "tpu.trace_start"() <{level = 10 : i32, message = "blc,bcd->bld"}> : () -> ()
    %cst_121 = arith.constant dense<0.000000e+00> : vector<1x5x32xf32>
    %148 = tpu.matmul %144, %147, %cst_121 {dimension_numbers = #tpu.dot_dimension_numbers<[2], [1], [1], [2], [0, 0, 0, 1, 1, 2], [0], [0]>} : vector<1x5x32xf32>, vector<1x32x32xf32>, vector<1x5x32xf32> -> vector<1x5x32xf32>
    "tpu.trace_stop"() : () -> ()
    %149 = arith.addf %143, %148 : vector<1x5x32xf32>
    %c0_122 = arith.constant 0 : index
    %c9 = arith.constant 9 : index
    %c0_123 = arith.constant 0 : index
    %150 = vector.load %arg25[%c0_122, %c9, %c0_123] : memref<1x14x32xf32, #tpu.memory_space<vmem>>, vector<1x5x32xf32>
    %c2_124 = arith.constant 2 : index
    %c0_125 = arith.constant 0 : index
    %c0_126 = arith.constant 0 : index
    %151 = vector.load %arg9[%c2_124, %c0_125, %c0_126] : memref<3x32x32xf32, #tpu.memory_space<vmem>>, vector<1x32x32xf32>
    %152 = vector.shape_cast %151 : vector<1x32x32xf32> to vector<32x32xf32>
    %153 = vector.shape_cast %152 : vector<32x32xf32> to vector<1x32x32xf32>
    "tpu.trace_start"() <{level = 10 : i32, message = "blc,bcd->bld"}> : () -> ()
    %cst_127 = arith.constant dense<0.000000e+00> : vector<1x5x32xf32>
    %154 = tpu.matmul %150, %153, %cst_127 {dimension_numbers = #tpu.dot_dimension_numbers<[2], [1], [1], [2], [0, 0, 0, 1, 1, 2], [0], [0]>} : vector<1x5x32xf32>, vector<1x32x32xf32>, vector<1x5x32xf32> -> vector<1x5x32xf32>
    "tpu.trace_stop"() : () -> ()
    %155 = arith.addf %149, %154 : vector<1x5x32xf32>
    %c0_128 = arith.constant 0 : index
    %c0_129 = arith.constant 0 : index
    %156 = vector.load %arg10[%c0_128, %c0_129] : memref<1x32xf32, #tpu.memory_space<vmem>>, vector<1x32xf32>
    %157 = vector.shape_cast %156 : vector<1x32xf32> to vector<1x1x32xf32>
    %158 = vector.broadcast %157 : vector<1x1x32xf32> to vector<1x5x32xf32>
    %159 = arith.addf %155, %158 : vector<1x5x32xf32>
    %cst_130 = arith.constant 0.000000e+00 : f32
    %160 = vector.broadcast %cst_130 : f32 to vector<1x5x32xf32>
    %161 = arith.maximumf %159, %160 : vector<1x5x32xf32>
    %cst_131 = arith.constant 0.000000e+00 : f32
    %162 = vector.broadcast %cst_131 : f32 to vector<1x14x32xf32>
    %c0_132 = arith.constant 0 : index
    %c0_133 = arith.constant 0 : index
    %c0_134 = arith.constant 0 : index
    %163 = vector.load %arg26[%c0_132, %c0_133, %c0_134] : memref<1x14x32xf32, #tpu.memory_space<vmem>>, vector<1x14x32xf32>
    tpu.vector_store %arg26[%c0_132, %c0_133, %c0_134], %162 {strides = array<i32>} : memref<1x14x32xf32, #tpu.memory_space<vmem>>, vector<1x14x32xf32>,
    %c0_135 = arith.constant 0 : index
    %c8_136 = arith.constant 8 : index
    %c0_137 = arith.constant 0 : index
    %164 = vector.load %arg26[%c0_135, %c8_136, %c0_137] : memref<1x14x32xf32, #tpu.memory_space<vmem>>, vector<1x5x32xf32>
    tpu.vector_store %arg26[%c0_135, %c8_136, %c0_137], %161 {strides = array<i32>} : memref<1x14x32xf32, #tpu.memory_space<vmem>>, vector<1x5x32xf32>,
    %c0_138 = arith.constant 0 : index
    %c7_139 = arith.constant 7 : index
    %c0_140 = arith.constant 0 : index
    %165 = vector.load %arg26[%c0_138, %c7_139, %c0_140] : memref<1x14x32xf32, #tpu.memory_space<vmem>>, vector<1x5x32xf32>
    %c0_141 = arith.constant 0 : index
    %c0_142 = arith.constant 0 : index
    %c0_143 = arith.constant 0 : index
    %166 = vector.load %arg11[%c0_141, %c0_142, %c0_143] : memref<3x32x48xf32, #tpu.memory_space<vmem>>, vector<1x32x48xf32>
    %167 = vector.shape_cast %166 : vector<1x32x48xf32> to vector<32x48xf32>
    %168 = vector.shape_cast %167 : vector<32x48xf32> to vector<1x32x48xf32>
    "tpu.trace_start"() <{level = 10 : i32, message = "blc,bcd->bld"}> : () -> ()
    %cst_144 = arith.constant dense<0.000000e+00> : vector<1x5x48xf32>
    %169 = tpu.matmul %165, %168, %cst_144 {dimension_numbers = #tpu.dot_dimension_numbers<[2], [1], [1], [2], [0, 0, 0, 1, 1, 2], [0], [0]>} : vector<1x5x32xf32>, vector<1x32x48xf32>, vector<1x5x48xf32> -> vector<1x5x48xf32>
    "tpu.trace_stop"() : () -> ()
    %c0_145 = arith.constant 0 : index
    %c8_146 = arith.constant 8 : index
    %c0_147 = arith.constant 0 : index
    %170 = vector.load %arg26[%c0_145, %c8_146, %c0_147] : memref<1x14x32xf32, #tpu.memory_space<vmem>>, vector<1x5x32xf32>
    %c1_148 = arith.constant 1 : index
    %c0_149 = arith.constant 0 : index
    %c0_150 = arith.constant 0 : index
    %171 = vector.load %arg11[%c1_148, %c0_149, %c0_150] : memref<3x32x48xf32, #tpu.memory_space<vmem>>, vector<1x32x48xf32>
    %172 = vector.shape_cast %171 : vector<1x32x48xf32> to vector<32x48xf32>
    %173 = vector.shape_cast %172 : vector<32x48xf32> to vector<1x32x48xf32>
    "tpu.trace_start"() <{level = 10 : i32, message = "blc,bcd->bld"}> : () -> ()
    %cst_151 = arith.constant dense<0.000000e+00> : vector<1x5x48xf32>
    %174 = tpu.matmul %170, %173, %cst_151 {dimension_numbers = #tpu.dot_dimension_numbers<[2], [1], [1], [2], [0, 0, 0, 1, 1, 2], [0], [0]>} : vector<1x5x32xf32>, vector<1x32x48xf32>, vector<1x5x48xf32> -> vector<1x5x48xf32>
    "tpu.trace_stop"() : () -> ()
    %175 = arith.addf %169, %174 : vector<1x5x48xf32>
    %c0_152 = arith.constant 0 : index
    %c9_153 = arith.constant 9 : index
    %c0_154 = arith.constant 0 : index
    %176 = vector.load %arg26[%c0_152, %c9_153, %c0_154] : memref<1x14x32xf32, #tpu.memory_space<vmem>>, vector<1x5x32xf32>
    %c2_155 = arith.constant 2 : index
    %c0_156 = arith.constant 0 : index
    %c0_157 = arith.constant 0 : index
    %177 = vector.load %arg11[%c2_155, %c0_156, %c0_157] : memref<3x32x48xf32, #tpu.memory_space<vmem>>, vector<1x32x48xf32>
    %178 = vector.shape_cast %177 : vector<1x32x48xf32> to vector<32x48xf32>
    %179 = vector.shape_cast %178 : vector<32x48xf32> to vector<1x32x48xf32>
    "tpu.trace_start"() <{level = 10 : i32, message = "blc,bcd->bld"}> : () -> ()
    %cst_158 = arith.constant dense<0.000000e+00> : vector<1x5x48xf32>
    %180 = tpu.matmul %176, %179, %cst_158 {dimension_numbers = #tpu.dot_dimension_numbers<[2], [1], [1], [2], [0, 0, 0, 1, 1, 2], [0], [0]>} : vector<1x5x32xf32>, vector<1x32x48xf32>, vector<1x5x48xf32> -> vector<1x5x48xf32>
    "tpu.trace_stop"() : () -> ()
    %181 = arith.addf %175, %180 : vector<1x5x48xf32>
    %c0_159 = arith.constant 0 : index
    %c0_160 = arith.constant 0 : index
    %182 = vector.load %arg12[%c0_159, %c0_160] : memref<1x48xf32, #tpu.memory_space<vmem>>, vector<1x48xf32>
    %183 = vector.shape_cast %182 : vector<1x48xf32> to vector<1x1x48xf32>
    %184 = vector.broadcast %183 : vector<1x1x48xf32> to vector<1x5x48xf32>
    %185 = arith.addf %181, %184 : vector<1x5x48xf32>
    %cst_161 = arith.constant 0.000000e+00 : f32
    %186 = vector.broadcast %cst_161 : f32 to vector<1x5x48xf32>
    %187 = arith.maximumf %185, %186 : vector<1x5x48xf32>
    %cst_162 = arith.constant dense<0xFF800000> : vector<1x48xf32>
    %188 = vector.multi_reduction <maximumf>, %187, %cst_162 [1] : vector<1x5x48xf32> to vector<1x48xf32>
    %c0_163 = arith.constant 0 : index
    %c0_164 = arith.constant 0 : index
    %c0_165 = arith.constant 0 : index
    %189 = vector.load %arg2[%c0_163, %c0_164, %c0_165] : memref<1x12x8xf32, #tpu.memory_space<vmem>>, vector<1x12x8xf32>
    %cst_166 = arith.constant 0.000000e+00 : f32
    %190 = vector.broadcast %cst_166 : f32 to vector<1x23x8xf32>
    %c0_167 = arith.constant 0 : index
    %c0_168 = arith.constant 0 : index
    %c0_169 = arith.constant 0 : index
    %191 = vector.load %arg22[%c0_167, %c0_168, %c0_169] : memref<1x23x8xf32, #tpu.memory_space<vmem>>, vector<1x23x8xf32>
    tpu.vector_store %arg22[%c0_167, %c0_168, %c0_169], %190 {strides = array<i32>} : memref<1x23x8xf32, #tpu.memory_space<vmem>>, vector<1x23x8xf32>,
    %c0_170 = arith.constant 0 : index
    %c8_171 = arith.constant 8 : index
    %c0_172 = arith.constant 0 : index
    %192 = vector.load %arg22[%c0_170, %c8_171, %c0_172] : memref<1x23x8xf32, #tpu.memory_space<vmem>>, vector<1x12x8xf32>
    tpu.vector_store %arg22[%c0_170, %c8_171, %c0_172], %189 {strides = array<i32>} : memref<1x23x8xf32, #tpu.memory_space<vmem>>, vector<1x12x8xf32>,
    %c0_173 = arith.constant 0 : index
    %c5_174 = arith.constant 5 : index
    %c0_175 = arith.constant 0 : index
    %193 = vector.load %arg22[%c0_173, %c5_174, %c0_175] : memref<1x23x8xf32, #tpu.memory_space<vmem>>, vector<1x16x8xf32>
    %c0_176 = arith.constant 0 : index
    %c0_177 = arith.constant 0 : index
    %c0_178 = arith.constant 0 : index
    %194 = vector.load %arg3[%c0_176, %c0_177, %c0_178] : memref<3x8x16xf32, #tpu.memory_space<vmem>>, vector<1x8x16xf32>
    %195 = vector.shape_cast %194 : vector<1x8x16xf32> to vector<8x16xf32>
    %196 = vector.shape_cast %195 : vector<8x16xf32> to vector<1x8x16xf32>
    "tpu.trace_start"() <{level = 10 : i32, message = "blc,bcd->bld"}> : () -> ()
    %cst_179 = arith.constant dense<0.000000e+00> : vector<1x16x16xf32>
    %197 = tpu.matmul %193, %196, %cst_179 {dimension_numbers = #tpu.dot_dimension_numbers<[2], [1], [1], [2], [0, 0, 0, 1, 1, 2], [0], [0]>} : vector<1x16x8xf32>, vector<1x8x16xf32>, vector<1x16x16xf32> -> vector<1x16x16xf32>
    "tpu.trace_stop"() : () -> ()
    %c0_180 = arith.constant 0 : index
    %c6_181 = arith.constant 6 : index
    %c0_182 = arith.constant 0 : index
    %198 = vector.load %arg22[%c0_180, %c6_181, %c0_182] : memref<1x23x8xf32, #tpu.memory_space<vmem>>, vector<1x16x8xf32>
    %c1_183 = arith.constant 1 : index
    %c0_184 = arith.constant 0 : index
    %c0_185 = arith.constant 0 : index
    %199 = vector.load %arg3[%c1_183, %c0_184, %c0_185] : memref<3x8x16xf32, #tpu.memory_space<vmem>>, vector<1x8x16xf32>
    %200 = vector.shape_cast %199 : vector<1x8x16xf32> to vector<8x16xf32>
    %201 = vector.shape_cast %200 : vector<8x16xf32> to vector<1x8x16xf32>
    "tpu.trace_start"() <{level = 10 : i32, message = "blc,bcd->bld"}> : () -> ()
    %cst_186 = arith.constant dense<0.000000e+00> : vector<1x16x16xf32>
    %202 = tpu.matmul %198, %201, %cst_186 {dimension_numbers = #tpu.dot_dimension_numbers<[2], [1], [1], [2], [0, 0, 0, 1, 1, 2], [0], [0]>} : vector<1x16x8xf32>, vector<1x8x16xf32>, vector<1x16x16xf32> -> vector<1x16x16xf32>
    "tpu.trace_stop"() : () -> ()
    %203 = arith.addf %197, %202 : vector<1x16x16xf32>
    %c0_187 = arith.constant 0 : index
    %c7_188 = arith.constant 7 : index
    %c0_189 = arith.constant 0 : index
    %204 = vector.load %arg22[%c0_187, %c7_188, %c0_189] : memref<1x23x8xf32, #tpu.memory_space<vmem>>, vector<1x16x8xf32>
    %c2_190 = arith.constant 2 : index
    %c0_191 = arith.constant 0 : index
    %c0_192 = arith.constant 0 : index
    %205 = vector.load %arg3[%c2_190, %c0_191, %c0_192] : memref<3x8x16xf32, #tpu.memory_space<vmem>>, vector<1x8x16xf32>
    %206 = vector.shape_cast %205 : vector<1x8x16xf32> to vector<8x16xf32>
    %207 = vector.shape_cast %206 : vector<8x16xf32> to vector<1x8x16xf32>
    "tpu.trace_start"() <{level = 10 : i32, message = "blc,bcd->bld"}> : () -> ()
    %cst_193 = arith.constant dense<0.000000e+00> : vector<1x16x16xf32>
    %208 = tpu.matmul %204, %207, %cst_193 {dimension_numbers = #tpu.dot_dimension_numbers<[2], [1], [1], [2], [0, 0, 0, 1, 1, 2], [0], [0]>} : vector<1x16x8xf32>, vector<1x8x16xf32>, vector<1x16x16xf32> -> vector<1x16x16xf32>
    "tpu.trace_stop"() : () -> ()
    %209 = arith.addf %203, %208 : vector<1x16x16xf32>
    %c0_194 = arith.constant 0 : index
    %c0_195 = arith.constant 0 : index
    %210 = vector.load %arg4[%c0_194, %c0_195] : memref<1x16xf32, #tpu.memory_space<vmem>>, vector<1x16xf32>
    %211 = vector.shape_cast %210 : vector<1x16xf32> to vector<1x1x16xf32>
    %212 = vector.broadcast %211 : vector<1x1x16xf32> to vector<1x16x16xf32>
    %213 = arith.addf %209, %212 : vector<1x16x16xf32>
    %cst_196 = arith.constant 0.000000e+00 : f32
    %214 = vector.broadcast %cst_196 : f32 to vector<1x16x16xf32>
    %215 = arith.maximumf %213, %214 : vector<1x16x16xf32>
    %216 = tpu.iota {dimensions = array<i32: 0>} : vector<8x16xi32>
    %217 = tpu.iota {dimensions = array<i32: 1>} : vector<8x16xi32>
    %c2_i32_197 = arith.constant 2 : i32
    %218 = vector.broadcast %c2_i32_197 : i32 to vector<8x16xi32>
    %219 = arith.muli %218, %216 : vector<8x16xi32>
    %220 = arith.cmpi eq, %217, %219 : vector<8x16xi32>
    %221 = arith.extui %220 : vector<8x16xi1> to vector<8x16xi32>
    %222 = arith.sitofp %221 : vector<8x16xi32> to vector<8x16xf32>
    %223 = vector.shape_cast %222 : vector<8x16xf32> to vector<1x8x16xf32>
    %c2_i32_198 = arith.constant 2 : i32
    %224 = vector.broadcast %c2_i32_198 : i32 to vector<8x16xi32>
    %225 = arith.muli %224, %216 : vector<8x16xi32>
    %c1_i32_199 = arith.constant 1 : i32
    %226 = vector.broadcast %c1_i32_199 : i32 to vector<8x16xi32>
    %227 = arith.addi %225, %226 : vector<8x16xi32>
    %228 = arith.cmpi eq, %217, %227 : vector<8x16xi32>
    %229 = arith.extui %228 : vector<8x16xi1> to vector<8x16xi32>
    %230 = arith.sitofp %229 : vector<8x16xi32> to vector<8x16xf32>
    %231 = vector.shape_cast %230 : vector<8x16xf32> to vector<1x8x16xf32>
    "tpu.trace_start"() <{level = 10 : i32, message = "bjs,bsc->bjc"}> : () -> ()
    %cst_200 = arith.constant dense<0.000000e+00> : vector<1x8x16xf32>
    %232 = tpu.matmul %223, %215, %cst_200 {dimension_numbers = #tpu.dot_dimension_numbers<[2], [1], [1], [2], [0, 0, 0, 1, 1, 2], [0], [0]>} : vector<1x8x16xf32>, vector<1x16x16xf32>, vector<1x8x16xf32> -> vector<1x8x16xf32>
    %cst_201 = arith.constant dense<0.000000e+00> : vector<1x8x16xf32>
    %233 = tpu.matmul %231, %215, %cst_201 {dimension_numbers = #tpu.dot_dimension_numbers<[2], [1], [1], [2], [0, 0, 0, 1, 1, 2], [0], [0]>} : vector<1x8x16xf32>, vector<1x16x16xf32>, vector<1x8x16xf32> -> vector<1x8x16xf32>
    "tpu.trace_stop"() : () -> ()
    %234 = arith.maximumf %232, %233 : vector<1x8x16xf32>
    %cst_202 = arith.constant 0.000000e+00 : f32
    %235 = vector.broadcast %cst_202 : f32 to vector<1x19x16xf32>
    %c0_203 = arith.constant 0 : index
    %c0_204 = arith.constant 0 : index
    %c0_205 = arith.constant 0 : index
    %236 = vector.load %arg23[%c0_203, %c0_204, %c0_205] : memref<1x19x16xf32, #tpu.memory_space<vmem>>, vector<1x19x16xf32>
    tpu.vector_store %arg23[%c0_203, %c0_204, %c0_205], %235 {strides = array<i32>} : memref<1x19x16xf32, #tpu.memory_space<vmem>>, vector<1x19x16xf32>,
    %c0_206 = arith.constant 0 : index
    %c8_207 = arith.constant 8 : index
    %c0_208 = arith.constant 0 : index
    %237 = vector.load %arg23[%c0_206, %c8_207, %c0_208] : memref<1x19x16xf32, #tpu.memory_space<vmem>>, vector<1x8x16xf32>
    tpu.vector_store %arg23[%c0_206, %c8_207, %c0_208], %234 {strides = array<i32>} : memref<1x19x16xf32, #tpu.memory_space<vmem>>, vector<1x8x16xf32>,
    %c0_209 = arith.constant 0 : index
    %c5_210 = arith.constant 5 : index
    %c0_211 = arith.constant 0 : index
    %238 = vector.load %arg23[%c0_209, %c5_210, %c0_211] : memref<1x19x16xf32, #tpu.memory_space<vmem>>, vector<1x12x16xf32>
    %c0_212 = arith.constant 0 : index
    %c0_213 = arith.constant 0 : index
    %c0_214 = arith.constant 0 : index
    %239 = vector.load %arg5[%c0_212, %c0_213, %c0_214] : memref<3x16x16xf32, #tpu.memory_space<vmem>>, vector<1x16x16xf32>
    %240 = vector.shape_cast %239 : vector<1x16x16xf32> to vector<16x16xf32>
    %241 = vector.shape_cast %240 : vector<16x16xf32> to vector<1x16x16xf32>
    "tpu.trace_start"() <{level = 10 : i32, message = "blc,bcd->bld"}> : () -> ()
    %cst_215 = arith.constant dense<0.000000e+00> : vector<1x12x16xf32>
    %242 = tpu.matmul %238, %241, %cst_215 {dimension_numbers = #tpu.dot_dimension_numbers<[2], [1], [1], [2], [0, 0, 0, 1, 1, 2], [0], [0]>} : vector<1x12x16xf32>, vector<1x16x16xf32>, vector<1x12x16xf32> -> vector<1x12x16xf32>
    "tpu.trace_stop"() : () -> ()
    %c0_216 = arith.constant 0 : index
    %c6_217 = arith.constant 6 : index
    %c0_218 = arith.constant 0 : index
    %243 = vector.load %arg23[%c0_216, %c6_217, %c0_218] : memref<1x19x16xf32, #tpu.memory_space<vmem>>, vector<1x12x16xf32>
    %c1_219 = arith.constant 1 : index
    %c0_220 = arith.constant 0 : index
    %c0_221 = arith.constant 0 : index
    %244 = vector.load %arg5[%c1_219, %c0_220, %c0_221] : memref<3x16x16xf32, #tpu.memory_space<vmem>>, vector<1x16x16xf32>
    %245 = vector.shape_cast %244 : vector<1x16x16xf32> to vector<16x16xf32>
    %246 = vector.shape_cast %245 : vector<16x16xf32> to vector<1x16x16xf32>
    "tpu.trace_start"() <{level = 10 : i32, message = "blc,bcd->bld"}> : () -> ()
    %cst_222 = arith.constant dense<0.000000e+00> : vector<1x12x16xf32>
    %247 = tpu.matmul %243, %246, %cst_222 {dimension_numbers = #tpu.dot_dimension_numbers<[2], [1], [1], [2], [0, 0, 0, 1, 1, 2], [0], [0]>} : vector<1x12x16xf32>, vector<1x16x16xf32>, vector<1x12x16xf32> -> vector<1x12x16xf32>
    "tpu.trace_stop"() : () -> ()
    %248 = arith.addf %242, %247 : vector<1x12x16xf32>
    %c0_223 = arith.constant 0 : index
    %c7_224 = arith.constant 7 : index
    %c0_225 = arith.constant 0 : index
    %249 = vector.load %arg23[%c0_223, %c7_224, %c0_225] : memref<1x19x16xf32, #tpu.memory_space<vmem>>, vector<1x12x16xf32>
    %c2_226 = arith.constant 2 : index
    %c0_227 = arith.constant 0 : index
    %c0_228 = arith.constant 0 : index
    %250 = vector.load %arg5[%c2_226, %c0_227, %c0_228] : memref<3x16x16xf32, #tpu.memory_space<vmem>>, vector<1x16x16xf32>
    %251 = vector.shape_cast %250 : vector<1x16x16xf32> to vector<16x16xf32>
    %252 = vector.shape_cast %251 : vector<16x16xf32> to vector<1x16x16xf32>
    "tpu.trace_start"() <{level = 10 : i32, message = "blc,bcd->bld"}> : () -> ()
    %cst_229 = arith.constant dense<0.000000e+00> : vector<1x12x16xf32>
    %253 = tpu.matmul %249, %252, %cst_229 {dimension_numbers = #tpu.dot_dimension_numbers<[2], [1], [1], [2], [0, 0, 0, 1, 1, 2], [0], [0]>} : vector<1x12x16xf32>, vector<1x16x16xf32>, vector<1x12x16xf32> -> vector<1x12x16xf32>
    "tpu.trace_stop"() : () -> ()
    %254 = arith.addf %248, %253 : vector<1x12x16xf32>
    %c0_230 = arith.constant 0 : index
    %c0_231 = arith.constant 0 : index
    %255 = vector.load %arg6[%c0_230, %c0_231] : memref<1x16xf32, #tpu.memory_space<vmem>>, vector<1x16xf32>
    %256 = vector.shape_cast %255 : vector<1x16xf32> to vector<1x1x16xf32>
    %257 = vector.broadcast %256 : vector<1x1x16xf32> to vector<1x12x16xf32>
    %258 = arith.addf %254, %257 : vector<1x12x16xf32>
    %cst_232 = arith.constant 0.000000e+00 : f32
    %259 = vector.broadcast %cst_232 : f32 to vector<1x12x16xf32>
    %260 = arith.maximumf %258, %259 : vector<1x12x16xf32>
    %261 = tpu.iota {dimensions = array<i32: 0>} : vector<6x12xi32>
    %262 = tpu.iota {dimensions = array<i32: 1>} : vector<6x12xi32>
    %c2_i32_233 = arith.constant 2 : i32
    %263 = vector.broadcast %c2_i32_233 : i32 to vector<6x12xi32>
    %264 = arith.muli %263, %261 : vector<6x12xi32>
    %265 = arith.cmpi eq, %262, %264 : vector<6x12xi32>
    %266 = arith.extui %265 : vector<6x12xi1> to vector<6x12xi32>
    %267 = arith.sitofp %266 : vector<6x12xi32> to vector<6x12xf32>
    %268 = vector.shape_cast %267 : vector<6x12xf32> to vector<1x6x12xf32>
    %c2_i32_234 = arith.constant 2 : i32
    %269 = vector.broadcast %c2_i32_234 : i32 to vector<6x12xi32>
    %270 = arith.muli %269, %261 : vector<6x12xi32>
    %c1_i32_235 = arith.constant 1 : i32
    %271 = vector.broadcast %c1_i32_235 : i32 to vector<6x12xi32>
    %272 = arith.addi %270, %271 : vector<6x12xi32>
    %273 = arith.cmpi eq, %262, %272 : vector<6x12xi32>
    %274 = arith.extui %273 : vector<6x12xi1> to vector<6x12xi32>
    %275 = arith.sitofp %274 : vector<6x12xi32> to vector<6x12xf32>
    %276 = vector.shape_cast %275 : vector<6x12xf32> to vector<1x6x12xf32>
    "tpu.trace_start"() <{level = 10 : i32, message = "bjs,bsc->bjc"}> : () -> ()
    %cst_236 = arith.constant dense<0.000000e+00> : vector<1x6x16xf32>
    %277 = tpu.matmul %268, %260, %cst_236 {dimension_numbers = #tpu.dot_dimension_numbers<[2], [1], [1], [2], [0, 0, 0, 1, 1, 2], [0], [0]>} : vector<1x6x12xf32>, vector<1x12x16xf32>, vector<1x6x16xf32> -> vector<1x6x16xf32>
    %cst_237 = arith.constant dense<0.000000e+00> : vector<1x6x16xf32>
    %278 = tpu.matmul %276, %260, %cst_237 {dimension_numbers = #tpu.dot_dimension_numbers<[2], [1], [1], [2], [0, 0, 0, 1, 1, 2], [0], [0]>} : vector<1x6x12xf32>, vector<1x12x16xf32>, vector<1x6x16xf32> -> vector<1x6x16xf32>
    "tpu.trace_stop"() : () -> ()
    %279 = arith.maximumf %277, %278 : vector<1x6x16xf32>
    %cst_238 = arith.constant 0.000000e+00 : f32
    %280 = vector.broadcast %cst_238 : f32 to vector<1x17x16xf32>
    %c0_239 = arith.constant 0 : index
    %c0_240 = arith.constant 0 : index
    %c0_241 = arith.constant 0 : index
    %281 = vector.load %arg24[%c0_239, %c0_240, %c0_241] : memref<1x17x16xf32, #tpu.memory_space<vmem>>, vector<1x17x16xf32>
    tpu.vector_store %arg24[%c0_239, %c0_240, %c0_241], %280 {strides = array<i32>} : memref<1x17x16xf32, #tpu.memory_space<vmem>>, vector<1x17x16xf32>,
    %c0_242 = arith.constant 0 : index
    %c8_243 = arith.constant 8 : index
    %c0_244 = arith.constant 0 : index
    %282 = vector.load %arg24[%c0_242, %c8_243, %c0_244] : memref<1x17x16xf32, #tpu.memory_space<vmem>>, vector<1x6x16xf32>
    tpu.vector_store %arg24[%c0_242, %c8_243, %c0_244], %279 {strides = array<i32>} : memref<1x17x16xf32, #tpu.memory_space<vmem>>, vector<1x6x16xf32>,
    %c0_245 = arith.constant 0 : index
    %c5_246 = arith.constant 5 : index
    %c0_247 = arith.constant 0 : index
    %283 = vector.load %arg24[%c0_245, %c5_246, %c0_247] : memref<1x17x16xf32, #tpu.memory_space<vmem>>, vector<1x10x16xf32>
    %c0_248 = arith.constant 0 : index
    %c0_249 = arith.constant 0 : index
    %c0_250 = arith.constant 0 : index
    %284 = vector.load %arg7[%c0_248, %c0_249, %c0_250] : memref<3x16x32xf32, #tpu.memory_space<vmem>>, vector<1x16x32xf32>
    %285 = vector.shape_cast %284 : vector<1x16x32xf32> to vector<16x32xf32>
    %286 = vector.shape_cast %285 : vector<16x32xf32> to vector<1x16x32xf32>
    "tpu.trace_start"() <{level = 10 : i32, message = "blc,bcd->bld"}> : () -> ()
    %cst_251 = arith.constant dense<0.000000e+00> : vector<1x10x32xf32>
    %287 = tpu.matmul %283, %286, %cst_251 {dimension_numbers = #tpu.dot_dimension_numbers<[2], [1], [1], [2], [0, 0, 0, 1, 1, 2], [0], [0]>} : vector<1x10x16xf32>, vector<1x16x32xf32>, vector<1x10x32xf32> -> vector<1x10x32xf32>
    "tpu.trace_stop"() : () -> ()
    %c0_252 = arith.constant 0 : index
    %c6_253 = arith.constant 6 : index
    %c0_254 = arith.constant 0 : index
    %288 = vector.load %arg24[%c0_252, %c6_253, %c0_254] : memref<1x17x16xf32, #tpu.memory_space<vmem>>, vector<1x10x16xf32>
    %c1_255 = arith.constant 1 : index
    %c0_256 = arith.constant 0 : index
    %c0_257 = arith.constant 0 : index
    %289 = vector.load %arg7[%c1_255, %c0_256, %c0_257] : memref<3x16x32xf32, #tpu.memory_space<vmem>>, vector<1x16x32xf32>
    %290 = vector.shape_cast %289 : vector<1x16x32xf32> to vector<16x32xf32>
    %291 = vector.shape_cast %290 : vector<16x32xf32> to vector<1x16x32xf32>
    "tpu.trace_start"() <{level = 10 : i32, message = "blc,bcd->bld"}> : () -> ()
    %cst_258 = arith.constant dense<0.000000e+00> : vector<1x10x32xf32>
    %292 = tpu.matmul %288, %291, %cst_258 {dimension_numbers = #tpu.dot_dimension_numbers<[2], [1], [1], [2], [0, 0, 0, 1, 1, 2], [0], [0]>} : vector<1x10x16xf32>, vector<1x16x32xf32>, vector<1x10x32xf32> -> vector<1x10x32xf32>
    "tpu.trace_stop"() : () -> ()
    %293 = arith.addf %287, %292 : vector<1x10x32xf32>
    %c0_259 = arith.constant 0 : index
    %c7_260 = arith.constant 7 : index
    %c0_261 = arith.constant 0 : index
    %294 = vector.load %arg24[%c0_259, %c7_260, %c0_261] : memref<1x17x16xf32, #tpu.memory_space<vmem>>, vector<1x10x16xf32>
    %c2_262 = arith.constant 2 : index
    %c0_263 = arith.constant 0 : index
    %c0_264 = arith.constant 0 : index
    %295 = vector.load %arg7[%c2_262, %c0_263, %c0_264] : memref<3x16x32xf32, #tpu.memory_space<vmem>>, vector<1x16x32xf32>
    %296 = vector.shape_cast %295 : vector<1x16x32xf32> to vector<16x32xf32>
    %297 = vector.shape_cast %296 : vector<16x32xf32> to vector<1x16x32xf32>
    "tpu.trace_start"() <{level = 10 : i32, message = "blc,bcd->bld"}> : () -> ()
    %cst_265 = arith.constant dense<0.000000e+00> : vector<1x10x32xf32>
    %298 = tpu.matmul %294, %297, %cst_265 {dimension_numbers = #tpu.dot_dimension_numbers<[2], [1], [1], [2], [0, 0, 0, 1, 1, 2], [0], [0]>} : vector<1x10x16xf32>, vector<1x16x32xf32>, vector<1x10x32xf32> -> vector<1x10x32xf32>
    "tpu.trace_stop"() : () -> ()
    %299 = arith.addf %293, %298 : vector<1x10x32xf32>
    %c0_266 = arith.constant 0 : index
    %c0_267 = arith.constant 0 : index
    %300 = vector.load %arg8[%c0_266, %c0_267] : memref<1x32xf32, #tpu.memory_space<vmem>>, vector<1x32xf32>
    %301 = vector.shape_cast %300 : vector<1x32xf32> to vector<1x1x32xf32>
    %302 = vector.broadcast %301 : vector<1x1x32xf32> to vector<1x10x32xf32>
    %303 = arith.addf %299, %302 : vector<1x10x32xf32>
    %cst_268 = arith.constant 0.000000e+00 : f32
    %304 = vector.broadcast %cst_268 : f32 to vector<1x10x32xf32>
    %305 = arith.maximumf %303, %304 : vector<1x10x32xf32>
    %306 = tpu.iota {dimensions = array<i32: 0>} : vector<5x10xi32>
    %307 = tpu.iota {dimensions = array<i32: 1>} : vector<5x10xi32>
    %c2_i32_269 = arith.constant 2 : i32
    %308 = vector.broadcast %c2_i32_269 : i32 to vector<5x10xi32>
    %309 = arith.muli %308, %306 : vector<5x10xi32>
    %310 = arith.cmpi eq, %307, %309 : vector<5x10xi32>
    %311 = arith.extui %310 : vector<5x10xi1> to vector<5x10xi32>
    %312 = arith.sitofp %311 : vector<5x10xi32> to vector<5x10xf32>
    %313 = vector.shape_cast %312 : vector<5x10xf32> to vector<1x5x10xf32>
    %c2_i32_270 = arith.constant 2 : i32
    %314 = vector.broadcast %c2_i32_270 : i32 to vector<5x10xi32>
    %315 = arith.muli %314, %306 : vector<5x10xi32>
    %c1_i32_271 = arith.constant 1 : i32
    %316 = vector.broadcast %c1_i32_271 : i32 to vector<5x10xi32>
    %317 = arith.addi %315, %316 : vector<5x10xi32>
    %318 = arith.cmpi eq, %307, %317 : vector<5x10xi32>
    %319 = arith.extui %318 : vector<5x10xi1> to vector<5x10xi32>
    %320 = arith.sitofp %319 : vector<5x10xi32> to vector<5x10xf32>
    %321 = vector.shape_cast %320 : vector<5x10xf32> to vector<1x5x10xf32>
    "tpu.trace_start"() <{level = 10 : i32, message = "bjs,bsc->bjc"}> : () -> ()
    %cst_272 = arith.constant dense<0.000000e+00> : vector<1x5x32xf32>
    %322 = tpu.matmul %313, %305, %cst_272 {dimension_numbers = #tpu.dot_dimension_numbers<[2], [1], [1], [2], [0, 0, 0, 1, 1, 2], [0], [0]>} : vector<1x5x10xf32>, vector<1x10x32xf32>, vector<1x5x32xf32> -> vector<1x5x32xf32>
    %cst_273 = arith.constant dense<0.000000e+00> : vector<1x5x32xf32>
    %323 = tpu.matmul %321, %305, %cst_273 {dimension_numbers = #tpu.dot_dimension_numbers<[2], [1], [1], [2], [0, 0, 0, 1, 1, 2], [0], [0]>} : vector<1x5x10xf32>, vector<1x10x32xf32>, vector<1x5x32xf32> -> vector<1x5x32xf32>
    "tpu.trace_stop"() : () -> ()
    %324 = arith.maximumf %322, %323 : vector<1x5x32xf32>
    %cst_274 = arith.constant 0.000000e+00 : f32
    %325 = vector.broadcast %cst_274 : f32 to vector<1x14x32xf32>
    %c0_275 = arith.constant 0 : index
    %c0_276 = arith.constant 0 : index
    %c0_277 = arith.constant 0 : index
    %326 = vector.load %arg25[%c0_275, %c0_276, %c0_277] : memref<1x14x32xf32, #tpu.memory_space<vmem>>, vector<1x14x32xf32>
    tpu.vector_store %arg25[%c0_275, %c0_276, %c0_277], %325 {strides = array<i32>} : memref<1x14x32xf32, #tpu.memory_space<vmem>>, vector<1x14x32xf32>,
    %c0_278 = arith.constant 0 : index
    %c8_279 = arith.constant 8 : index
    %c0_280 = arith.constant 0 : index
    %327 = vector.load %arg25[%c0_278, %c8_279, %c0_280] : memref<1x14x32xf32, #tpu.memory_space<vmem>>, vector<1x5x32xf32>
    tpu.vector_store %arg25[%c0_278, %c8_279, %c0_280], %324 {strides = array<i32>} : memref<1x14x32xf32, #tpu.memory_space<vmem>>, vector<1x5x32xf32>,
    %c0_281 = arith.constant 0 : index
    %c7_282 = arith.constant 7 : index
    %c0_283 = arith.constant 0 : index
    %328 = vector.load %arg25[%c0_281, %c7_282, %c0_283] : memref<1x14x32xf32, #tpu.memory_space<vmem>>, vector<1x5x32xf32>
    %c0_284 = arith.constant 0 : index
    %c0_285 = arith.constant 0 : index
    %c0_286 = arith.constant 0 : index
    %329 = vector.load %arg9[%c0_284, %c0_285, %c0_286] : memref<3x32x32xf32, #tpu.memory_space<vmem>>, vector<1x32x32xf32>
    %330 = vector.shape_cast %329 : vector<1x32x32xf32> to vector<32x32xf32>
    %331 = vector.shape_cast %330 : vector<32x32xf32> to vector<1x32x32xf32>
    "tpu.trace_start"() <{level = 10 : i32, message = "blc,bcd->bld"}> : () -> ()
    %cst_287 = arith.constant dense<0.000000e+00> : vector<1x5x32xf32>
    %332 = tpu.matmul %328, %331, %cst_287 {dimension_numbers = #tpu.dot_dimension_numbers<[2], [1], [1], [2], [0, 0, 0, 1, 1, 2], [0], [0]>} : vector<1x5x32xf32>, vector<1x32x32xf32>, vector<1x5x32xf32> -> vector<1x5x32xf32>
    "tpu.trace_stop"() : () -> ()
    %c0_288 = arith.constant 0 : index
    %c8_289 = arith.constant 8 : index
    %c0_290 = arith.constant 0 : index
    %333 = vector.load %arg25[%c0_288, %c8_289, %c0_290] : memref<1x14x32xf32, #tpu.memory_space<vmem>>, vector<1x5x32xf32>
    %c1_291 = arith.constant 1 : index
    %c0_292 = arith.constant 0 : index
    %c0_293 = arith.constant 0 : index
    %334 = vector.load %arg9[%c1_291, %c0_292, %c0_293] : memref<3x32x32xf32, #tpu.memory_space<vmem>>, vector<1x32x32xf32>
    %335 = vector.shape_cast %334 : vector<1x32x32xf32> to vector<32x32xf32>
    %336 = vector.shape_cast %335 : vector<32x32xf32> to vector<1x32x32xf32>
    "tpu.trace_start"() <{level = 10 : i32, message = "blc,bcd->bld"}> : () -> ()
    %cst_294 = arith.constant dense<0.000000e+00> : vector<1x5x32xf32>
    %337 = tpu.matmul %333, %336, %cst_294 {dimension_numbers = #tpu.dot_dimension_numbers<[2], [1], [1], [2], [0, 0, 0, 1, 1, 2], [0], [0]>} : vector<1x5x32xf32>, vector<1x32x32xf32>, vector<1x5x32xf32> -> vector<1x5x32xf32>
    "tpu.trace_stop"() : () -> ()
    %338 = arith.addf %332, %337 : vector<1x5x32xf32>
    %c0_295 = arith.constant 0 : index
    %c9_296 = arith.constant 9 : index
    %c0_297 = arith.constant 0 : index
    %339 = vector.load %arg25[%c0_295, %c9_296, %c0_297] : memref<1x14x32xf32, #tpu.memory_space<vmem>>, vector<1x5x32xf32>
    %c2_298 = arith.constant 2 : index
    %c0_299 = arith.constant 0 : index
    %c0_300 = arith.constant 0 : index
    %340 = vector.load %arg9[%c2_298, %c0_299, %c0_300] : memref<3x32x32xf32, #tpu.memory_space<vmem>>, vector<1x32x32xf32>
    %341 = vector.shape_cast %340 : vector<1x32x32xf32> to vector<32x32xf32>
    %342 = vector.shape_cast %341 : vector<32x32xf32> to vector<1x32x32xf32>
    "tpu.trace_start"() <{level = 10 : i32, message = "blc,bcd->bld"}> : () -> ()
    %cst_301 = arith.constant dense<0.000000e+00> : vector<1x5x32xf32>
    %343 = tpu.matmul %339, %342, %cst_301 {dimension_numbers = #tpu.dot_dimension_numbers<[2], [1], [1], [2], [0, 0, 0, 1, 1, 2], [0], [0]>} : vector<1x5x32xf32>, vector<1x32x32xf32>, vector<1x5x32xf32> -> vector<1x5x32xf32>
    "tpu.trace_stop"() : () -> ()
    %344 = arith.addf %338, %343 : vector<1x5x32xf32>
    %c0_302 = arith.constant 0 : index
    %c0_303 = arith.constant 0 : index
    %345 = vector.load %arg10[%c0_302, %c0_303] : memref<1x32xf32, #tpu.memory_space<vmem>>, vector<1x32xf32>
    %346 = vector.shape_cast %345 : vector<1x32xf32> to vector<1x1x32xf32>
    %347 = vector.broadcast %346 : vector<1x1x32xf32> to vector<1x5x32xf32>
    %348 = arith.addf %344, %347 : vector<1x5x32xf32>
    %cst_304 = arith.constant 0.000000e+00 : f32
    %349 = vector.broadcast %cst_304 : f32 to vector<1x5x32xf32>
    %350 = arith.maximumf %348, %349 : vector<1x5x32xf32>
    %cst_305 = arith.constant 0.000000e+00 : f32
    %351 = vector.broadcast %cst_305 : f32 to vector<1x14x32xf32>
    %c0_306 = arith.constant 0 : index
    %c0_307 = arith.constant 0 : index
    %c0_308 = arith.constant 0 : index
    %352 = vector.load %arg26[%c0_306, %c0_307, %c0_308] : memref<1x14x32xf32, #tpu.memory_space<vmem>>, vector<1x14x32xf32>
    tpu.vector_store %arg26[%c0_306, %c0_307, %c0_308], %351 {strides = array<i32>} : memref<1x14x32xf32, #tpu.memory_space<vmem>>, vector<1x14x32xf32>,
    %c0_309 = arith.constant 0 : index
    %c8_310 = arith.constant 8 : index
    %c0_311 = arith.constant 0 : index
    %353 = vector.load %arg26[%c0_309, %c8_310, %c0_311] : memref<1x14x32xf32, #tpu.memory_space<vmem>>, vector<1x5x32xf32>
    tpu.vector_store %arg26[%c0_309, %c8_310, %c0_311], %350 {strides = array<i32>} : memref<1x14x32xf32, #tpu.memory_space<vmem>>, vector<1x5x32xf32>,
    %c0_312 = arith.constant 0 : index
    %c7_313 = arith.constant 7 : index
    %c0_314 = arith.constant 0 : index
    %354 = vector.load %arg26[%c0_312, %c7_313, %c0_314] : memref<1x14x32xf32, #tpu.memory_space<vmem>>, vector<1x5x32xf32>
    %c0_315 = arith.constant 0 : index
    %c0_316 = arith.constant 0 : index
    %c0_317 = arith.constant 0 : index
    %355 = vector.load %arg11[%c0_315, %c0_316, %c0_317] : memref<3x32x48xf32, #tpu.memory_space<vmem>>, vector<1x32x48xf32>
    %356 = vector.shape_cast %355 : vector<1x32x48xf32> to vector<32x48xf32>
    %357 = vector.shape_cast %356 : vector<32x48xf32> to vector<1x32x48xf32>
    "tpu.trace_start"() <{level = 10 : i32, message = "blc,bcd->bld"}> : () -> ()
    %cst_318 = arith.constant dense<0.000000e+00> : vector<1x5x48xf32>
    %358 = tpu.matmul %354, %357, %cst_318 {dimension_numbers = #tpu.dot_dimension_numbers<[2], [1], [1], [2], [0, 0, 0, 1, 1, 2], [0], [0]>} : vector<1x5x32xf32>, vector<1x32x48xf32>, vector<1x5x48xf32> -> vector<1x5x48xf32>
    "tpu.trace_stop"() : () -> ()
    %c0_319 = arith.constant 0 : index
    %c8_320 = arith.constant 8 : index
    %c0_321 = arith.constant 0 : index
    %359 = vector.load %arg26[%c0_319, %c8_320, %c0_321] : memref<1x14x32xf32, #tpu.memory_space<vmem>>, vector<1x5x32xf32>
    %c1_322 = arith.constant 1 : index
    %c0_323 = arith.constant 0 : index
    %c0_324 = arith.constant 0 : index
    %360 = vector.load %arg11[%c1_322, %c0_323, %c0_324] : memref<3x32x48xf32, #tpu.memory_space<vmem>>, vector<1x32x48xf32>
    %361 = vector.shape_cast %360 : vector<1x32x48xf32> to vector<32x48xf32>
    %362 = vector.shape_cast %361 : vector<32x48xf32> to vector<1x32x48xf32>
    "tpu.trace_start"() <{level = 10 : i32, message = "blc,bcd->bld"}> : () -> ()
    %cst_325 = arith.constant dense<0.000000e+00> : vector<1x5x48xf32>
    %363 = tpu.matmul %359, %362, %cst_325 {dimension_numbers = #tpu.dot_dimension_numbers<[2], [1], [1], [2], [0, 0, 0, 1, 1, 2], [0], [0]>} : vector<1x5x32xf32>, vector<1x32x48xf32>, vector<1x5x48xf32> -> vector<1x5x48xf32>
    "tpu.trace_stop"() : () -> ()
    %364 = arith.addf %358, %363 : vector<1x5x48xf32>
    %c0_326 = arith.constant 0 : index
    %c9_327 = arith.constant 9 : index
    %c0_328 = arith.constant 0 : index
    %365 = vector.load %arg26[%c0_326, %c9_327, %c0_328] : memref<1x14x32xf32, #tpu.memory_space<vmem>>, vector<1x5x32xf32>
    %c2_329 = arith.constant 2 : index
    %c0_330 = arith.constant 0 : index
    %c0_331 = arith.constant 0 : index
    %366 = vector.load %arg11[%c2_329, %c0_330, %c0_331] : memref<3x32x48xf32, #tpu.memory_space<vmem>>, vector<1x32x48xf32>
    %367 = vector.shape_cast %366 : vector<1x32x48xf32> to vector<32x48xf32>
    %368 = vector.shape_cast %367 : vector<32x48xf32> to vector<1x32x48xf32>
    "tpu.trace_start"() <{level = 10 : i32, message = "blc,bcd->bld"}> : () -> ()
    %cst_332 = arith.constant dense<0.000000e+00> : vector<1x5x48xf32>
    %369 = tpu.matmul %365, %368, %cst_332 {dimension_numbers = #tpu.dot_dimension_numbers<[2], [1], [1], [2], [0, 0, 0, 1, 1, 2], [0], [0]>} : vector<1x5x32xf32>, vector<1x32x48xf32>, vector<1x5x48xf32> -> vector<1x5x48xf32>
    "tpu.trace_stop"() : () -> ()
    %370 = arith.addf %364, %369 : vector<1x5x48xf32>
    %c0_333 = arith.constant 0 : index
    %c0_334 = arith.constant 0 : index
    %371 = vector.load %arg12[%c0_333, %c0_334] : memref<1x48xf32, #tpu.memory_space<vmem>>, vector<1x48xf32>
    %372 = vector.shape_cast %371 : vector<1x48xf32> to vector<1x1x48xf32>
    %373 = vector.broadcast %372 : vector<1x1x48xf32> to vector<1x5x48xf32>
    %374 = arith.addf %370, %373 : vector<1x5x48xf32>
    %cst_335 = arith.constant 0.000000e+00 : f32
    %375 = vector.broadcast %cst_335 : f32 to vector<1x5x48xf32>
    %376 = arith.maximumf %374, %375 : vector<1x5x48xf32>
    %cst_336 = arith.constant dense<0xFF800000> : vector<1x48xf32>
    %377 = vector.multi_reduction <maximumf>, %376, %cst_336 [1] : vector<1x5x48xf32> to vector<1x48xf32>
    %c0_337 = arith.constant 0 : index
    %c0_338 = arith.constant 0 : index
    %378 = vector.load %arg13[%c0_337, %c0_338] : memref<96x64xf32, #tpu.memory_space<vmem>>, vector<48x64xf32>
    %cst_339 = arith.constant dense<0.000000e+00> : vector<1x64xf32>
    %379 = tpu.matmul %188, %378, %cst_339 {dimension_numbers = #tpu.dot_dimension_numbers<[1], [0], [0], [1], [0, 0, 1, 1], [], []>} : vector<1x48xf32>, vector<48x64xf32>, vector<1x64xf32> -> vector<1x64xf32>
    %c48 = arith.constant 48 : index
    %c0_340 = arith.constant 0 : index
    %380 = vector.load %arg13[%c48, %c0_340] : memref<96x64xf32, #tpu.memory_space<vmem>>, vector<48x64xf32>
    %cst_341 = arith.constant dense<0.000000e+00> : vector<1x64xf32>
    %381 = tpu.matmul %377, %380, %cst_341 {dimension_numbers = #tpu.dot_dimension_numbers<[1], [0], [0], [1], [0, 0, 1, 1], [], []>} : vector<1x48xf32>, vector<48x64xf32>, vector<1x64xf32> -> vector<1x64xf32>
    %382 = arith.addf %379, %381 : vector<1x64xf32>
    %c0_342 = arith.constant 0 : index
    %c0_343 = arith.constant 0 : index
    %383 = vector.load %arg14[%c0_342, %c0_343] : memref<1x64xf32, #tpu.memory_space<vmem>>, vector<1x64xf32>
    %384 = arith.addf %382, %383 : vector<1x64xf32>
    %cst_344 = arith.constant 0.000000e+00 : f32
    %385 = vector.broadcast %cst_344 : f32 to vector<1x64xf32>
    %386 = arith.maximumf %384, %385 : vector<1x64xf32>
    %c0_345 = arith.constant 0 : index
    %c0_346 = arith.constant 0 : index
    %387 = vector.load %arg15[%c0_345, %c0_346] : memref<64x64xf32, #tpu.memory_space<vmem>>, vector<64x64xf32>
    %cst_347 = arith.constant dense<0.000000e+00> : vector<1x64xf32>
    %388 = tpu.matmul %386, %387, %cst_347 {dimension_numbers = #tpu.dot_dimension_numbers<[1], [0], [0], [1], [0, 0, 1, 1], [], []>} : vector<1x64xf32>, vector<64x64xf32>, vector<1x64xf32> -> vector<1x64xf32>
    %c0_348 = arith.constant 0 : index
    %c0_349 = arith.constant 0 : index
    %389 = vector.load %arg16[%c0_348, %c0_349] : memref<1x64xf32, #tpu.memory_space<vmem>>, vector<1x64xf32>
    %390 = arith.addf %388, %389 : vector<1x64xf32>
    %cst_350 = arith.constant 0.000000e+00 : f32
    %391 = vector.broadcast %cst_350 : f32 to vector<1x64xf32>
    %392 = arith.maximumf %390, %391 : vector<1x64xf32>
    %c0_351 = arith.constant 0 : index
    %c0_352 = arith.constant 0 : index
    %393 = vector.load %arg17[%c0_351, %c0_352] : memref<64x64xf32, #tpu.memory_space<vmem>>, vector<64x64xf32>
    %cst_353 = arith.constant dense<0.000000e+00> : vector<1x64xf32>
    %394 = tpu.matmul %392, %393, %cst_353 {dimension_numbers = #tpu.dot_dimension_numbers<[1], [0], [0], [1], [0, 0, 1, 1], [], []>} : vector<1x64xf32>, vector<64x64xf32>, vector<1x64xf32> -> vector<1x64xf32>
    %c0_354 = arith.constant 0 : index
    %c0_355 = arith.constant 0 : index
    %395 = vector.load %arg18[%c0_354, %c0_355] : memref<1x64xf32, #tpu.memory_space<vmem>>, vector<1x64xf32>
    %396 = arith.addf %394, %395 : vector<1x64xf32>
    %cst_356 = arith.constant 0.000000e+00 : f32
    %397 = vector.broadcast %cst_356 : f32 to vector<1x64xf32>
    %398 = arith.maximumf %396, %397 : vector<1x64xf32>
    %c0_357 = arith.constant 0 : index
    %c0_358 = arith.constant 0 : index
    %399 = vector.load %arg19[%c0_357, %c0_358] : memref<64x4xf32, #tpu.memory_space<vmem>>, vector<64x4xf32>
    %cst_359 = arith.constant dense<0.000000e+00> : vector<1x4xf32>
    %400 = tpu.matmul %398, %399, %cst_359 {dimension_numbers = #tpu.dot_dimension_numbers<[1], [0], [0], [1], [0, 0, 1, 1], [], []>} : vector<1x64xf32>, vector<64x4xf32>, vector<1x4xf32> -> vector<1x4xf32>
    %c0_360 = arith.constant 0 : index
    %c0_361 = arith.constant 0 : index
    %401 = vector.load %arg20[%c0_360, %c0_361] : memref<1x4xf32, #tpu.memory_space<vmem>>, vector<1x4xf32>
    %402 = arith.addf %400, %401 : vector<1x4xf32>
    %c0_362 = arith.constant 0 : index
    %c0_363 = arith.constant 0 : index
    %c0_364 = arith.constant 0 : index
    %403 = vector.load %arg21[%c0_362, %c0_363, %c0_364] : memref<1x1x4xf32, #tpu.memory_space<vmem>>, vector<1x1x4xf32>
    %404 = vector.shape_cast %403 : vector<1x1x4xf32> to vector<1x4xf32>
    %405 = vector.shape_cast %402 : vector<1x4xf32> to vector<1x1x4xf32>
    tpu.vector_store %arg21[%c0_362, %c0_363, %c0_364], %405 {strides = array<i32>} : memref<1x1x4xf32, #tpu.memory_space<vmem>>, vector<1x1x4xf32>,
    return
  }
  func.func @transform_0(%arg0: i32) -> (i32, i32, i32) {
    %c0_i32 = arith.constant 0 : i32
    %c0_i32_0 = arith.constant 0 : i32
    %c0_i32_1 = arith.constant 0 : i32
    return %arg0, %c0_i32, %c0_i32_0 : i32, i32, i32
  }
  func.func @transform_1(%arg0: i32) -> (i32, i32, i32) {
    %c0_i32 = arith.constant 0 : i32
    %c0_i32_0 = arith.constant 0 : i32
    %c0_i32_1 = arith.constant 0 : i32
    return %arg0, %c0_i32, %c0_i32_0 : i32, i32, i32
  }
  func.func @transform_2(%arg0: i32) -> (i32, i32, i32) {
    %c0_i32 = arith.constant 0 : i32
    %c0_i32_0 = arith.constant 0 : i32
    %c0_i32_1 = arith.constant 0 : i32
    %c0_i32_2 = arith.constant 0 : i32
    return %c0_i32, %c0_i32_0, %c0_i32_1 : i32, i32, i32
  }
  func.func @transform_3(%arg0: i32) -> (i32, i32) {
    %c0_i32 = arith.constant 0 : i32
    %c0_i32_0 = arith.constant 0 : i32
    %c0_i32_1 = arith.constant 0 : i32
    return %c0_i32, %c0_i32_0 : i32, i32
  }
  func.func @transform_4(%arg0: i32) -> (i32, i32, i32) {
    %c0_i32 = arith.constant 0 : i32
    %c0_i32_0 = arith.constant 0 : i32
    %c0_i32_1 = arith.constant 0 : i32
    %c0_i32_2 = arith.constant 0 : i32
    return %c0_i32, %c0_i32_0, %c0_i32_1 : i32, i32, i32
  }
  func.func @transform_5(%arg0: i32) -> (i32, i32) {
    %c0_i32 = arith.constant 0 : i32
    %c0_i32_0 = arith.constant 0 : i32
    %c0_i32_1 = arith.constant 0 : i32
    return %c0_i32, %c0_i32_0 : i32, i32
  }
  func.func @transform_6(%arg0: i32) -> (i32, i32, i32) {
    %c0_i32 = arith.constant 0 : i32
    %c0_i32_0 = arith.constant 0 : i32
    %c0_i32_1 = arith.constant 0 : i32
    %c0_i32_2 = arith.constant 0 : i32
    return %c0_i32, %c0_i32_0, %c0_i32_1 : i32, i32, i32
  }
  func.func @transform_7(%arg0: i32) -> (i32, i32) {
    %c0_i32 = arith.constant 0 : i32
    %c0_i32_0 = arith.constant 0 : i32
    %c0_i32_1 = arith.constant 0 : i32
    return %c0_i32, %c0_i32_0 : i32, i32
  }
  func.func @transform_8(%arg0: i32) -> (i32, i32, i32) {
    %c0_i32 = arith.constant 0 : i32
    %c0_i32_0 = arith.constant 0 : i32
    %c0_i32_1 = arith.constant 0 : i32
    %c0_i32_2 = arith.constant 0 : i32
    return %c0_i32, %c0_i32_0, %c0_i32_1 : i32, i32, i32
  }
  func.func @transform_9(%arg0: i32) -> (i32, i32) {
    %c0_i32 = arith.constant 0 : i32
    %c0_i32_0 = arith.constant 0 : i32
    %c0_i32_1 = arith.constant 0 : i32
    return %c0_i32, %c0_i32_0 : i32, i32
  }
  func.func @transform_10(%arg0: i32) -> (i32, i32, i32) {
    %c0_i32 = arith.constant 0 : i32
    %c0_i32_0 = arith.constant 0 : i32
    %c0_i32_1 = arith.constant 0 : i32
    %c0_i32_2 = arith.constant 0 : i32
    return %c0_i32, %c0_i32_0, %c0_i32_1 : i32, i32, i32
  }
  func.func @transform_11(%arg0: i32) -> (i32, i32) {
    %c0_i32 = arith.constant 0 : i32
    %c0_i32_0 = arith.constant 0 : i32
    %c0_i32_1 = arith.constant 0 : i32
    return %c0_i32, %c0_i32_0 : i32, i32
  }
  func.func @transform_12(%arg0: i32) -> (i32, i32) {
    %c0_i32 = arith.constant 0 : i32
    %c0_i32_0 = arith.constant 0 : i32
    %c0_i32_1 = arith.constant 0 : i32
    return %c0_i32, %c0_i32_0 : i32, i32
  }
  func.func @transform_13(%arg0: i32) -> (i32, i32) {
    %c0_i32 = arith.constant 0 : i32
    %c0_i32_0 = arith.constant 0 : i32
    %c0_i32_1 = arith.constant 0 : i32
    return %c0_i32, %c0_i32_0 : i32, i32
  }
  func.func @transform_14(%arg0: i32) -> (i32, i32) {
    %c0_i32 = arith.constant 0 : i32
    %c0_i32_0 = arith.constant 0 : i32
    %c0_i32_1 = arith.constant 0 : i32
    return %c0_i32, %c0_i32_0 : i32, i32
  }
  func.func @transform_15(%arg0: i32) -> (i32, i32) {
    %c0_i32 = arith.constant 0 : i32
    %c0_i32_0 = arith.constant 0 : i32
    %c0_i32_1 = arith.constant 0 : i32
    return %c0_i32, %c0_i32_0 : i32, i32
  }
  func.func @transform_16(%arg0: i32) -> (i32, i32) {
    %c0_i32 = arith.constant 0 : i32
    %c0_i32_0 = arith.constant 0 : i32
    %c0_i32_1 = arith.constant 0 : i32
    return %c0_i32, %c0_i32_0 : i32, i32
  }
  func.func @transform_17(%arg0: i32) -> (i32, i32) {
    %c0_i32 = arith.constant 0 : i32
    %c0_i32_0 = arith.constant 0 : i32
    %c0_i32_1 = arith.constant 0 : i32
    return %c0_i32, %c0_i32_0 : i32, i32
  }
  func.func @transform_18(%arg0: i32) -> (i32, i32) {
    %c0_i32 = arith.constant 0 : i32
    %c0_i32_0 = arith.constant 0 : i32
    %c0_i32_1 = arith.constant 0 : i32
    return %c0_i32, %c0_i32_0 : i32, i32
  }
  func.func @transform_19(%arg0: i32) -> (i32, i32) {
    %c0_i32 = arith.constant 0 : i32
    %c0_i32_0 = arith.constant 0 : i32
    %c0_i32_1 = arith.constant 0 : i32
    return %c0_i32, %c0_i32_0 : i32, i32
  }
  func.func @transform_20(%arg0: i32) -> (i32, i32, i32) {
    %c0_i32 = arith.constant 0 : i32
    %c0_i32_0 = arith.constant 0 : i32
    %c0_i32_1 = arith.constant 0 : i32
    return %arg0, %c0_i32, %c0_i32_0 : i32, i32, i32
  }
}

</mosaic_0001>

<bundles_post_ra>
// kernel: forward.1
= control target key start
LH: loop header
LB: loop body
LE: loop exit
PB: predicated region body
PF: predicated region fallthrough
CT: control target
= control target key end

     0   :  { %s7105_s0 = inlined_call_operand.vmem [shape: f32[2,12,8], index: 0, kind: input, shape index: {}]   ;;  %s7106_s1 = inlined_call_operand.vmem [shape: f32[2,12,8], index: 1, kind: input, shape index: {}]   ;;  %s7107_s2 = inlined_call_operand.hbm [shape: f32[3,8,16], index: 2, kind: input, shape index: {}]   ;;  %s7108_s3 = inlined_call_operand.hbm [shape: f32[1,16], index: 3, kind: input, shape index: {}]   ;;  %s7109_s4 = inlined_call_operand.hbm [shape: f32[3,16,16], index: 4, kind: input, shape index: {}]   ;;  %s7110_s5 = inlined_call_operand.hbm [shape: f32[1,16], index: 5, kind: input, shape index: {}]   ;;  %s7111_s6 = inlined_call_operand.hbm [shape: f32[3,16,32], index: 6, kind: input, shape index: {}]   ;;  %s7112_s7 = inlined_call_operand.hbm [shape: f32[1,32], index: 7, kind: input, shape index: {}]   ;;  %s7113_s8 = inlined_call_operand.vmem [shape: f32[3,32,32], index: 8, kind: input, shape index: {}]   ;;  %s7114_s9 = inlined_call_operand.hbm [shape: f32[1,32], index: 9, kind: input, shape index: {}]   ;;  %s7115_s10 = inlined_call_operand.vmem [shape: f32[3,32,48], index: 10, kind: input, shape index: {}]   ;;  %s7116_s11 = inlined_call_operand.hbm [shape: f32[1,48], index: 11, kind: input, shape index: {}]   ;;  %s7117_s12 = inlined_call_operand.vmem [shape: f32[96,64], index: 12, kind: input, shape index: {}]   ;;  %s7118_s13 = inlined_call_operand.vmem [shape: f32[1,64], index: 13, kind: input, shape index: {}]   ;;  %s7119_s14 = inlined_call_operand.vmem [shape: f32[64,64], index: 14, kind: input, shape index: {}]   ;;  %s7120_s15 = inlined_call_operand.vmem [shape: f32[1,64], index: 15, kind: input, shape index: {}]   ;;  %s7121_s16 = inlined_call_operand.vmem [shape: f32[64,64], index: 16, kind: input, shape index: {}]   ;;  %s7122_s17 = inlined_call_operand.vmem [shape: f32[1,64], index: 17, kind: input, shape index: {}]   ;;  %s7123_s18 = inlined_call_operand.vmem [shape: f32[64,4], index: 18, kind: input, shape index: {}]   ;;  %s7124_s19 = inlined_call_operand.vmem [shape: f32[1,4], index: 19, kind: input, shape index: {}]   ;;  %s7125_s20 = inlined_call_operand.hbm [shape: f32[2,1,4], index: 20, kind: output, shape index: {}]  }
   0x1   :  { %7136 = sst [smem:[#allocation34_spill]] %s7105_s0 }
   0x2   :  { %7137 = sst [smem:[#allocation35_spill]] %s7106_s1 }
   0x3   :  { %7138 = sst [smem:[#allocation36_spill]] %s7107_s2 }
   0x4   :  { %7139 = sst [smem:[#allocation37_spill]] %s7108_s3 }
   0x5   :  { %7140 = sst [smem:[#allocation38_spill]] %s7109_s4 }
   0x6   :  { %7141 = sst [smem:[#allocation39_spill]] %s7110_s5 }
   0x7   :  { %7142 = sst [smem:[#allocation40_spill]] %s7125_s20 }
   0x8   :  { %25 = vsyncpa [#allocation8], 0 }
   0x9   :  { %26 = vsyncpa [#allocation11], 0 }
   0xa   :  { %27 = vsyncpa [#allocation14], 0 }
   0xb   :  { %28 = vsyncpa [#allocation17], 0 }
   0xc   :  { %29 = vsyncpa [#allocation20], 0 }
   0xd   :  { %30 = vsyncpa [#allocation9], 0 }
   0xe   :  { %32 = vsyncpa [#allocation9 + $0x1], 0  ;;  %s6167_s1 = smov 0   ;;  %s6169_s22 = smov 0  }
   0xf   :  { %s6171_s23 = smov 0   ;;  %s6173_s24 = smov 0  }
  0x10 LB: > { %7143 = sst [smem:[#allocation28_spill]] %s6035_s1  ;;  %s6188_s2 = sadd.s32 4294967295, %s6047_s24   ;;  %s6047_s24 = sphi %s6173_s24, %s7177_s24   ;;  %s6043_s23 = sphi %s6171_s23, %s7179_s23   ;;  %s6039_s22 = sphi %s6169_s22, %s7181_s22   ;;  %s6035_s1 = sphi %s6167_s1, %s7180_s1  }
  0x11   : > { %7144 = sst [smem:[#allocation29_spill]] %s6043_s23  ;;  %s4869_s25 = sadd.s32 4294967294, %s6047_s24  }
  0x12   : > { %7145 = sst [smem:[#allocation30_spill]] %s6047_s24  ;;  %s6192_s3 = sadd.s32 1, %s6047_s24  }
  0x13   : > { %7146 = sst [smem:[#allocation31_spill]] %s6192_s3  ;;  %s475_s26 = sadd.s32 1, %s6043_s23 }
  0x14   : > { %s472_s27 = ssub.s32 %s6047_s24, %s6192_s3  ;;  %p485_p0 = scmp.ne.s32.totalorder %s6043_s23, %s6039_s22 }
  0x15   : > { %p473_p1 = scmp.eq.s32.totalorder %s472_s27, 0  ;;  %p486_p2 = scmp.eq.s32.totalorder %s6188_s2, 1 }
  0x16   : > { %p491_p3 = scmp.ne.s32.totalorder %s6039_s22, %s6035_s1  ;;  %p492_p4 = scmp.eq.s32.totalorder %s4869_s25, 1 }
  0x17   : > { %s6203_s28 = scalar_select %p473_p1, %s6043_s23, %s475_s26  }
  0x18   : > { %p6205_p5 = por %p486_p2, %p485_p0  ;;  %p6209_p6 = por %p492_p4, %p491_p3 }
  0x19   : > { %7147 = sst [smem:[#allocation32_spill]] %s6203_s28  ;;  %p4870_p7 = scmp.ge.s32.totalorder %s6047_s24, 1 }
  0x1a   : > { %s7148_s4 = scalar_select %p6205_p5, 1, 0 }
  0x1b   : > { %s7149_s29 = scalar_select %p6209_p6, 1, 0 }
  0x1c   : > { %p499_p8 = scmp.lt.s32.totalorder %s6047_s24, 3  ;;  %p7132_p9 = scmp.eq.s32.totalorder %s6188_s2, 0 }
  0x1d   : > { %7150 = sst [smem:[#allocation33_spill]] %s7149_s29  ;;  %s6049_s0 = smov [#allocation10]  }
  0x1e   : > { %p6216_p10 = pnand %p4870_p7, %p499_p8  ;;  %s525_s21 = sshll.u32 %s6049_s0, 4  ;;  %s526_s21 = int_to_ptr.vmem [resolvable:$true] %s525_s21 }
  0x1f   : > { %s6050_s25 = smov [#allocation13]   ;;  %s6051_s28 = smov [#allocation16]  }
  0x20   : > { %s7151_s30 = scalar_select %p6216_p10, 1, 0 }
  0x21   : > { %p5669_p11 = pneg %p6216_p10  ;;  %s549_s26 = sshll.u32 %s6050_s25, 4  ;;  %s550_s26 = int_to_ptr.vmem [resolvable:$true] %s549_s26 }
  0x22   : > { %s573_s23 = sshll.u32 %s6051_s28, 4  ;;  %s5770_s0 = scalar_lea.vmem %s526_s21, 16  ;;  %s6228_s23 = int_to_ptr.vmem [resolvable:$true] %s573_s23 }
  0x23   : > { %p6224_p12 = pnand %p7132_p9, %p5669_p11  ;;  %p5771_p0 = scmp.ne.s32.totalorder %s526_s21, %s5770_s0 }
  0x24   : > { %s5777_s25 = scalar_lea.vmem %s526_s21, 32  ;;  %p5778_p3 = scmp.lt.s32.totalorder %s526_s21, %s526_s21 }
  0x25   : > { %p6232_p13 = pneg %p6224_p12  ;;  %p5779_p4 = scmp.lt.s32.totalorder %s5777_s25, %s5770_s0 }
  0x27   : > { %p5773_p1 = pnand %p5771_p0, %p6232_p13  ;;  %p5780_p7 = por %p5779_p4, %p5778_p3 }
  0x29   : > { %p5774_p2 = pneg %p5773_p1 }
  0x2b   : > { %p5781_p8 = pnand %p5780_p7, %p5774_p2 }
  0x2d   : > { %5784 = shalt.err (!%p5781_p8)
}
  0x2e   : > { %s7154_s1 = sld [smem:[#allocation37_spill]]  ;;  %s5796_s24 = scalar_lea.vmem %s550_s26, 16 }
  0x2f   : > { %p5797_p11 = scmp.ne.s32.totalorder %s550_s26, %s5796_s24  ;;  %s5803_s20 = scalar_lea.vmem %s550_s26, 32 }
  0x30   : > { %p5804_p0 = scmp.lt.s32.totalorder %s550_s26, %s550_s26  ;;  %p5805_p1 = scmp.lt.s32.totalorder %s5803_s20, %s5796_s24 }
  0x31   : > { %p5799_p9 = pnand %p5797_p11, %p6232_p13 }
  0x32   : > { %p5806_p5 = por %p5805_p1, %p5804_p0 }
  0x33   : > { %p5800_p6 = pneg %p5799_p9 }
  0x34   : > { %5675 = dma.hbm_to_vmem [thread:$0]  (!%p6224_p12), %s7154_s1, 16, %s526_s21, [#allocation11]  }
  0x35   : > { %p5807_p10 = pnand %p5806_p5, %p5800_p6 }
  0x37   : > { %5810 = shalt.err (!%p5807_p10)
}
  0x38   : > { %s7155_s5 = sld [smem:[#allocation39_spill]]  ;;  %s5822_s1 = scalar_lea.vmem %s6228_s23, 16 }
  0x39   : > { %p5823_p2 = scmp.ne.s32.totalorder %s6228_s23, %s5822_s1  ;;  %s5829_s20 = scalar_lea.vmem %s6228_s23, 32 }
  0x3a   : > { %p5830_p5 = scmp.lt.s32.totalorder %s6228_s23, %s6228_s23  ;;  %p5831_p6 = scmp.lt.s32.totalorder %s5829_s20, %s5822_s1 }
  0x3b   : > { %p5825_p9 = pnand %p5823_p2, %p6232_p13 }
  0x3c   : > { %p5832_p10 = por %p5831_p6, %p5830_p5 }
  0x3d   : > { %p5826_p3 = pneg %p5825_p9 }
  0x3e   : > { %5681 = dma.hbm_to_vmem [thread:$0]  (!%p6224_p12), %s7155_s5, 16, %s550_s26, [#allocation14]  }
  0x3f   : > { %p5833_p4 = pnand %p5832_p10, %p5826_p3 }
  0x41   : > { %5836 = shalt.err (!%p5833_p4)
}
  0x42   : > { %5687 = dma.hbm_to_vmem [thread:$0]  (!%p6224_p12), %s7112_s7, 16, %s6228_s23, [#allocation17]  }
  0x43   : > { %s6052_s21 = smov [#allocation7]  }
  0x44   : > { %s511_s26 = sshll.u32 %s6052_s21, 4  ;;  %s512_s26 = int_to_ptr.vmem [resolvable:$true] %s511_s26 }
  0x45   : > { %s5848_s28 = scalar_lea.vmem %s512_s26, 384  ;;  %p5856_p0 = scmp.lt.s32.totalorder %s512_s26, %s512_s26 }
  0x46   : > { %p5849_p7 = scmp.ne.s32.totalorder %s512_s26, %s5848_s28  ;;  %p5857_p1 = scmp.lt.s32.totalorder %s5848_s28, %s5848_s28 }
  0x48   : > { %p5851_p8 = pnand %p5849_p7, %p6232_p13  ;;  %p5858_p2 = por %p5857_p1, %p5856_p0 }
  0x4a   : > { %p5852_p11 = pneg %p5851_p8 }
  0x4c   : > { %p5859_p9 = pnand %p5858_p2, %p5852_p11 }
  0x4e   : > { %5862 = shalt.err (!%p5859_p9)
}
  0x4f   : > { %s6053_s0 = smov 128   ;;  %s6054_s25 = smov 8  }
  0x50   : > { %s7156_s20 = sld [smem:[#allocation36_spill]]  ;;  %s6055_s24 = smov [#allocation12]  }
  0x51   : > { %s535_s29 = sshll.u32 %s6055_s24, 4  ;;  %s6056_s21 = smov [#allocation15]   ;;  %s536_s29 = int_to_ptr.vmem [resolvable:$true] %s535_s29 }
  0x52   : > { %s559_s5 = sshll.u32 %s6056_s21, 4  ;;  %s5874_s28 = scalar_lea.vmem %s536_s29, 768  ;;  %s560_s5 = int_to_ptr.vmem [resolvable:$true] %s559_s5 }
  0x53   : > { %p5875_p3 = scmp.ne.s32.totalorder %s536_s29, %s5874_s28  ;;  %p5882_p10 = scmp.lt.s32.totalorder %s536_s29, %s536_s29 }
  0x54   : > { %p5883_p4 = scmp.lt.s32.totalorder %s5874_s28, %s5874_s28 }
  0x55   : > { %p5877_p5 = pnand %p5875_p3, %p6232_p13 }
  0x56   : > { %5672 = dma.hbm_to_vmem [thread:$0]  (!%p6224_p12), %s7156_s20, 384, %s512_s26, [#allocation8], %s6053_s0, %s6053_s0, %s6054_s25  }
  0x57   : > { %p5878_p6 = pneg %p5877_p5  ;;  %p5884_p7 = por %p5883_p4, %p5882_p10 }
  0x59   : > { %p5885_p8 = pnand %p5884_p7, %p5878_p6 }
  0x5b   : > { %5888 = shalt.err (!%p5885_p8)
}
  0x5c   : > { %s7157_s1 = sld [smem:[#allocation38_spill]]  ;;  %s5900_s20 = scalar_lea.vmem %s560_s5, 768 }
  0x5d   : > { %p5901_p11 = scmp.ne.s32.totalorder %s560_s5, %s5900_s20  ;;  %p5908_p2 = scmp.lt.s32.totalorder %s560_s5, %s560_s5 }
  0x5e   : > { %p5909_p9 = scmp.lt.s32.totalorder %s5900_s20, %s5900_s20 }
  0x5f   : > { %p5903_p0 = pnand %p5901_p11, %p6232_p13 }
  0x60   : > { %p5910_p3 = por %p5909_p9, %p5908_p2 }
  0x61   : > { %p5904_p1 = pneg %p5903_p0 }
  0x62   : > { %5678 = dma.hbm_to_vmem [thread:$0]  (!%p6224_p12), %s7157_s1, 768, %s536_s29, [#allocation11], %s6053_s0, %s6053_s0, %s6054_s25  }
  0x63   : > { %p5911_p5 = pnand %p5910_p3, %p5904_p1 }
  0x65   : > { %5914 = shalt.err (!%p5911_p5)
}
  0x66   : > { %5684 = dma.hbm_to_vmem [thread:$0]  (!%p6224_p12), %s7111_s6, 768, %s560_s5, [#allocation14], %s6053_s0, %s6053_s0, %s6054_s25  }
  0x67   : > { %s6057_s29 = smov [#allocation18]   ;;  %s6058_s26 = smov [#allocation19]  }
  0x68   : > { %s587_s28 = sshll.u32 %s6057_s29, 4  ;;  %s601_s23 = sshll.u32 %s6058_s26, 4  ;;  %s588_s28 = int_to_ptr.vmem [resolvable:$true] %s587_s28  ;;  %s602_s23 = int_to_ptr.vmem [resolvable:$true] %s601_s23 }
  0x69   : > { %s5926_s1 = scalar_lea.vmem %s588_s28, 16  ;;  %s5933_s20 = scalar_lea.vmem %s588_s28, 32 }
  0x6a   : > { %p5927_p6 = scmp.ne.s32.totalorder %s588_s28, %s5926_s1  ;;  %p5934_p7 = scmp.lt.s32.totalorder %s588_s28, %s588_s28 }
  0x6b   : > { %p5935_p8 = scmp.lt.s32.totalorder %s5933_s20, %s5926_s1 }
  0x6c   : > { %p5929_p10 = pnand %p5927_p6, %p6232_p13 }
  0x6d   : > { %p5936_p11 = por %p5935_p8, %p5934_p7 }
  0x6e   : > { %p5930_p4 = pneg %p5929_p10 }
  0x70   : > { %p5937_p0 = pnand %p5936_p11, %p5930_p4 }
  0x72   : > { %5940 = shalt.err (!%p5937_p0)
}
  0x73   : > { %5690 = dma.hbm_to_vmem [thread:$0]  (!%p6224_p12), %s7114_s9, 16, %s588_s28, [#allocation17]  }
  0x74   : > { %s5952_s25 = scalar_lea.vmem %s602_s23, 16  ;;  %s5959_s24 = scalar_lea.vmem %s602_s23, 32 }
  0x75   : > { %p5953_p1 = scmp.ne.s32.totalorder %s602_s23, %s5952_s25  ;;  %p5960_p3 = scmp.lt.s32.totalorder %s602_s23, %s602_s23 }
  0x76   : > { %p5961_p5 = scmp.lt.s32.totalorder %s5959_s24, %s5952_s25 }
  0x77   : > { %p5955_p2 = pnand %p5953_p1, %p6232_p13 }
  0x78   : > { %p5962_p6 = por %p5961_p5, %p5960_p3 }
  0x79   : > { %p5956_p9 = pneg %p5955_p2 }
  0x7b   : > { %p5963_p10 = pnand %p5962_p6, %p5956_p9 }
  0x7d   : > { %5966 = shalt.err (!%p5963_p10)
}
  0x7e   : > { %5693 = dma.hbm_to_vmem [thread:$0]  (!%p6224_p12), %s7116_s11, 16, %s602_s23, [#allocation20]  }
  0x7f   : > { %p7158_p4 = scmp.ne.s32.totalorder %s7151_s30, 0 }
  0x80   : > { %p7159_p7 = scmp.eq.s32.totalorder (!%p7158_p4), %s6188_s2, 0 }
  0x81   : > { %654 = sbr.rel (%p7158_p4) target bundleno = 4091 (0xffb), region = 100 }
  0x86   : > { %6010 = dma.done.wait (%p7159_p7), [#allocation8], 384   ;;  %p7160_p13 = pmov %p7159_p7 }
  0x87   : > { %p7161_p8 = pmov %p7159_p7 }
  0x88   : > { %6012 = vsyncadd (%p7160_p13), [#allocation8], 4294966912 }
  0x89   : > { %6014 = dma.done.wait (%p7161_p8), [#allocation11], 784   ;;  %p7162_p11 = pmov %p7159_p7 }
  0x8a   : > { %p7163_p0 = pmov %p7159_p7 }
  0x8b   : > { %6016 = vsyncadd (%p7162_p11), [#allocation11], 4294966512 }
  0x8c   : > { %6018 = dma.done.wait (%p7163_p0), [#allocation14], 784   ;;  %p7164_p12 = pmov %p7163_p0 }
  0x8d   : > { %p7165_p1 = pmov %p7163_p0 }
  0x8e   : > { %6020 = vsyncadd (%p7164_p12), [#allocation14], 4294966512 }
  0x8f   : > { %6022 = dma.done.wait (%p7165_p1), [#allocation17], 32   ;;  %p7166_p2 = pmov %p7163_p0 }
  0x90   : > { %p7167_p9 = pmov %p7163_p0 }
  0x91   : > { %6024 = vsyncadd (%p7166_p2), [#allocation17], 4294967264 }
  0x92   : > { %6026 = dma.done.wait (%p7167_p9), [#allocation20], 16   ;;  %p7168_p3 = pmov %p7163_p0 }
  0x93   : > { %p744_p5 = scmp.lt.s32.totalorder %s6188_s2, 1  ;;  %vm756_vm0 = vcmask 64512   ;;  %vm759_vm1 = vcmask 63488   ;;  %v6059_v0 = vmov 0.0   ;;  %s7169_s26 = sld [smem:[#allocation34_spill]]  ;;  %vm762_vm2 = vcmask 60416  }
  0x94   : > { %6028 = vsyncadd (%p7168_p3), [#allocation20], 4294967280  ;;  %757 = vst.msk [vmem:[#allocation2] sm:$0xff] %vm756_vm0, %v6059_v0  ;;  %v6340_v1 = vld [vmem:[#allocation7 + $0x8] sm:$0xff]  ;;  %v6342_v2 = vld [vmem:[#allocation7] sm:$0xff]  ;;  %s7170_s5 = sld [smem:[#allocation35_spill]]  ;;  %v1031_v14 = vlaneseq }
  0x95   : > { %758 = vst.msk [vmem:[#allocation2 + $0x8] sm:$0xff] %vm756_vm0, %v6059_v0  ;;  %s745_s3 = scalar_select %p744_p5, %s6188_s2, 1  ;;  %5218 = vmatprep.subr.mxu0 %v6340_v1  ;;  %5223 = vmatprep.subr.mxu1 %v6342_v2  ;;  %v6347_v5 = vld [vmem:[#allocation7 + $0x10] sm:$0xff]  ;;  %vm6060_vm3 = vmmov 0   ;;  %vm1043_vm4 = vcmask 130048   ;;  %vm1193_vm7 = vcmask 124928  }
  0x96   : > { %760 = vst.msk [vmem:[#allocation2 + $0x10] sm:$0x7f] %vm759_vm1, %v6059_v0  ;;  %5219 = vmatpush3.msra.mxu0 %v6340_v1  ;;  %5224 = vmatpush3.msra.mxu1 %v6342_v2  ;;  %v1032_v15 = vshrl.u32 %v1031_v14, 7  ;;  %v6385_v23 = vld [vmem:[#allocation10] ss:$0 sm:$0xff]  ;;  %v1034_v24 = vand.u32 127, %v1031_v14 }
  0x97   : > { %s5013_s30 = sshll.u32 %s745_s3, 4  ;;  %5228 = vmatprep.subr.mxu0 %v6347_v5  ;;  %5233 = vmatprep.subr.mxu1 %v6059_v0  ;;  %1191 = vst.msk [vmem:[#allocation3] sm:$0xff] %vm1043_vm4, %v6059_v0  ;;  %1192 = vst.msk [vmem:[#allocation3 + $0x8] sm:$0xff] %vm1043_vm4, %v6059_v0  ;;  %v6401_v36 = vld [vmem:[#allocation12 + $0x18] sm:$0xff]  ;;  %v6403_v37 = vld [vmem:[#allocation12 + $0x8] sm:$0xff]  ;;  %vm1469_vm8 = vcmask 1043456  }
  0x98   : > { %1616 = vst.msk [vmem:[#allocation4] sm:$0xff] %vm1043_vm4, %v6059_v0  ;;  %1617 = vst.msk [vmem:[#allocation4 + $0x8] sm:$0xff] %vm1043_vm4, %v6059_v0  ;;  %v1035_v18 = vmul.u32 2, %v1032_v15  ;;  %v6405_v38 = vld [vmem:[#allocation12 + $0x10] sm:$0xff]  ;;  %v6411_v39 = vld [vmem:[#allocation12] sm:$0xff]  ;;  %vm1466_vm9 = vcmask 97280  }
  0x99   : > { %s748_s23 = scalar_lea.vmem %s7169_s26, %s5013_s30  ;;  %1194 = vst.msk [vmem:[#allocation3 + $0x10] sm:$0x7] %vm1193_vm7, %v6059_v0  ;;  %v6420_v40 = vld [vmem:[#allocation12 + $0x28] sm:$0xff]  ;;  %v6424_v46 = vld [vmem:[#allocation12 + $0x20] sm:$0xff]  ;;  %v6446_v59 = vld [vmem:[#allocation13] ss:$0 sm:$0xff] }
  0x9a   : > { %v754_v3 = vld [vmem:[%s748_s23] sm:$0xff]  ;;  %v755_v4 = vld [vmem:[%s748_s23 + $0x8] sm:$0xf]  ;;  %s753_s0 = scalar_lea.vmem %s7170_s5, %s5013_s30  ;;  %v1039_v25 = vadd.s32 1, %v1035_v18  ;;  %vm1036_vm5 = vcmp.eq.s32.totalorder %v1034_v24, %v1035_v18  ;;  %vm1618_vm10 = vcmask 122880   ;;  %vm1620_vm11 = vcmask 128000  }
  0x9b   : > { %761 = vst.msk [vmem:[#allocation2 + $0x8] sm:$0xff] %vm756_vm0, %v754_v3  ;;  %v2551_v6 = vld [vmem:[%s753_s0] sm:$0xff]  ;;  %v2552_v7 = vld [vmem:[%s753_s0 + $0x8] sm:$0xf]  ;;  %v6390_v34 = vsel %vm1036_vm5, 1.0, %v6059_v0  ;;  %vm1895_vm12 = vcmask 1041408  }
  0x9c   : > { %763 = vst.msk [vmem:[#allocation2 + $0x10] sm:$0xf] %vm762_vm2, %v755_v4  ;;  %vm1040_vm6 = vcmp.eq.s32.totalorder %v1034_v24, %v1039_v25  ;;  %v6483_v25 = vld [vmem:[#allocation15 + $0x20] sm:$0xff]  ;;  %vm1892_vm13 = vcmask 80896   ;;  %vm2044_vm14 = vcmask 259072   ;;  %vm2042_vm15 = vcmask 261120  }
  0x9d   : > { %v6393_v35 = vsel %vm1040_vm6, 1.0, %v6059_v0  ;;  %1619 = vst.msk [vmem:[#allocation4 + $0x10] sm:$0x1] %vm1618_vm10, %v6059_v0  ;;  %s742_s25 = sand.u32 1, %s6039_s22   ;;  %s5010_s29 = sshll.u32 %s6188_s2, 4 }
  0x9e   : > { %2045 = vst.msk [vmem:[#allocation5 + $0x8] sm:$0x3f] %vm2044_vm14, %v6059_v0  ;;  %2295 = vst.msk [vmem:[#allocation6 + $0x8] sm:$0x3f] %vm2044_vm14, %v6059_v0  ;;  %s743_s3 = scalar_lea.vmem [#allocation21], %s742_s25  ;;  %s7171_s26 = sld [smem:[#allocation40_spill]] }
  0x9f   : > { %2043 = vst.msk [vmem:[#allocation5] sm:$0xff] %vm2042_vm15, %v6059_v0  ;;  %2294 = vst.msk [vmem:[#allocation6] sm:$0xff] %vm2042_vm15, %v6059_v0  ;;  %s4723_s30 = sshll.u32 %s743_s3, 4  ;;  %s4711_s1 = scalar_lea.sflag [#allocation9], %s742_s25  ;;  %s4724_s30 = int_to_ptr.vmem [resolvable:$true] %s4723_s30 }
  0xa0   : > { %s5967_s20 = scalar_lea.vmem %s4724_s30, 16  ;;  %p7172_p10 = scmp.ne.s32.totalorder %s7148_s4, 0 }
  0xa1   : > { %p5968_p6 = scmp.ne.s32.totalorder %s4724_s30, %s5967_s20  ;;  %s6061_s2 = smov [#allocation21]  }
  0xa2   : > { %v767_v8 = vld [vmem:[#allocation2 + $0x6] sm:$0xff]  ;;  %s5971_s5 = sshll.u32 %s6061_s2, 4  ;;  %s5972_s5 = int_to_ptr.vmem [resolvable:$false] %s5971_s5 }
  0xa3   : > { %v764_v9 = vld [vmem:[#allocation2 + $0x5] sm:$0xff]  ;;  %5220 = vmatprep.mubr.msk.f32.mxu0 %vm756_vm0, %v767_v8  ;;  %v768_v11 = vld [vmem:[#allocation2 + $0xe] sm:$0xff]  ;;  %p5969_p4 = pnand %p5968_p6, %p7172_p10  ;;  %s5973_s0 = scalar_lea.vmem %s5972_s5, 32 }
  0xa4   : > { %v933_v10 = vld [vmem:[#allocation2 + $0x7] sm:$0xff]  ;;  %5225 = vmatprep.mubr.msk.f32.mxu1 %vm756_vm0, %v764_v9  ;;  %v934_v13 = vld [vmem:[#allocation2 + $0xf] sm:$0xff]  ;;  %5221 = vmatmul.mubr.msk.f32.vlgmr.msra.gmra.mxu0 %vm756_vm0, %v768_v11  ;;  %v6460_v9 = vld [vmem:[#allocation15 + $0x8] sm:$0xff]  ;;  %s7070_s23 = scalar_lea.hbm %s7171_s26, %s5010_s29  ;;  %p5974_p13 = scmp.lt.s32.totalorder %s4724_s30, %s5972_s5 }
  0xa5   : > { %v765_v12 = vld [vmem:[#allocation2 + $0xd] sm:$0xff]  ;;  %2553 = vst.msk [vmem:[#allocation2] sm:$0xff] %vm756_vm0, %v6059_v0  ;;  %5229 = vmatpush3.msra.mxu0 %v6347_v5  ;;  %5230 = vmatprep.mubr.msk.f32.mxu0 %vm756_vm0, %v933_v10  ;;  %v6462_v10 = vld [vmem:[#allocation15 + $0x10] sm:$0xff]  ;;  %p5970_p7 = pneg %p5969_p4  ;;  %p5975_p8 = scmp.lt.s32.totalorder %s5973_s0, %s5967_s20 }
  0xa6   : > { %5226 = vmatmul.mubr.msk.f32.vlgmr.msra.gmra.mxu1 %vm756_vm0, %v765_v12  ;;  %2554 = vst.msk [vmem:[#allocation2 + $0x8] sm:$0xff] %vm756_vm0, %v6059_v0  ;;  %5240 = vmatprep.subr.mxu0 %v6059_v0  ;;  %v6458_v8 = vld [vmem:[#allocation15 + $0x18] sm:$0xff]  ;;  %v6466_v11 = vld [vmem:[#allocation15] sm:$0xff]  ;;  %v6476_v12 = vld [vmem:[#allocation15 + $0x28] sm:$0xff] }
  0xa7   : > { %2555 = vst.msk [vmem:[#allocation2 + $0x10] sm:$0x7f] %vm759_vm1, %v6059_v0  ;;  %5237 = vmatprep.mubr.msk.f32.mxu1 %vm6060_vm3, %v6059_v0  ;;  %vm2046_vm1 = vcmask 258048   ;;  %p5976_p11 = por %p5975_p8, %p5974_p13 }
  0xa8   : > { %2556 = vst.msk [vmem:[#allocation2 + $0x8] sm:$0xff] %vm756_vm0, %v2551_v6  ;;  %5231 = vmatmul.mubr.msk.f32.vlgmr.msra.gmra.mxu0 %vm756_vm0, %v934_v13  ;;  %v1794_v13 = vld [vmem:[#allocation4 + $0xf] sm:$0x3] }
  0xa9   : > { %2557 = vst.msk [vmem:[#allocation2 + $0x10] sm:$0xf] %vm762_vm2, %v2552_v7  ;;  %5244 = vmatprep.mubr.msk.f32.mxu0 %vm6060_vm3, %v6059_v0  ;;  %vm4309_vm2 = vcmask 392192   ;;  %p5977_p0 = pnand %p5976_p11, %p5970_p7 }
  0xaa   : > { %3382 = vst.msk [vmem:[#allocation4 + $0x10] sm:$0x1] %vm1618_vm10, %v6059_v0 }
 0x164   : > { %v5222_v16 = vpop.f32.mrf.mxu0 }
 0x166   : > { %v5227_v17 = vpop.f32.mrf.mxu1  ;;  %v843_v19 = vpop.f32.mrf.mxu0 }
 0x167   : > { %v930_v21 = vadd.f32 %v5227_v17, %v5222_v16 }
 0x168   : > { %v924_v20 = vpop.f32.mrf.mxu1  ;;  %v5232_v22 = vpop.f32.mrf.mxu0 }
 0x169   : > { %v925_v26 = vadd.f32 %v924_v20, %v843_v19  ;;  %v1019_v27 = vadd.f32 %v5232_v22, %v930_v21  ;;  %v1627_v19 = vld [vmem:[#allocation4 + $0xe] sm:$0x3] }
 0x16a   : > { %v1009_v28 = vpop.f32.mrf.mxu0 }
 0x16b   : > { %v1028_v29 = vadd.f32 %v6385_v23, %v1019_v27  ;;  %v1018_v30 = vadd.f32 %v1009_v28, %v925_v26 }
 0x16d   : > { %v1030_v31 = vmax.f32 %v1028_v29, 0.0  ;;  %v1027_v32 = vadd.f32 %v6385_v23, %v1018_v30 }
 0x16f   : > { %v1029_v33 = vmax.f32 %v1027_v32, 0.0  ;;  %5234 = vmatpush3.msra.mxu1 %v1030_v31  ;;  %5241 = vmatpush3.msra.mxu0 %v1030_v31  ;;  %v6501_v32 = vld [vmem:[#allocation16] ss:$0 sm:$0xff] }
 0x170   : > { %5235 = vmatprep.subr.mxu1 %v6059_v0  ;;  %5242 = vmatprep.subr.mxu0 %v6059_v0 }
 0x171   : > { %5236 = vmatpush3.msra.mxu1 %v1029_v33  ;;  %5243 = vmatpush3.msra.mxu0 %v1029_v33 }
 0x172   : > { %5238 = vmatmul.mubr.msk.f32.vlgmr.msra.gmra.mxu1 %vm1043_vm4, %v6390_v34  ;;  %5245 = vmatmul.mubr.msk.f32.vlgmr.msra.gmra.mxu0 %vm1043_vm4, %v6393_v35 }
 0x173   : > { %5247 = vmatprep.subr.mxu1 %v6401_v36  ;;  %5254 = vmatprep.subr.mxu0 %v6403_v37 }
 0x174   : > { %5248 = vmatpush3.msra.mxu1 %v6401_v36  ;;  %5255 = vmatpush3.msra.mxu0 %v6403_v37 }
 0x175   : > { %5249 = vmatprep.subr.mxu1 %v6405_v38  ;;  %5256 = vmatprep.subr.mxu0 %v6411_v39 }
 0x176   : > { %5250 = vmatpush3.msra.mxu1 %v6405_v38  ;;  %5257 = vmatpush3.msra.mxu0 %v6411_v39 }
 0x177   : > { %5268 = vmatprep.subr.mxu0 %v6059_v0  ;;  %5261 = vmatprep.subr.mxu1 %v6420_v40 }
 0x232   : > { %v1113_v41 = vpop.f32.mrf.mxu1  ;;  %v1186_v42 = vpop.f32.mrf.mxu0 }
 0x233   : > { %v1190_v43 = vmax.f32 %v1113_v41, %v1186_v42 }
 0x234   : > { %v5239_v44 = vpop.f32.mrf.mxu1  ;;  %v5246_v45 = vpop.f32.mrf.mxu0 }
 0x235   : > { %1195 = vst.msk [vmem:[#allocation3 + $0x8] sm:$0xff] %vm1043_vm4, %v1190_v43 }
 0x23c   : > { %v1200_v47 = vld [vmem:[#allocation3 + $0x6] sm:$0xff]  ;;  %v1201_v49 = vld [vmem:[#allocation3 + $0xe] sm:$0xf] }
 0x23d   : > { %v1196_v48 = vld [vmem:[#allocation3 + $0x5] sm:$0xff]  ;;  %5251 = vmatprep.mubr.msk.f32.mxu1 %vm1043_vm4, %v1200_v47  ;;  %v1197_v50 = vld [vmem:[#allocation3 + $0xd] sm:$0xf] }
 0x23e   : > { %5258 = vmatprep.mubr.msk.f32.mxu0 %vm1043_vm4, %v1196_v48  ;;  %v1367_v51 = vld [vmem:[#allocation3 + $0x7] sm:$0xff]  ;;  %v1368_v52 = vld [vmem:[#allocation3 + $0xf] sm:$0xf]  ;;  %5252 = vmatmul.mubr.msk.f32.vlgmr.msra.gmra.mxu1 %vm1043_vm4, %v1201_v49 }
 0x23f   : > { %5259 = vmatmul.mubr.msk.f32.vlgmr.msra.gmra.mxu0 %vm1043_vm4, %v1197_v50  ;;  %2964 = vst.msk [vmem:[#allocation3] sm:$0xff] %vm1043_vm4, %v6059_v0  ;;  %2965 = vst.msk [vmem:[#allocation3 + $0x8] sm:$0xff] %vm1043_vm4, %v6059_v0  ;;  %5262 = vmatpush3.msra.mxu1 %v6420_v40  ;;  %v6526_v49 = vld [vmem:[%s7113_s8 + $0x38] sm:$0xff]  ;;  %v6531_v50 = vld [vmem:[%s7113_s8 + $0x30] sm:$0xff] }
 0x240   : > { %2966 = vst.msk [vmem:[#allocation3 + $0x10] sm:$0x7] %vm1193_vm7, %v6059_v0  ;;  %5265 = vmatprep.mubr.msk.f32.mxu1 %vm1043_vm4, %v1367_v51  ;;  %5263 = vmatprep.subr.mxu1 %v6424_v46  ;;  %v6542_v51 = vld [vmem:[%s7113_s8 + $0x28] sm:$0xff] }
 0x241   : > { %5272 = vmatprep.mubr.msk.f32.mxu0 %vm6060_vm3, %v6059_v0  ;;  %5264 = vmatpush3.msra.mxu1 %v6424_v46 }
 0x242   : > { %5266 = vmatmul.mubr.msk.f32.vlgmr.msra.gmra.mxu1 %vm1043_vm4, %v1368_v52  ;;  %5275 = vmatprep.subr.mxu1 %v6059_v0  ;;  %v6549_v52 = vld [vmem:[%s7113_s8 + $0x20] sm:$0xff] }
 0x243   : > { %5279 = vmatprep.mubr.msk.f32.mxu1 %vm6060_vm3, %v6059_v0 }
 0x2fe   : > { %v5253_v53 = vpop.f32.mrf.mxu1 }
 0x2ff   : > { %v5260_v54 = vpop.f32.mrf.mxu0 }
 0x300   : > { %v1277_v55 = vpop.f32.mrf.mxu1  ;;  %v1364_v57 = vadd.f32 %v5260_v54, %v5253_v53 }
 0x301   : > { %v1358_v56 = vpop.f32.mrf.mxu0 }
 0x302   : > { %v5267_v58 = vpop.f32.mrf.mxu1  ;;  %v1359_v60 = vadd.f32 %v1358_v56, %v1277_v55 }
 0x303   : > { %v1454_v61 = vadd.f32 %v5267_v58, %v1364_v57  ;;  %v6559_v58 = vld [vmem:[%s7113_s8 + $0x18] sm:$0xff] }
 0x304   : > { %v1444_v62 = vpop.f32.mrf.mxu1 }
 0x305   : > { %v1463_v63 = vadd.f32 %v6446_v59, %v1454_v61  ;;  %v1453_v3 = vadd.f32 %v1444_v62, %v1359_v60 }
 0x307   : > { %v1465_v4 = vmax.f32 %v1463_v63, 0.0  ;;  %v1462_v6 = vadd.f32 %v6446_v59, %v1453_v3  ;;  %v6565_v63 = vld [vmem:[%s7113_s8 + $0x10] sm:$0xff]  ;;  %v6578_v3 = vld [vmem:[%s7113_s8 + $0x8] sm:$0xff] }
 0x309   : > { %v1464_v7 = vmax.f32 %v1462_v6, 0.0  ;;  %5269 = vmatpush3.msk.msra.mxu0 %vm1469_vm8, %v1465_v4  ;;  %5276 = vmatpush3.msk.msra.mxu1 %vm1469_vm8, %v1465_v4  ;;  %v6585_v4 = vld [vmem:[%s7113_s8] sm:$0xff]  ;;  %v6592_v6 = vld [vmem:[%s7113_s8 + $0x58] sm:$0xff] }
 0x30a   : > { %5270 = vmatprep.subr.mxu0 %v6059_v0  ;;  %5277 = vmatprep.subr.mxu1 %v6059_v0 }
 0x30b   : > { %5271 = vmatpush3.msra.mxu0 %v1464_v7  ;;  %5278 = vmatpush3.msra.mxu1 %v1464_v7  ;;  %v6600_v7 = vld [vmem:[%s7113_s8 + $0x50] sm:$0xff] }
 0x30c   : > { %5273 = vmatmul.mubr.msk.f32.vlgmr.msra.gmra.mxu0 %vm1466_vm9, %v6390_v34  ;;  %5280 = vmatmul.mubr.msk.f32.vlgmr.msra.gmra.mxu1 %vm1466_vm9, %v6393_v35 }
 0x30d   : > { %5282 = vmatprep.subr.mxu0 %v6458_v8  ;;  %5289 = vmatprep.subr.mxu1 %v6460_v9 }
 0x30e   : > { %5283 = vmatpush3.msra.mxu0 %v6458_v8  ;;  %5290 = vmatpush3.msra.mxu1 %v6460_v9 }
 0x30f   : > { %5284 = vmatprep.subr.mxu0 %v6462_v10  ;;  %5291 = vmatprep.subr.mxu1 %v6466_v11 }
 0x310   : > { %5285 = vmatpush3.msra.mxu0 %v6462_v10  ;;  %5292 = vmatpush3.msra.mxu1 %v6466_v11 }
 0x311   : > { %5303 = vmatprep.subr.mxu1 %v6059_v0  ;;  %5296 = vmatprep.subr.mxu0 %v6476_v12 }
 0x3cc   : > { %v1539_v14 = vpop.f32.mrf.mxu0  ;;  %v1611_v15 = vpop.f32.mrf.mxu1 }
 0x3cd   : > { %v1615_v16 = vmax.f32 %v1539_v14, %v1611_v15  ;;  %v6616_v14 = vld [vmem:[%s7113_s8 + $0x40] sm:$0xff]  ;;  %v6628_v15 = vld [vmem:[%s7115_s10 + $0x38] sm:$0xff] }
 0x3ce   : > { %v5274_v17 = vpop.f32.mrf.mxu0  ;;  %v5281_v18 = vpop.f32.mrf.mxu1 }
 0x3cf   : > { %1621 = vst.msk [vmem:[#allocation4 + $0x8] sm:$0x3f] %vm1620_vm11, %v1615_v16  ;;  %v6634_v16 = vld [vmem:[%s7115_s10 + $0x18] sm:$0xff]  ;;  %v6639_v17 = vld [vmem:[%s7115_s10 + $0x30] sm:$0xff] }
 0x3d0   : > { %v6644_v18 = vld [vmem:[%s7115_s10 + $0x10] sm:$0xff] }
 0x3d6   : > { %v1626_v20 = vld [vmem:[#allocation4 + $0x6] sm:$0xff] }
 0x3d7   : > { %v1622_v21 = vld [vmem:[#allocation4 + $0x5] sm:$0xff]  ;;  %v1623_v22 = vld [vmem:[#allocation4 + $0xd] sm:$0x3]  ;;  %5286 = vmatprep.mubr.msk.f32.mxu0 %vm1043_vm4, %v1626_v20  ;;  %v6658_v20 = vld [vmem:[%s7115_s10 + $0x8] sm:$0xff] }
 0x3d8   : > { %5293 = vmatprep.mubr.msk.f32.mxu1 %vm1043_vm4, %v1622_v21  ;;  %v1793_v24 = vld [vmem:[#allocation4 + $0x7] sm:$0xff]  ;;  %5287 = vmatmul.mubr.msk.f32.vlgmr.msra.gmra.mxu0 %vm1043_vm4, %v1627_v19  ;;  %v6651_v19 = vld [vmem:[%s7115_s10 + $0x28] sm:$0xff]  ;;  %v6665_v21 = vld [vmem:[%s7115_s10 + $0x20] sm:$0xff] }
 0x3d9   : > { %5294 = vmatmul.mubr.msk.f32.vlgmr.msra.gmra.mxu1 %vm1043_vm4, %v1623_v22  ;;  %3380 = vst.msk [vmem:[#allocation4] sm:$0xff] %vm1043_vm4, %v6059_v0  ;;  %3381 = vst.msk [vmem:[#allocation4 + $0x8] sm:$0xff] %vm1043_vm4, %v6059_v0  ;;  %5297 = vmatpush3.msra.mxu0 %v6476_v12  ;;  %v6672_v22 = vld [vmem:[%s7115_s10] sm:$0xff] }
 0x3da   : > { %5300 = vmatprep.mubr.msk.f32.mxu0 %vm1043_vm4, %v1793_v24  ;;  %5298 = vmatprep.subr.mxu0 %v6483_v25 }
 0x3db   : > { %5307 = vmatprep.mubr.msk.f32.mxu1 %vm6060_vm3, %v6059_v0  ;;  %5299 = vmatpush3.msra.mxu0 %v6483_v25 }
 0x3dc   : > { %5301 = vmatmul.mubr.msk.f32.vlgmr.msra.gmra.mxu0 %vm1043_vm4, %v1794_v13  ;;  %5310 = vmatprep.subr.mxu0 %v6059_v0  ;;  %v6609_v13 = vld [vmem:[%s7113_s8 + $0x48] sm:$0xff] }
 0x3dd   : > { %5314 = vmatprep.mubr.msk.f32.mxu0 %vm6060_vm3, %v6059_v0 }
 0x498   : > { %v5288_v26 = vpop.f32.mrf.mxu0 }
 0x499   : > { %v5295_v27 = vpop.f32.mrf.mxu1 }
 0x49a   : > { %v1703_v28 = vpop.f32.mrf.mxu0  ;;  %v1790_v30 = vadd.f32 %v5295_v27, %v5288_v26 }
 0x49b   : > { %v1784_v29 = vpop.f32.mrf.mxu1 }
 0x49c   : > { %v5302_v31 = vpop.f32.mrf.mxu0  ;;  %v1785_v33 = vadd.f32 %v1784_v29, %v1703_v28 }
 0x49d   : > { %v1880_v41 = vadd.f32 %v5302_v31, %v1790_v30  ;;  %v6681_v31 = vld [vmem:[#allocation18] ss:$0 sm:$0xff] }
 0x49e   : > { %v1870_v42 = vpop.f32.mrf.mxu0 }
 0x49f   : > { %v1889_v43 = vadd.f32 %v6501_v32, %v1880_v41  ;;  %v1879_v44 = vadd.f32 %v1870_v42, %v1785_v33 }
 0x4a1   : > { %v1891_v45 = vmax.f32 %v1889_v43, 0.0  ;;  %v1888_v47 = vadd.f32 %v6501_v32, %v1879_v44  ;;  %v6688_v44 = vld [vmem:[%s7115_s10 + $0x58] sm:$0xff] }
 0x4a3   : > { %v1890_v48 = vmax.f32 %v1888_v47, 0.0  ;;  %5304 = vmatpush3.msk.msra.mxu1 %vm1895_vm12, %v1891_v45  ;;  %5311 = vmatpush3.msk.msra.mxu0 %vm1895_vm12, %v1891_v45 }
 0x4a4   : > { %5305 = vmatprep.subr.mxu1 %v6059_v0  ;;  %5312 = vmatprep.subr.mxu0 %v6059_v0 }
 0x4a5   : > { %5306 = vmatpush3.msra.mxu1 %v1890_v48  ;;  %5313 = vmatpush3.msra.mxu0 %v1890_v48 }
 0x4a6   : > { %5308 = vmatmul.mubr.msk.f32.vlgmr.msra.gmra.mxu1 %vm1892_vm13, %v6390_v34  ;;  %5315 = vmatmul.mubr.msk.f32.vlgmr.msra.gmra.mxu0 %vm1892_vm13, %v6393_v35 }
 0x4a7   : > { %5317 = vmatprep.subr.mxu1 %v6059_v0  ;;  %5325 = vmatprep.mubr.msk.f32.mxu1 %vm6060_vm3, %v6059_v0 }
 0x4a8   : > { %5350 = vmatprep.subr.mxu0 %v6059_v0  ;;  %5358 = vmatprep.mubr.msk.f32.mxu0 %vm6060_vm3, %v6059_v0 }
 0x4a9   : > { %5318 = vmatpush3.msra.mxu1 %v6526_v49  ;;  %5351 = vmatpush3.msra.mxu0 %v6628_v15 }
 0x4aa   : > { %5319 = vmatprep.subr.mxu1 %v6059_v0  ;;  %5352 = vmatprep.subr.mxu0 %v6059_v0 }
 0x4ab   : > { %5320 = vmatpush3.msra.mxu1 %v6531_v50  ;;  %5353 = vmatpush3.msra.mxu0 %v6639_v17 }
 0x4ac   : > { %5321 = vmatprep.subr.mxu1 %v6059_v0  ;;  %5354 = vmatprep.subr.mxu0 %v6059_v0 }
 0x4ad   : > { %5322 = vmatpush3.msra.mxu1 %v6542_v51  ;;  %5355 = vmatpush3.msra.mxu0 %v6651_v19 }
 0x4ae   : > { %5323 = vmatprep.subr.mxu1 %v6059_v0  ;;  %5356 = vmatprep.subr.mxu0 %v6059_v0 }
 0x4af   : > { %5324 = vmatpush3.msra.mxu1 %v6549_v52  ;;  %5357 = vmatpush3.msra.mxu0 %v6665_v21 }
 0x4b0   : > { %5328 = vmatprep.subr.mxu1 %v6059_v0  ;;  %5372 = vmatprep.subr.mxu0 %v6059_v0 }
 0x566   : > { %v1965_v53 = vpop.f32.mrf.mxu1  ;;  %v2037_v54 = vpop.f32.mrf.mxu0 }
 0x567   : > { %v2041_v55 = vmax.f32 %v1965_v53, %v2037_v54  ;;  %v6697_v53 = vld [vmem:[%s7115_s10 + $0x50] sm:$0xff]  ;;  %v2561_v54 = vld [vmem:[#allocation2 + $0x6] sm:$0xff] }
 0x568   : > { %v5309_v56 = vpop.f32.mrf.mxu1  ;;  %v5316_v57 = vpop.f32.mrf.mxu0 }
 0x569   : > { %2047 = vst.msk [vmem:[#allocation5 + $0x8] sm:$0x1f] %vm2046_vm1, %v2041_v55  ;;  %v2562_v55 = vld [vmem:[#allocation2 + $0xe] sm:$0xff]  ;;  %v6717_v57 = vld [vmem:[%s7115_s10 + $0x40] sm:$0xff] }
 0x56a   : > { %v6708_v56 = vld [vmem:[%s7115_s10 + $0x48] sm:$0xff] }
 0x570   : > { %v2053_v60 = vld [vmem:[#allocation5 + $0x8] sm:$0x1f] }
 0x571   : > { %v2048_v61 = vld [vmem:[#allocation5 + $0x7] sm:$0x1f]  ;;  %5326 = vmatmul.mubr.msk.f32.vlgmr.msra.gmra.mxu1 %vm2042_vm15, %v2053_v60  ;;  %v2726_v60 = vld [vmem:[#allocation2 + $0x7] sm:$0xff] }
 0x572   : > { %v2205_v62 = vld [vmem:[#allocation5 + $0x9] sm:$0x1f]  ;;  %3796 = vst.msk [vmem:[#allocation5] sm:$0xff] %vm2042_vm15, %v6059_v0  ;;  %5329 = vmatpush3.msra.mxu1 %v6559_v58  ;;  %5336 = vmatprep.mubr.msk.f32.mxu1 %vm6060_vm3, %v6059_v0 }
 0x573   : > { %3797 = vst.msk [vmem:[#allocation5 + $0x8] sm:$0x3f] %vm2044_vm14, %v6059_v0  ;;  %5330 = vmatprep.subr.mxu1 %v6059_v0 }
 0x574   : > { %5331 = vmatpush3.msra.mxu1 %v6565_v63 }
 0x575   : > { %5332 = vmatprep.subr.mxu1 %v6059_v0 }
 0x576   : > { %5333 = vmatpush3.msra.mxu1 %v6578_v3 }
 0x577   : > { %5334 = vmatprep.subr.mxu1 %v6059_v0 }
 0x578   : > { %5335 = vmatpush3.msra.mxu1 %v6585_v4 }
 0x579   : > { %5337 = vmatmul.mubr.msk.f32.vlgmr.msra.gmra.mxu1 %vm2042_vm15, %v2048_v61  ;;  %5339 = vmatprep.subr.mxu1 %v6059_v0  ;;  %v2727_v61 = vld [vmem:[#allocation2 + $0xf] sm:$0xff] }
 0x57a   : > { %5340 = vmatpush3.msra.mxu1 %v6592_v6  ;;  %5347 = vmatprep.mubr.msk.f32.mxu1 %vm6060_vm3, %v6059_v0 }
 0x57b   : > { %5341 = vmatprep.subr.mxu1 %v6059_v0 }
 0x57c   : > { %5342 = vmatpush3.msra.mxu1 %v6600_v7 }
 0x57d   : > { %5343 = vmatprep.subr.mxu1 %v6059_v0 }
 0x57e   : > { %5344 = vmatpush3.msra.mxu1 %v6609_v13 }
 0x57f   : > { %5345 = vmatprep.subr.mxu1 %v6059_v0 }
 0x580   : > { %5346 = vmatpush3.msra.mxu1 %v6616_v14 }
 0x581   : > { %5348 = vmatmul.mubr.msk.f32.vlgmr.msra.gmra.mxu1 %vm2042_vm15, %v2205_v62  ;;  %5361 = vmatprep.subr.mxu1 %v6059_v0  ;;  %v2559_v62 = vld [vmem:[#allocation2 + $0xd] sm:$0xff] }
 0x582   : > { %5369 = vmatprep.mubr.msk.f32.mxu1 %vm6060_vm3, %v6059_v0  ;;  %5362 = vmatpush3.msra.mxu1 %v6634_v16 }
 0x583   : > { %5363 = vmatprep.subr.mxu1 %v6059_v0 }
 0x584   : > { %5364 = vmatpush3.msra.mxu1 %v6644_v18 }
 0x585   : > { %5365 = vmatprep.subr.mxu1 %v6059_v0 }
 0x586   : > { %5366 = vmatpush3.msra.mxu1 %v6658_v20 }
 0x587   : > { %5367 = vmatprep.subr.mxu1 %v6059_v0 }
 0x588   : > { %5368 = vmatpush3.msra.mxu1 %v6672_v22 }
 0x589   : > { %5383 = vmatprep.subr.mxu1 %v6340_v1 }
 0x631   : > { %v2128_v24 = vpop.f32.mrf.mxu1 }
 0x633   : > { %v5327_v26 = vpop.f32.mrf.mxu1 }
 0x639   : > { %v2201_v27 = vpop.f32.mrf.mxu1 }
 0x63a   : > { %v2202_v29 = vadd.f32 %v2201_v27, %v2128_v24 }
 0x63b   : > { %v5338_v28 = vpop.f32.mrf.mxu1 }
 0x641   : > { %v2280_v30 = vpop.f32.mrf.mxu1 }
 0x642   : > { %v2284_v33 = vadd.f32 %v2280_v30, %v2202_v29 }
 0x643   : > { %v5349_v41 = vpop.f32.mrf.mxu1 }
 0x644   : > { %v2292_v42 = vadd.f32 %v6681_v31, %v2284_v33 }
 0x646   : > { %v2293_v43 = vmax.f32 %v2292_v42, 0.0 }
 0x648   : > { %2296 = vst.msk [vmem:[#allocation6 + $0x8] sm:$0x1f] %vm2046_vm1, %v2293_v43 }
 0x64f   : > { %v2302_v45 = vld [vmem:[#allocation6 + $0x8] sm:$0x1f] }
 0x650   : > { %v2297_v47 = vld [vmem:[#allocation6 + $0x7] sm:$0x1f]  ;;  %5359 = vmatmul.mubr.msk.f32.vlgmr.msra.gmra.mxu0 %vm2042_vm15, %v2302_v45 }
 0x651   : > { %v2454_v48 = vld [vmem:[#allocation6 + $0x9] sm:$0x1f]  ;;  %5370 = vmatmul.mubr.msk.f32.vlgmr.msra.gmra.mxu1 %vm2042_vm15, %v2297_v47  ;;  %4043 = vst.msk [vmem:[#allocation6] sm:$0xff] %vm2042_vm15, %v6059_v0  ;;  %5373 = vmatpush3.msra.mxu0 %v6688_v44 }
 0x652   : > { %4044 = vst.msk [vmem:[#allocation6 + $0x8] sm:$0x3f] %vm2044_vm14, %v6059_v0  ;;  %5380 = vmatprep.mubr.msk.f32.mxu0 %vm6060_vm3, %v6059_v0  ;;  %5374 = vmatprep.subr.mxu0 %v6059_v0 }
 0x653   : > { %5384 = vmatpush3.msra.mxu1 %v6340_v1  ;;  %5375 = vmatpush3.msra.mxu0 %v6697_v53  ;;  %v2558_v1 = vld [vmem:[#allocation2 + $0x5] sm:$0xff] }
 0x654   : > { %5385 = vmatprep.mubr.msk.f32.mxu1 %vm756_vm0, %v2561_v54  ;;  %5376 = vmatprep.subr.mxu0 %v6059_v0 }
 0x655   : > { %5386 = vmatmul.mubr.msk.f32.vlgmr.msra.gmra.mxu1 %vm756_vm0, %v2562_v55  ;;  %5377 = vmatpush3.msra.mxu0 %v6708_v56 }
 0x656   : > { %5393 = vmatprep.subr.mxu1 %v6347_v5  ;;  %5378 = vmatprep.subr.mxu0 %v6059_v0 }
 0x657   : > { %5394 = vmatpush3.msra.mxu1 %v6347_v5  ;;  %5379 = vmatpush3.msra.mxu0 %v6717_v57 }
 0x658   : > { %5395 = vmatprep.mubr.msk.f32.mxu1 %vm756_vm0, %v2726_v60  ;;  %5381 = vmatmul.mubr.msk.f32.vlgmr.msra.gmra.mxu0 %vm2042_vm15, %v2454_v48 }
 0x659   : > { %5388 = vmatprep.subr.mxu0 %v6342_v2  ;;  %5390 = vmatprep.mubr.msk.f32.mxu0 %vm756_vm0, %v2558_v1 }
 0x65a   : > { %5389 = vmatpush3.msra.mxu0 %v6342_v2  ;;  %5396 = vmatmul.mubr.msk.f32.vlgmr.msra.gmra.mxu1 %vm756_vm0, %v2727_v61 }
 0x65b   : > { %5398 = vmatprep.subr.mxu0 %v6059_v0  ;;  %5405 = vmatprep.subr.mxu1 %v6059_v0 }
 0x65c   : > { %5409 = vmatprep.mubr.msk.f32.mxu1 %vm6060_vm3, %v6059_v0  ;;  %5391 = vmatmul.mubr.msk.f32.vlgmr.msra.gmra.mxu0 %vm756_vm0, %v2559_v62  ;;  %vm2543_vm0 = vcmask 389120  }
 0x65d   : > { %5402 = vmatprep.mubr.msk.f32.mxu0 %vm6060_vm3, %v6059_v0 }
 0x710   : > { %v2377_v5 = vpop.f32.mrf.mxu0 }
 0x711   : > { %v2450_v24 = vpop.f32.mrf.mxu1 }
 0x712   : > { %v2451_v2 = vadd.f32 %v2450_v24, %v2377_v5  ;;  %v5360_v26 = vpop.f32.mrf.mxu0 }
 0x713   : > { %v5371_v27 = vpop.f32.mrf.mxu1 }
 0x715   : > { %v5387_v28 = vpop.f32.mrf.mxu1 }
 0x717   : > { %v2636_v30 = vpop.f32.mrf.mxu1 }
 0x718   : > { %v2529_v29 = vpop.f32.mrf.mxu0 }
 0x719   : > { %v6738_v33 = vadd.f32 %v2529_v29, %v2451_v2 }
 0x71a   : > { %v5382_v41 = vpop.f32.mrf.mxu0  ;;  %v5397_v43 = vpop.f32.mrf.mxu1 }
 0x71c   : > { %v5392_v42 = vpop.f32.mrf.mxu0  ;;  %v2801_v55 = vpop.f32.mrf.mxu1 }
 0x71d   : > { %v2723_v45 = vadd.f32 %v5392_v42, %v5387_v28 }
 0x71e   : > { %v2717_v47 = vpop.f32.mrf.mxu0 }
 0x71f   : > { %v2811_v48 = vadd.f32 %v5397_v43, %v2723_v45  ;;  %v2718_v54 = vadd.f32 %v2717_v47, %v2636_v30 }
 0x721   : > { %v2820_v60 = vadd.f32 %v6385_v23, %v2811_v48  ;;  %v2810_v1 = vadd.f32 %v2801_v55, %v2718_v54 }
 0x723   : > { %v2822_v61 = vmax.f32 %v2820_v60, 0.0  ;;  %v2819_v62 = vadd.f32 %v6385_v23, %v2810_v1 }
 0x725   : > { %v2821_v5 = vmax.f32 %v2819_v62, 0.0  ;;  %5399 = vmatpush3.msra.mxu0 %v2822_v61  ;;  %5406 = vmatpush3.msra.mxu1 %v2822_v61 }
 0x726   : > { %5400 = vmatprep.subr.mxu0 %v6059_v0  ;;  %5407 = vmatprep.subr.mxu1 %v6059_v0 }
 0x727   : > { %5401 = vmatpush3.msra.mxu0 %v2821_v5  ;;  %5408 = vmatpush3.msra.mxu1 %v2821_v5 }
 0x728   : > { %5403 = vmatmul.mubr.msk.f32.vlgmr.msra.gmra.mxu0 %vm1043_vm4, %v6390_v34  ;;  %5410 = vmatmul.mubr.msk.f32.vlgmr.msra.gmra.mxu1 %vm1043_vm4, %v6393_v35 }
 0x729   : > { %5412 = vmatprep.subr.mxu0 %v6401_v36  ;;  %5419 = vmatprep.subr.mxu1 %v6403_v37 }
 0x72a   : > { %5413 = vmatpush3.msra.mxu0 %v6401_v36  ;;  %5420 = vmatpush3.msra.mxu1 %v6403_v37 }
 0x72b   : > { %5414 = vmatprep.subr.mxu0 %v6405_v38  ;;  %5421 = vmatprep.subr.mxu1 %v6411_v39 }
 0x72c   : > { %5415 = vmatpush3.msra.mxu0 %v6405_v38  ;;  %5422 = vmatpush3.msra.mxu1 %v6411_v39 }
 0x72d   : > { %5426 = vmatprep.subr.mxu0 %v6420_v40  ;;  %5433 = vmatprep.subr.mxu1 %v6059_v0 }
 0x7e8   : > { %v2889_v23 = vpop.f32.mrf.mxu0  ;;  %v2959_v24 = vpop.f32.mrf.mxu1 }
 0x7e9   : > { %v2963_v2 = vmax.f32 %v2889_v23, %v2959_v24 }
 0x7ea   : > { %v5404_v26 = vpop.f32.mrf.mxu0  ;;  %v5411_v27 = vpop.f32.mrf.mxu1 }
 0x7eb   : > { %2967 = vst.msk [vmem:[#allocation3 + $0x8] sm:$0xff] %vm1043_vm4, %v2963_v2 }
 0x7f2   : > { %v2972_v36 = vld [vmem:[#allocation3 + $0x6] sm:$0xff]  ;;  %v2973_v28 = vld [vmem:[#allocation3 + $0xe] sm:$0xf] }
 0x7f3   : > { %v2968_v37 = vld [vmem:[#allocation3 + $0x5] sm:$0xff]  ;;  %5416 = vmatprep.mubr.msk.f32.mxu0 %vm1043_vm4, %v2972_v36  ;;  %v2969_v38 = vld [vmem:[#allocation3 + $0xd] sm:$0xf] }
 0x7f4   : > { %5423 = vmatprep.mubr.msk.f32.mxu1 %vm1043_vm4, %v2968_v37  ;;  %5417 = vmatmul.mubr.msk.f32.vlgmr.msra.gmra.mxu0 %vm1043_vm4, %v2973_v28  ;;  %v3138_v39 = vld [vmem:[#allocation3 + $0x7] sm:$0xff]  ;;  %v3139_v29 = vld [vmem:[#allocation3 + $0xf] sm:$0xf] }
 0x7f5   : > { %5424 = vmatmul.mubr.msk.f32.vlgmr.msra.gmra.mxu1 %vm1043_vm4, %v2969_v38  ;;  %5427 = vmatpush3.msra.mxu0 %v6420_v40 }
 0x7f6   : > { %5430 = vmatprep.mubr.msk.f32.mxu0 %vm1043_vm4, %v3138_v39  ;;  %5428 = vmatprep.subr.mxu0 %v6424_v46 }
 0x7f7   : > { %5437 = vmatprep.mubr.msk.f32.mxu1 %vm6060_vm3, %v6059_v0  ;;  %5429 = vmatpush3.msra.mxu0 %v6424_v46 }
 0x7f8   : > { %5431 = vmatmul.mubr.msk.f32.vlgmr.msra.gmra.mxu0 %vm1043_vm4, %v3139_v29  ;;  %5440 = vmatprep.subr.mxu0 %v6059_v0 }
 0x7f9   : > { %5444 = vmatprep.mubr.msk.f32.mxu0 %vm6060_vm3, %v6059_v0 }
 0x8b4   : > { %v5418_v30 = vpop.f32.mrf.mxu0 }
 0x8b5   : > { %v5425_v41 = vpop.f32.mrf.mxu1 }
 0x8b6   : > { %v3048_v40 = vpop.f32.mrf.mxu0  ;;  %v3135_v43 = vadd.f32 %v5425_v41, %v5418_v30 }
 0x8b7   : > { %v3129_v42 = vpop.f32.mrf.mxu1 }
 0x8b8   : > { %v5432_v45 = vpop.f32.mrf.mxu0  ;;  %v3130_v47 = vadd.f32 %v3129_v42, %v3048_v40 }
 0x8b9   : > { %v3224_v48 = vadd.f32 %v5432_v45, %v3135_v43 }
 0x8ba   : > { %v3214_v54 = vpop.f32.mrf.mxu0 }
 0x8bb   : > { %v3233_v55 = vadd.f32 %v6446_v59, %v3224_v48  ;;  %v3223_v46 = vadd.f32 %v3214_v54, %v3130_v47  ;;  %v4299_v54 = vld [vmem:[%s7117_s12 + $0x10] sm:$0xff] }
 0x8bd   : > { %v3235_v60 = vmax.f32 %v3233_v55, 0.0  ;;  %v3232_v1 = vadd.f32 %v6446_v59, %v3223_v46  ;;  %v4298_v46 = vld [vmem:[%s7117_s12 + $0x8] sm:$0xff] }
 0x8bf   : > { %v3234_v61 = vmax.f32 %v3232_v1, 0.0  ;;  %5434 = vmatpush3.msk.msra.mxu1 %vm1469_vm8, %v3235_v60  ;;  %5441 = vmatpush3.msk.msra.mxu0 %vm1469_vm8, %v3235_v60  ;;  %v4297_v60 = vld [vmem:[%s7117_s12] sm:$0xff] }
 0x8c0   : > { %5435 = vmatprep.subr.mxu1 %v6059_v0  ;;  %5442 = vmatprep.subr.mxu0 %v6059_v0 }
 0x8c1   : > { %5436 = vmatpush3.msra.mxu1 %v3234_v61  ;;  %5443 = vmatpush3.msra.mxu0 %v3234_v61  ;;  %v4308_v61 = vld [vmem:[%s7117_s12 + $0x58] sm:$0xff] }
 0x8c2   : > { %5438 = vmatmul.mubr.msk.f32.vlgmr.msra.gmra.mxu1 %vm1466_vm9, %v6390_v34  ;;  %5445 = vmatmul.mubr.msk.f32.vlgmr.msra.gmra.mxu0 %vm1466_vm9, %v6393_v35 }
 0x8c3   : > { %5447 = vmatprep.subr.mxu1 %v6458_v8  ;;  %5454 = vmatprep.subr.mxu0 %v6460_v9 }
 0x8c4   : > { %5448 = vmatpush3.msra.mxu1 %v6458_v8  ;;  %5455 = vmatpush3.msra.mxu0 %v6460_v9  ;;  %v3389_v8 = vld [vmem:[#allocation4 + $0xe] sm:$0x3] }
 0x8c5   : > { %5449 = vmatprep.subr.mxu1 %v6462_v10  ;;  %5456 = vmatprep.subr.mxu0 %v6466_v11 }
 0x8c6   : > { %5450 = vmatpush3.msra.mxu1 %v6462_v10  ;;  %5457 = vmatpush3.msra.mxu0 %v6466_v11  ;;  %v3555_v11 = vld [vmem:[#allocation4 + $0xf] sm:$0x3] }
 0x8c7   : > { %5461 = vmatprep.subr.mxu1 %v6476_v12  ;;  %5468 = vmatprep.subr.mxu0 %v6059_v0 }
 0x982   : > { %v3305_v59 = vpop.f32.mrf.mxu1  ;;  %v3375_v62 = vpop.f32.mrf.mxu0 }
 0x983   : > { %v3379_v5 = vmax.f32 %v3305_v59, %v3375_v62  ;;  %v4307_v59 = vld [vmem:[%s7117_s12 + $0x50] sm:$0xff]  ;;  %v4306_v62 = vld [vmem:[%s7117_s12 + $0x48] sm:$0xff] }
 0x984   : > { %v5439_v23 = vpop.f32.mrf.mxu1  ;;  %v5446_v24 = vpop.f32.mrf.mxu0 }
 0x985   : > { %3383 = vst.msk [vmem:[#allocation4 + $0x8] sm:$0x3f] %vm1620_vm11, %v3379_v5  ;;  %v4305_v5 = vld [vmem:[%s7117_s12 + $0x40] sm:$0xff]  ;;  %v4304_v23 = vld [vmem:[%s7117_s12 + $0x38] sm:$0xff]  ;;  %v4303_v24 = vld [vmem:[%s7117_s12 + $0x30] sm:$0xff] }
 0x98c   : > { %v3388_v9 = vld [vmem:[#allocation4 + $0x6] sm:$0xff] }
 0x98d   : > { %v3384_v2 = vld [vmem:[#allocation4 + $0x5] sm:$0xff]  ;;  %v3385_v26 = vld [vmem:[#allocation4 + $0xd] sm:$0x3]  ;;  %5451 = vmatprep.mubr.msk.f32.mxu1 %vm1043_vm4, %v3388_v9 }
 0x98e   : > { %5458 = vmatprep.mubr.msk.f32.mxu0 %vm1043_vm4, %v3384_v2  ;;  %5452 = vmatmul.mubr.msk.f32.vlgmr.msra.gmra.mxu1 %vm1043_vm4, %v3389_v8  ;;  %v3554_v10 = vld [vmem:[#allocation4 + $0x7] sm:$0xff] }
 0x98f   : > { %5459 = vmatmul.mubr.msk.f32.vlgmr.msra.gmra.mxu0 %vm1043_vm4, %v3385_v26  ;;  %5462 = vmatpush3.msra.mxu1 %v6476_v12 }
 0x990   : > { %5465 = vmatprep.mubr.msk.f32.mxu1 %vm1043_vm4, %v3554_v10  ;;  %5463 = vmatprep.subr.mxu1 %v6483_v25 }
 0x991   : > { %5472 = vmatprep.mubr.msk.f32.mxu0 %vm6060_vm3, %v6059_v0  ;;  %5464 = vmatpush3.msra.mxu1 %v6483_v25 }
 0x992   : > { %5466 = vmatmul.mubr.msk.f32.vlgmr.msra.gmra.mxu1 %vm1043_vm4, %v3555_v11  ;;  %5475 = vmatprep.subr.mxu1 %v6059_v0  ;;  %vm4468_vm4 = vcmask 523264  }
 0x993   : > { %5479 = vmatprep.mubr.msk.f32.mxu1 %vm6060_vm3, %v6059_v0 }
 0xa4e   : > { %v5453_v27 = vpop.f32.mrf.mxu1 }
 0xa4f   : > { %v5460_v36 = vpop.f32.mrf.mxu0 }
 0xa50   : > { %v3464_v12 = vpop.f32.mrf.mxu1  ;;  %v3551_v28 = vadd.f32 %v5460_v36, %v5453_v27 }
 0xa51   : > { %v3545_v37 = vpop.f32.mrf.mxu0 }
 0xa52   : > { %v5467_v38 = vpop.f32.mrf.mxu1  ;;  %v3546_v39 = vadd.f32 %v3545_v37, %v3464_v12 }
 0xa53   : > { %v3640_v29 = vadd.f32 %v5467_v38, %v3551_v28 }
 0xa54   : > { %v3630_v30 = vpop.f32.mrf.mxu1 }
 0xa55   : > { %v3649_v41 = vadd.f32 %v6501_v32, %v3640_v29  ;;  %v3639_v40 = vadd.f32 %v3630_v30, %v3546_v39 }
 0xa57   : > { %v3651_v25 = vmax.f32 %v3649_v41, 0.0  ;;  %v3648_v42 = vadd.f32 %v6501_v32, %v3639_v40 }
 0xa59   : > { %v3650_v43 = vmax.f32 %v3648_v42, 0.0  ;;  %5469 = vmatpush3.msk.msra.mxu0 %vm1895_vm12, %v3651_v25  ;;  %5476 = vmatpush3.msk.msra.mxu1 %vm1895_vm12, %v3651_v25 }
 0xa5a   : > { %5470 = vmatprep.subr.mxu0 %v6059_v0  ;;  %5477 = vmatprep.subr.mxu1 %v6059_v0 }
 0xa5b   : > { %5471 = vmatpush3.msra.mxu0 %v3650_v43  ;;  %5478 = vmatpush3.msra.mxu1 %v3650_v43  ;;  %v4466_v43 = vld [vmem:[%s7119_s14 + $0x38] sm:$0xff] }
 0xa5c   : > { %5473 = vmatmul.mubr.msk.f32.vlgmr.msra.gmra.mxu0 %vm1892_vm13, %v6390_v34  ;;  %5480 = vmatmul.mubr.msk.f32.vlgmr.msra.gmra.mxu1 %vm1892_vm13, %v6393_v35 }
 0xa5d   : > { %5482 = vmatprep.subr.mxu0 %v6059_v0  ;;  %5493 = vmatprep.subr.mxu1 %v6059_v0 }
 0xa5e   : > { %5483 = vmatpush3.msra.mxu0 %v6526_v49  ;;  %5494 = vmatpush3.msra.mxu1 %v6559_v58 }
 0xa5f   : > { %5484 = vmatprep.subr.mxu0 %v6059_v0  ;;  %5495 = vmatprep.subr.mxu1 %v6059_v0 }
 0xa60   : > { %5485 = vmatpush3.msra.mxu0 %v6531_v50  ;;  %5496 = vmatpush3.msra.mxu1 %v6565_v63 }
 0xa61   : > { %5486 = vmatprep.subr.mxu0 %v6059_v0  ;;  %5497 = vmatprep.subr.mxu1 %v6059_v0 }
 0xa62   : > { %5487 = vmatpush3.msra.mxu0 %v6542_v51  ;;  %5498 = vmatpush3.msra.mxu1 %v6578_v3 }
 0xa63   : > { %5488 = vmatprep.subr.mxu0 %v6059_v0  ;;  %5499 = vmatprep.subr.mxu1 %v6059_v0 }
 0xa64   : > { %5489 = vmatpush3.msra.mxu0 %v6549_v52  ;;  %5490 = vmatprep.mubr.msk.f32.mxu0 %vm6060_vm3, %v6059_v0 }
 0xa65   : > { %5500 = vmatpush3.msra.mxu1 %v6585_v4  ;;  %5501 = vmatprep.mubr.msk.f32.mxu1 %vm6060_vm3, %v6059_v0 }
 0xa66   : > { %5504 = vmatprep.subr.mxu0 %v6059_v0  ;;  %5515 = vmatprep.subr.mxu1 %v6059_v0 }
 0xb1c   : > { %v3721_v34 = vpop.f32.mrf.mxu0  ;;  %v3791_v35 = vpop.f32.mrf.mxu1 }
 0xb1d   : > { %v3795_v32 = vmax.f32 %v3721_v34, %v3791_v35  ;;  %v4465_v34 = vld [vmem:[%s7119_s14 + $0x30] sm:$0xff]  ;;  %v4464_v35 = vld [vmem:[%s7119_s14 + $0x28] sm:$0xff] }
 0xb1e   : > { %v5474_v49 = vpop.f32.mrf.mxu0  ;;  %v5481_v50 = vpop.f32.mrf.mxu1 }
 0xb1f   : > { %3798 = vst.msk [vmem:[#allocation5 + $0x8] sm:$0x1f] %vm2046_vm1, %v3795_v32  ;;  %v4463_v32 = vld [vmem:[%s7119_s14 + $0x20] sm:$0xff]  ;;  %v4462_v49 = vld [vmem:[%s7119_s14 + $0x18] sm:$0xff]  ;;  %v4461_v50 = vld [vmem:[%s7119_s14 + $0x10] sm:$0xff] }
 0xb26   : > { %v3804_v51 = vld [vmem:[#allocation5 + $0x8] sm:$0x1f] }
 0xb27   : > { %v3799_v52 = vld [vmem:[#allocation5 + $0x7] sm:$0x1f]  ;;  %5491 = vmatmul.mubr.msk.f32.vlgmr.msra.gmra.mxu0 %vm2042_vm15, %v3804_v51 }
 0xb28   : > { %5502 = vmatmul.mubr.msk.f32.vlgmr.msra.gmra.mxu1 %vm2042_vm15, %v3799_v52  ;;  %5505 = vmatpush3.msra.mxu0 %v6592_v6  ;;  %v3955_v58 = vld [vmem:[#allocation5 + $0x9] sm:$0x1f]  ;;  %v4460_v51 = vld [vmem:[%s7119_s14 + $0x8] sm:$0xff]  ;;  %v4459_v52 = vld [vmem:[%s7119_s14] sm:$0xff] }
 0xb29   : > { %5512 = vmatprep.mubr.msk.f32.mxu0 %vm6060_vm3, %v6059_v0  ;;  %5506 = vmatprep.subr.mxu0 %v6059_v0 }
 0xb2a   : > { %5516 = vmatpush3.msra.mxu1 %v6628_v15  ;;  %5507 = vmatpush3.msra.mxu0 %v6600_v7  ;;  %v6874_v7 = vld [vmem:[#allocation19] ss:$0 sm:$0xff] }
 0xb2b   : > { %5517 = vmatprep.subr.mxu1 %v6059_v0  ;;  %5508 = vmatprep.subr.mxu0 %v6059_v0 }
 0xb2c   : > { %5518 = vmatpush3.msra.mxu1 %v6639_v17  ;;  %5509 = vmatpush3.msra.mxu0 %v6609_v13 }
 0xb2d   : > { %5519 = vmatprep.subr.mxu1 %v6059_v0  ;;  %5510 = vmatprep.subr.mxu0 %v6059_v0 }
 0xb2e   : > { %5520 = vmatpush3.msra.mxu1 %v6651_v19  ;;  %5511 = vmatpush3.msra.mxu0 %v6616_v14 }
 0xb2f   : > { %5521 = vmatprep.subr.mxu1 %v6059_v0  ;;  %5513 = vmatmul.mubr.msk.f32.vlgmr.msra.gmra.mxu0 %vm2042_vm15, %v3955_v58  ;;  %v4550_v58 = vld [vmem:[%s7121_s16 + $0x38] sm:$0xff] }
 0xb30   : > { %5526 = vmatprep.subr.mxu0 %v6059_v0  ;;  %5522 = vmatpush3.msra.mxu1 %v6665_v21 }
 0xb31   : > { %5527 = vmatpush3.msra.mxu0 %v6634_v16  ;;  %5523 = vmatprep.mubr.msk.f32.mxu1 %vm6060_vm3, %v6059_v0  ;;  %v2541_v16 = vadd.f32 %v6874_v7, %v6738_v33 }
 0xb32   : > { %5528 = vmatprep.subr.mxu0 %v6059_v0  ;;  %5534 = vmatprep.mubr.msk.f32.mxu0 %vm6060_vm3, %v6059_v0 }
 0xb33   : > { %5529 = vmatpush3.msra.mxu0 %v6644_v18  ;;  %5537 = vmatprep.subr.mxu1 %v6059_v0 }
 0xb34   : > { %5530 = vmatprep.subr.mxu0 %v6059_v0 }
 0xb35   : > { %5531 = vmatpush3.msra.mxu0 %v6658_v20  ;;  %v2542_v20 = vmax.f32 %v2541_v16, 0.0 }
 0xb36   : > { %5532 = vmatprep.subr.mxu0 %v6059_v0 }
 0xb37   : > { %5533 = vmatpush3.msra.mxu0 %v6672_v22  ;;  %v2544_v21 = vsel %vm2543_vm0, %v2542_v20, -inf  ;;  %v4543_v20 = vld [vmem:[%s7121_s16] sm:$0xff] }
 0xb38   : > { %5548 = vmatprep.subr.mxu0 %v6059_v0  ;;  %v2545_v22 = vrot.slane %v2544_v21, 4 }
 0xbe7   : > { %v3878_v63 = vpop.f32.mrf.mxu0 }
 0xbe8   : > { %v3951_v3 = vpop.f32.mrf.mxu1 }
 0xbe9   : > { %v5492_v4 = vpop.f32.mrf.mxu0  ;;  %v3952_v13 = vadd.f32 %v3951_v3, %v3878_v63  ;;  %v4549_v63 = vld [vmem:[%s7121_s16 + $0x30] sm:$0xff]  ;;  %v4548_v3 = vld [vmem:[%s7121_s16 + $0x28] sm:$0xff] }
 0xbea   : > { %v5503_v6 = vpop.f32.mrf.mxu1  ;;  %v4547_v4 = vld [vmem:[%s7121_s16 + $0x20] sm:$0xff] }
 0xbeb   : > { %v4546_v6 = vld [vmem:[%s7121_s16 + $0x18] sm:$0xff] }
 0xbef   : > { %v4029_v14 = vpop.f32.mrf.mxu0 }
 0xbf0   : > { %v4033_v15 = vadd.f32 %v4029_v14, %v3952_v13  ;;  %v4456_v13 = vld [vmem:[%s7118_s13] sm:$0x1] }
 0xbf1   : > { %v5514_v17 = vpop.f32.mrf.mxu0 }
 0xbf2   : > { %v4041_v18 = vadd.f32 %v6681_v31, %v4033_v15  ;;  %v2546_v31 = vmax.f32 %v2544_v21, %v2545_v22  ;;  %v4633_v21 = vld [vmem:[%s7123_s18 + $0x38] sm:$0xff]  ;;  %v4632_v22 = vld [vmem:[%s7123_s18 + $0x30] sm:$0xff] }
 0xbf4   : > { %v4042_v19 = vmax.f32 %v4041_v18, 0.0  ;;  %v2547_v33 = vrot.slane %v2546_v31, 2  ;;  %v4545_v18 = vld [vmem:[%s7121_s16 + $0x10] sm:$0xff] }
 0xbf6   : > { %4045 = vst.msk [vmem:[#allocation6 + $0x8] sm:$0x1f] %vm2046_vm1, %v4042_v19  ;;  %v4544_v19 = vld [vmem:[%s7121_s16 + $0x8] sm:$0xff] }
 0xbfd   : > { %v4051_v45 = vld [vmem:[#allocation6 + $0x8] sm:$0x1f] }
 0xbfe   : > { %v4046_v47 = vld [vmem:[#allocation6 + $0x7] sm:$0x1f]  ;;  %5524 = vmatmul.mubr.msk.f32.vlgmr.msra.gmra.mxu1 %vm2042_vm15, %v4051_v45  ;;  %v4631_v45 = vld [vmem:[%s7123_s18 + $0x28] sm:$0xff] }
 0xbff   : > { %5535 = vmatmul.mubr.msk.f32.vlgmr.msra.gmra.mxu0 %vm2042_vm15, %v4046_v47  ;;  %5538 = vmatpush3.msra.mxu1 %v6688_v44  ;;  %v4302_v44 = vld [vmem:[%s7117_s12 + $0x28] sm:$0xff]  ;;  %v4202_v48 = vld [vmem:[#allocation6 + $0x9] sm:$0x1f] }
 0xc00   : > { %5545 = vmatprep.mubr.msk.f32.mxu1 %vm6060_vm3, %v6059_v0  ;;  %5539 = vmatprep.subr.mxu1 %v6059_v0  ;;  %v4630_v47 = vld [vmem:[%s7123_s18 + $0x20] sm:$0xff] }
 0xc01   : > { %5560 = vmatprep.mubr.msk.f32.mxu0 %vm6060_vm3, %v6059_v0  ;;  %5540 = vmatpush3.msra.mxu1 %v6697_v53  ;;  %v4301_v53 = vld [vmem:[%s7117_s12 + $0x20] sm:$0xff] }
 0xc02   : > { %5541 = vmatprep.subr.mxu1 %v6059_v0  ;;  %5549 = vmatpush3.msra.mxu0 %v4308_v61 }
 0xc03   : > { %5542 = vmatpush3.msra.mxu1 %v6708_v56  ;;  %v2548_v56 = vmax.f32 %v2546_v31, %v2547_v33  ;;  %5550 = vmatprep.subr.mxu0 %v6059_v0  ;;  %v4629_v31 = vld [vmem:[%s7123_s18 + $0x18] sm:$0xff]  ;;  %v4467_v33 = vld [vmem:[%s7120_s15] sm:$0x1] }
 0xc04   : > { %5543 = vmatprep.subr.mxu1 %v6059_v0  ;;  %5551 = vmatpush3.msra.mxu0 %v4307_v59 }
 0xc05   : > { %5544 = vmatpush3.msra.mxu1 %v6717_v57  ;;  %v4300_v57 = vld [vmem:[%s7117_s12 + $0x18] sm:$0xff]  ;;  %v2549_v55 = vrot.slane %v2548_v56, 1  ;;  %5552 = vmatprep.subr.mxu0 %v6059_v0 }
 0xc06   : > { %5546 = vmatmul.mubr.msk.f32.vlgmr.msra.gmra.mxu1 %vm2042_vm15, %v4202_v48  ;;  %5563 = vmatprep.subr.mxu1 %v6059_v0 }
 0xc07   : > { %5564 = vmatpush3.msra.mxu1 %v4302_v44  ;;  %5575 = vmatprep.mubr.msk.f32.mxu1 %vm6060_vm3, %v6059_v0  ;;  %v2550_v1 = vmax.f32 %v2548_v56, %v2549_v55  ;;  %v4626_v55 = vld [vmem:[%s7123_s18] sm:$0xff] }
 0xc08   : > { %5565 = vmatprep.subr.mxu1 %v6059_v0  ;;  %5553 = vmatpush3.msra.mxu0 %v4306_v62 }
 0xc09   : > { %5566 = vmatpush3.msra.mxu1 %v4301_v53  ;;  %5554 = vmatprep.subr.mxu0 %v6059_v0 }
 0xc0a   : > { %5567 = vmatprep.subr.mxu1 %v6059_v0  ;;  %5555 = vmatpush3.msra.mxu0 %v4305_v5 }
 0xc0b   : > { %5568 = vmatpush3.msra.mxu1 %v4300_v57  ;;  %5556 = vmatprep.subr.mxu0 %v6059_v0  ;;  %v4628_v57 = vld [vmem:[%s7123_s18 + $0x10] sm:$0xff] }
 0xc0c   : > { %5569 = vmatprep.subr.mxu1 %v6059_v0  ;;  %5557 = vmatpush3.msra.mxu0 %v4304_v23 }
 0xc0d   : > { %5570 = vmatpush3.msra.mxu1 %v4299_v54  ;;  %5558 = vmatprep.subr.mxu0 %v6059_v0  ;;  %v4627_v54 = vld [vmem:[%s7123_s18 + $0x8] sm:$0xff] }
 0xc0e   : > { %5571 = vmatprep.subr.mxu1 %v6059_v0  ;;  %5559 = vmatpush3.msra.mxu0 %v4303_v24 }
 0xc0f   : > { %5572 = vmatpush3.msra.mxu1 %v4298_v46  ;;  %5578 = vmatprep.subr.mxu0 %v6059_v0  ;;  %v4551_v46 = vld [vmem:[%s7122_s17] sm:$0x1] }
 0xc10   : > { %5573 = vmatprep.subr.mxu1 %v6059_v0 }
 0xc11   : > { %5574 = vmatpush3.msra.mxu1 %v4297_v60 }
 0xc12   : > { %5576 = vmatmul.mubr.msk.f32.vlgmr.msra.gmra.mxu1 %vm4309_vm2, %v2550_v1  ;;  %5597 = vmatprep.subr.mxu1 %v6059_v0 }
 0xc13   : > { %5613 = vmatprep.mubr.msk.f32.mxu1 %vm6060_vm3, %v6059_v0  ;;  %5598 = vmatpush3.msra.mxu1 %v4550_v58 }
 0xc14   : > { %5599 = vmatprep.subr.mxu1 %v6059_v0 }
 0xc15   : > { %5600 = vmatpush3.msra.mxu1 %v4549_v63 }
 0xc16   : > { %5601 = vmatprep.subr.mxu1 %v6059_v0 }
 0xc17   : > { %5602 = vmatpush3.msra.mxu1 %v4548_v3 }
 0xc18   : > { %5603 = vmatprep.subr.mxu1 %v6059_v0 }
 0xc19   : > { %5604 = vmatpush3.msra.mxu1 %v4547_v4 }
 0xc1a   : > { %5605 = vmatprep.subr.mxu1 %v6059_v0 }
 0xc1b   : > { %5606 = vmatpush3.msra.mxu1 %v4546_v6 }
 0xc1c   : > { %5607 = vmatprep.subr.mxu1 %v6059_v0 }
 0xc1d   : > { %5608 = vmatpush3.msra.mxu1 %v4545_v18 }
 0xc1e   : > { %5609 = vmatprep.subr.mxu1 %v6059_v0 }
 0xc1f   : > { %5610 = vmatpush3.msra.mxu1 %v4544_v19 }
 0xc20   : > { %5611 = vmatprep.subr.mxu1 %v6059_v0 }
 0xc21   : > { %5612 = vmatpush3.msra.mxu1 %v4543_v20 }
 0xcbe   : > { %v4125_v8 = vpop.f32.mrf.mxu1 }
 0xcbf   : > { %v4198_v9 = vpop.f32.mrf.mxu0 }
 0xcc0   : > { %v5525_v2 = vpop.f32.mrf.mxu1  ;;  %v4199_v10 = vadd.f32 %v4198_v9, %v4125_v8 }
 0xcc1   : > { %v5536_v26 = vpop.f32.mrf.mxu0 }
 0xcc6   : > { %v4276_v11 = vpop.f32.mrf.mxu1 }
 0xcc7   : > { %v4280_v27 = vadd.f32 %v4276_v11, %v4199_v10 }
 0xcc8   : > { %v5547_v36 = vpop.f32.mrf.mxu1 }
 0xcc9   : > { %v4288_v12 = vadd.f32 %v6874_v7, %v4280_v27 }
 0xccb   : > { %v4289_v37 = vmax.f32 %v4288_v12, 0.0 }
 0xccd   : > { %v4290_v28 = vsel %vm2543_vm0, %v4289_v37, -inf }
 0xcce   : > { %v4291_v38 = vrot.slane %v4290_v28, 4 }
 0xcd0   : > { %v4292_v39 = vmax.f32 %v4290_v28, %v4291_v38 }
 0xcd2   : > { %v4293_v29 = vrot.slane %v4292_v39, 2  ;;  %v4452_v30 = vpop.f32.mrf.mxu1 }
 0xcd4   : > { %v4294_v41 = vmax.f32 %v4292_v39, %v4293_v29  ;;  %v5577_v40 = vpop.f32.mrf.mxu1 }
 0xcd6   : > { %v4295_v25 = vrot.slane %v4294_v41, 1 }
 0xcd8   : > { %v4296_v42 = vmax.f32 %v4294_v41, %v4295_v25 }
 0xcda   : > { %5561 = vmatmul.mubr.msk.f32.vlgmr.msra.gmra.mxu0 %vm4309_vm2, %v4296_v42 }
 0xcdb   : > { %5579 = vmatpush3.msra.mxu0 %v4466_v43  ;;  %5594 = vmatprep.mubr.msk.f32.mxu0 %vm6060_vm3, %v6059_v0 }
 0xcdc   : > { %5580 = vmatprep.subr.mxu0 %v6059_v0 }
 0xcdd   : > { %5581 = vmatpush3.msra.mxu0 %v4465_v34 }
 0xcde   : > { %5582 = vmatprep.subr.mxu0 %v6059_v0 }
 0xcdf   : > { %5583 = vmatpush3.msra.mxu0 %v4464_v35 }
 0xce0   : > { %5584 = vmatprep.subr.mxu0 %v6059_v0 }
 0xce1   : > { %5585 = vmatpush3.msra.mxu0 %v4463_v32 }
 0xce2   : > { %5586 = vmatprep.subr.mxu0 %v6059_v0 }
 0xce3   : > { %5587 = vmatpush3.msra.mxu0 %v4462_v49 }
 0xce4   : > { %5588 = vmatprep.subr.mxu0 %v6059_v0 }
 0xce5   : > { %5589 = vmatpush3.msra.mxu0 %v4461_v50 }
 0xce6   : > { %5590 = vmatprep.subr.mxu0 %v6059_v0 }
 0xce7   : > { %5591 = vmatpush3.msra.mxu0 %v4460_v51 }
 0xce8   : > { %5592 = vmatprep.subr.mxu0 %v6059_v0 }
 0xce9   : > { %5593 = vmatpush3.msra.mxu0 %v4459_v52 }
 0xcea   : > { %5616 = vmatprep.subr.mxu0 %v6059_v0 }
 0xd9a   : > { %v4379_v7 = vpop.f32.mrf.mxu0 }
 0xd9b   : > { %v4453_v14 = vadd.f32 %v4452_v30, %v4379_v7 }
 0xd9c   : > { %v5562_v15 = vpop.f32.mrf.mxu0 }
 0xd9d   : > { %v4457_v16 = vadd.f32 %v4456_v13, %v4453_v14 }
 0xd9f   : > { %v4458_v17 = vmax.f32 %v4457_v16, 0.0 }
 0xda1   : > { %5595 = vmatmul.mubr.msk.f32.vlgmr.msra.gmra.mxu0 %vm4468_vm4, %v4458_v17 }
 0xda2   : > { %5632 = vmatprep.mubr.msk.f32.mxu0 %vm6060_vm3, %v6059_v0  ;;  %5617 = vmatpush3.msra.mxu0 %v4633_v21  ;;  %vm4708_vm3 = vcmask 24576  }
 0xda3   : > { %5618 = vmatprep.subr.mxu0 %v6059_v0 }
 0xda4   : > { %5619 = vmatpush3.msra.mxu0 %v4632_v22 }
 0xda5   : > { %5620 = vmatprep.subr.mxu0 %v6059_v0 }
 0xda6   : > { %5621 = vmatpush3.msra.mxu0 %v4631_v45 }
 0xda7   : > { %5622 = vmatprep.subr.mxu0 %v6059_v0 }
 0xda8   : > { %5623 = vmatpush3.msra.mxu0 %v4630_v47 }
 0xda9   : > { %5624 = vmatprep.subr.mxu0 %v6059_v0 }
 0xdaa   : > { %5625 = vmatpush3.msra.mxu0 %v4629_v31 }
 0xdab   : > { %5626 = vmatprep.subr.mxu0 %v6059_v0 }
 0xdac   : > { %5627 = vmatpush3.msra.mxu0 %v4628_v57 }
 0xdad   : > { %5628 = vmatprep.subr.mxu0 %v6059_v0 }
 0xdae   : > { %5629 = vmatpush3.msra.mxu0 %v4627_v54 }
 0xdaf   : > { %5630 = vmatprep.subr.mxu0 %v6059_v0  ;;  %v4634_v0 = vld [vmem:[%s7124_s19] sm:$0x1] }
 0xdb0   : > { %5631 = vmatpush3.msra.mxu0 %v4626_v55 }
 0xe61   : > { %v4538_v44 = vpop.f32.mrf.mxu0 }
 0xe62   : > { %v4539_v48 = vadd.f32 %v4538_v44, %v4467_v33 }
 0xe63   : > { %v5596_v53 = vpop.f32.mrf.mxu0 }
 0xe64   : > { %v4542_v56 = vmax.f32 %v4539_v48, 0.0 }
 0xe66   : > { %5614 = vmatmul.mubr.msk.f32.vlgmr.msra.gmra.mxu1 %vm4468_vm4, %v4542_v56 }
 0xf26   : > { %v4621_v60 = vpop.f32.mrf.mxu1 }
 0xf27   : > { %v4622_v1 = vadd.f32 %v4621_v60, %v4551_v46 }
 0xf28   : > { %v5615_v61 = vpop.f32.mrf.mxu1 }
 0xf29   : > { %v4625_v59 = vmax.f32 %v4622_v1, 0.0 }
 0xf2b   : > { %5633 = vmatmul.mubr.msk.f32.vlgmr.msra.gmra.mxu0 %vm4468_vm4, %v4625_v59 }
 0xfeb   : > { %v4704_v62 = vpop.f32.mrf.mxu0 }
 0xfec   : > { %v4705_v5 = vadd.f32 %v4704_v62, %v4634_v0 }
 0xfed   : > { %v5634_v23 = vpop.f32.mrf.mxu0 }
 0xfee   : > { %4709 = vst.msk [vmem:[%s743_s3] sm:$0x1] %vm4708_vm3, %v4705_v5 }
 0xfef   : > { %5980 = shalt.err (!%p5977_p0)
}
 0xff0   : > { %s5981_s24 = scalar_lea.hbm %s7070_s23, 16  ;;  %s5985_s29 = scalar_lea.hbm %s7171_s26, 32 }
 0xff1   : > { %p5982_p12 = scmp.ne.s32.totalorder %s7070_s23, %s5981_s24  ;;  %p5986_p9 = scmp.lt.s32.totalorder %s7070_s23, %s7171_s26 }
 0xff2   : > { %p5987_p3 = scmp.lt.s32.totalorder %s5985_s29, %s5981_s24 }
 0xff3   : > { %p5983_p1 = pnand %p5982_p12, %p7172_p10 }
 0xff4   : > { %p5988_p5 = por %p5987_p3, %p5986_p9 }
 0xff5   : > { %p5984_p2 = pneg %p5983_p1 }
 0xff7   : > { %p5989_p6 = pnand %p5988_p5, %p5984_p2 }
 0xff9   : > { %5992 = shalt.err (!%p5989_p6)
}
 0xffa   : > { %5667 = dma.vmem_to_hbm [thread:$0]  (%p7172_p10), %s4724_s30, 16, %s7070_s23, %s4711_s1  }
 0xffb PF: > { %s7173_s28 = sld [smem:[#allocation30_spill]] }
 0xffc   : > { %s7174_s20 = sld [smem:[#allocation28_spill]] }
 0xffd   : > { %s7175_s2 = sld [smem:[#allocation33_spill]] }
0x1001   : > { %p5714_p4 = scmp.ge.s32.totalorder %s7173_s28, 2 }
0x1002   : > { %s4735_s5 = sand.u32 1, %s7174_s20  }
0x1003   : > { %p7176_p7 = scmp.ne.s32.totalorder %s7175_s2, 0  ;;  %s4736_s0 = scalar_lea.sflag [#allocation9], %s4735_s5 }
0x1005   : > { %p5695_p13 = pnand %p5714_p4, %p7176_p7 }
0x1007   : > { %p5696_p8 = pneg %p5695_p13 }
0x1009   : > { %6030 = dma.done.wait (%p5696_p8), %s4736_s0, 16  }
0x100a   : > { %6032 = vsyncadd (%p5696_p8), %s4736_s0, 4294967280  ;;  %s7177_s24 = sld [smem:[#allocation31_spill]]  ;;  %s7180_s1 = smov %s6039_s22 }
0x100b   : > { %s7178_s25 = sld [smem:[#allocation29_spill]] }
0x100c   : > { %s7179_s23 = sld [smem:[#allocation32_spill]] }
0x1010   : > { %p35_p11 = scmp.ge.s32.totalorder %s7177_s24, 4  }
0x1011   : > { %s7181_s22 = smov %s7178_s25 }
0x1012   :  { %37 = sbr.rel (!%p35_p11) target bundleno = 16 (0x10), region = 181 }
0x1017   :  { %4740 = vsyncpa [#allocation8], 1 }
0x1018   :  { %4742 = vsyncpa [#allocation8 + $0x1], 1 }
0x1019   :  { %4743 = vsyncpa [#allocation11], 1 }
0x101a   :  { %4744 = vsyncpa [#allocation14], 1 }
0x101b   :  { %4745 = vsyncpa [#allocation17], 1 }
0x101c   :  { %4746 = vsyncpa [#allocation20], 1 }
0x101d   :  { %4747 = vsyncpa [#allocation9], 1 }
0x101e   :  { %4749 = vsyncpa [#allocation9 + $0x1], 1 }

</bundles_post_ra>
